<compile_context>
chip_gen: v6e
topology: v6e:2x2x1
jax: 0.10.0
libtpu: 0.0.40
codegen_flags: <defaults>
</compile_context>

<pallas_src>
import functools

import jax
import jax.numpy as jnp
from jax.experimental import pallas as pl
from jax.experimental.pallas import tpu as pltpu

H1 = 1024                      # fc1 width (fixed by the nn.Module)
H2 = 512                       # fc2 / shortcut width
OUT_PAD = 128                  # lane-padded width of the fused fc3|confidence output
_OFF_FC2 = H1 + H2             # 1536  (128-aligned)
_OFF_HEAD = H1 + 2 * H2        # 2048  (128-aligned)
BIAS_TOTAL = H1 + 2 * H2 + OUT_PAD   # 2176


def _round_up(x, m):
    return (x + m - 1) // m * m


def plum_head_kernel(x_ref, se_w1_ref, se_w2_ref, fc1sc_w_ref, fc2_w_ref,
                     head_w_ref, bias_ref, out_ref, pooled_acc_ref, *, inv_hw):
    f32 = jnp.float32
    bf16 = jnp.bfloat16
    j = pl.program_id(1)                      # HW-chunk axis (reduction, last)

    @pl.when(j == 0)
    def _():
        pooled_acc_ref[...] = jnp.zeros_like(pooled_acc_ref)

    # Global average pool. Activations arrive as [bm, C, hw_chunk] in bf16
    # (the backbone's native NCHW layout with HW flattened -> no host
    # transpose, half the HBM bytes). Accumulate the spatial sum in f32;
    # the result [bm, C] keeps C dense on lanes for the matmuls below.
    pooled_acc_ref[...] += jnp.sum(x_ref[...].astype(f32), axis=2)

    @pl.when(j == pl.num_programs(1) - 1)
    def _():
        pooled = pooled_acc_ref[...] * inv_hw                          # [bm, C] f32

        # SEBlock: gate = sigmoid(W2 relu(W1 pooled)). The gate is constant over
        # H,W and pooling is linear, so pool(se(x)) == pooled * gate.
        se_h = jnp.maximum(
            jnp.dot(pooled.astype(bf16), se_w1_ref[...],
                    preferred_element_type=f32), 0.0)                  # [bm, 128]
        gate = jax.nn.sigmoid(
            jnp.dot(se_h.astype(bf16), se_w2_ref[...],
                    preferred_element_type=f32))                       # [bm, C]
        pooled_g = (pooled * gate).astype(bf16)

        # fc1 (BN folded) and the shortcut share the same LHS -> one fused
        # [C, 1536] matmul; split on the 1024 lane boundary (stays a view).
        y01 = jnp.dot(pooled_g, fc1sc_w_ref[...], preferred_element_type=f32)
        y01 = y01 + bias_ref[:, :_OFF_FC2]                             # fc1_b | sc_b
        h = jnp.maximum(y01[:, :H1], 0.0)                              # ReLU
        residual = y01[:, H1:_OFF_FC2]

        h = jnp.dot(h.astype(bf16), fc2_w_ref[...], preferred_element_type=f32)
        h = h + bias_ref[:, _OFF_FC2:_OFF_HEAD]                        # fc2+BN2 bias
        h = jnp.maximum(h + residual, 0.0)                             # +res, ReLU

        # fused fc3 | confidence_fc: one matmul, one unmasked lane-dense store.
        y = jnp.dot(h.astype(bf16), head_w_ref[...], preferred_element_type=f32)
        out_ref[...] = y + bias_ref[:, _OFF_HEAD:]


def _choose_tiles(B, C, HW):
    """Pick (bm, b_pad, hw_chunk) so blocks fit VMEM and both v7x TCs get work."""
    bm = min(_round_up(B, 8), 128)
    # Prefer >= 2 batch grid steps so both v7x TensorCores are used.
    if _round_up(B, bm) // bm < 2 and bm > 8:
        bm = _round_up(bm // 2, 8)
    # Bound one activation block to ~4 MiB of bf16; HW chunks must be a
    # lane-aligned (multiple-of-128) divisor of HW unless the full extent fits.
    budget = 4 << 20
    hw_chunk = HW
    if bm * C * HW * 2 > budget and HW % 128 == 0:
        n = HW // 128
        best = 1
        for d in range(1, n + 1):
            if n % d == 0 and bm * C * 128 * d * 2 <= budget:
                best = d
        hw_chunk = 128 * best
    # If HW could not be chunked finely enough, shrink bm instead.
    while bm > 8 and bm * C * hw_chunk * 2 > 2 * budget:
        bm -= 8
    b_pad = _round_up(B, bm)
    return bm, b_pad, hw_chunk


@functools.partial(jax.jit, static_argnames=("num_classes", "use_buffered"))
def _forward_impl(feat, kparams, num_classes, use_buffered):
    B, C, H, W = feat.shape
    HW = H * W

    # Free reshape (contiguous NCHW), no transpose; keep bf16 for the DMA.
    x = feat.reshape(B, C, HW)
    if x.dtype != jnp.bfloat16:
        x = x.astype(jnp.bfloat16)

    bm, b_pad, hw_chunk = _choose_tiles(B, C, HW)
    if b_pad != B:
        x = jnp.pad(x, ((0, b_pad - B), (0, 0), (0, 0)))

    se_pad = kparams["se_w1"].shape[1]

    def resident(shape):
        # Weights/bias never change across grid steps -> VMEM-resident; request
        # single buffering when the pipeline_mode knob is available.
        index_map = lambda i, j: (0,) * len(shape)
        if use_buffered:
            return pl.BlockSpec(shape, index_map, pipeline_mode=pl.Buffered(1))
        return pl.BlockSpec(shape, index_map)

    # Explicit scoped-VMEM budget (conservatively counts weights double-buffered).
    weight_bytes = 2 * (2 * C * se_pad * 2 + C * (H1 + H2) * 2
                        + H1 * H2 * 2 + H2 * OUT_PAD * 2 + BIAS_TOTAL * 4)
    vmem_bytes = (2 * bm * C * hw_chunk * 2       # activation double buffer (bf16)
                  + weight_bytes
                  + 2 * bm * OUT_PAD * 4          # output double buffer
                  + bm * C * 4                    # pooled f32 accumulator scratch
                  + (2 << 20))                    # headroom
    vmem_limit = int(min(max(vmem_bytes, 8 << 20), 60 << 20))

    grid = (b_pad // bm, HW // hw_chunk)

    out = pl.pallas_call(
        functools.partial(plum_head_kernel, inv_hw=1.0 / HW),
        grid=grid,
        in_specs=[
            pl.BlockSpec((bm, C, hw_chunk), lambda i, j: (i, 0, j)),  # activations
            resident((C, se_pad)),                 # se_w1 (lane-padded hidden)
            resident((se_pad, C)),                 # se_w2
            resident((C, H1 + H2)),                # fused fc1|shortcut (BN folded)
            resident((H1, H2)),                    # fc2 (BN folded)
            resident((H2, OUT_PAD)),               # fused fc3|confidence
            resident((1, BIAS_TOTAL)),             # packed biases
        ],
        out_specs=pl.BlockSpec((bm, OUT_PAD), lambda i, j: (i, 0)),
        out_shape=jax.ShapeDtypeStruct((b_pad, OUT_PAD), jnp.float32),
        scratch_shapes=[pltpu.VMEM((bm, C), jnp.float32)],
        compiler_params=pltpu.CompilerParams(
            dimension_semantics=("parallel", "arbitrary"),
            vmem_limit_bytes=vmem_limit),
    )(x, kparams["se_w1"], kparams["se_w2"], kparams["fc1sc_w"],
      kparams["fc2_w"], kparams["head_w"], kparams["bias"])

    logits = out[:B, :num_classes]
    conf = jax.nn.sigmoid(out[:B, num_classes:num_classes + 1])
    return logits, conf


def plum_classifier_forward(feat, kparams, num_classes=6):
    """feat: [B, C, H, W] backbone feature map. Returns (logits, confidence)."""
    try:
        return _forward_impl(feat, kparams, num_classes=num_classes,
                             use_buffered=True)
    except Exception:
        # pl.Buffered(1) pipeline_mode unavailable on this JAX build -> default
        # double-buffered weights (same semantics, slightly more VMEM).
        return _forward_impl(feat, kparams, num_classes=num_classes,
                             use_buffered=False)


def fold_params(params, num_classes=6):
    """Fold eval BN + biases into weights, fuse fc1|shortcut and fc3|conf,
    lane-pad the SE hidden dim, pack biases, cast matmul weights to bf16."""
    bf16 = jnp.bfloat16
    c_red = params["se_w1"].shape[1]
    se_pad = _round_up(max(c_red, 1), 128)
    se_w1 = jnp.pad(params["se_w1"], ((0, 0), (0, se_pad - c_red))).astype(bf16)
    se_w2 = jnp.pad(params["se_w2"], ((0, se_pad - c_red), (0, 0))).astype(bf16)

    fc1_w = params["fc1_w"] * params["bn1_s"]                 # column scale (BN fold)
    fc1_b = params["fc1_b"] * params["bn1_s"] + params["bn1_b"]
    fc2_w = (params["fc2_w"] * params["bn2_s"]).astype(bf16)
    fc2_b = params["fc2_b"] * params["bn2_s"] + params["bn2_b"]

    fc1sc_w = jnp.concatenate([fc1_w, params["sc_w"]], axis=1).astype(bf16)  # [C,1536]

    n_head = num_classes + 1
    assert n_head <= OUT_PAD
    head_w = jnp.concatenate([params["fc3_w"], params["conf_w"]], axis=1)
    head_w = jnp.pad(head_w, ((0, 0), (0, OUT_PAD - n_head))).astype(bf16)
    head_b = jnp.concatenate([params["fc3_b"], params["conf_b"]], axis=1)
    head_b = jnp.pad(head_b, ((0, 0), (0, OUT_PAD - n_head)))

    bias = jnp.concatenate(
        [fc1_b, params["sc_b"], fc2_b, head_b], axis=1).astype(jnp.float32)
    assert bias.shape == (1, BIAS_TOTAL)

    return {"se_w1": se_w1, "se_w2": se_w2, "fc1sc_w": fc1sc_w,
            "fc2_w": fc2_w, "head_w": head_w, "bias": bias}


def init_params(key, channels, reduction=16, num_classes=6, eps=1e-5):
    """Deterministic synthetic parameters (shapes follow the nn.Module)."""
    ks = list(jax.random.split(key, 20))

    def linear_w(k, fan_in, fan_out):
        bound = 1.0 / (fan_in ** 0.5)
        return jax.random.uniform(k, (fan_in, fan_out), jnp.float32, -bound, bound)

    def linear_b(k, fan_in, fan_out):
        bound = 1.0 / (fan_in ** 0.5)
        return jax.random.uniform(k, (1, fan_out), jnp.float32, -bound, bound)

    def bn_fold(k, n):
        kg, kb, km, kv = jax.random.split(k, 4)
        gamma = jax.random.uniform(kg, (1, n), jnp.float32, 0.5, 1.5)
        beta = jax.random.uniform(kb, (1, n), jnp.float32, -0.2, 0.2)
        mean = jax.random.uniform(km, (1, n), jnp.float32, -0.2, 0.2)
        var = jax.random.uniform(kv, (1, n), jnp.float32, 0.5, 1.5)
        scale = gamma / jnp.sqrt(var + eps)
        shift = beta - mean * scale
        return scale, shift

    c_red = channels // reduction
    bn1_s, bn1_b = bn_fold(ks[6], H1)
    bn2_s, bn2_b = bn_fold(ks[7], H2)
    return {
        # SEBlock: Linear(C, C//r, bias=False), Linear(C//r, C, bias=False)
        "se_w1": linear_w(ks[0], channels, c_red),
        "se_w2": linear_w(ks[1], c_red, channels),
        # fc1: Linear(C, 1024) + BN(1024)
        "fc1_w": linear_w(ks[2], channels, H1),
        "fc1_b": linear_b(ks[3], channels, H1),
        "bn1_s": bn1_s, "bn1_b": bn1_b,
        # fc2: Linear(1024, 512) + BN(512)
        "fc2_w": linear_w(ks[4], H1, H2),
        "fc2_b": linear_b(ks[5], H1, H2),
        "bn2_s": bn2_s, "bn2_b": bn2_b,
        # shortcut: Linear(C, 512)
        "sc_w": linear_w(ks[8], channels, H2),
        "sc_b": linear_b(ks[9], channels, H2),
        # fc3: Linear(512, num_classes)
        "fc3_w": linear_w(ks[10], H2, num_classes),
        "fc3_b": linear_b(ks[11], H2, num_classes),
        # confidence_fc: Linear(512, 1)
        "conf_w": linear_w(ks[12], H2, 1),
        "conf_b": linear_b(ks[13], H2, 1),
    }


def reference_forward(feat, params):
    """Pure-JAX f32 reference mirroring the PyTorch forward (eval mode)."""
    B, C, H, W = feat.shape
    pooled_pre = jnp.mean(feat.reshape(B, C, H * W), axis=-1)
    gate = jax.nn.sigmoid(
        jnp.maximum(pooled_pre @ params["se_w1"], 0.0) @ params["se_w2"])
    pooled = pooled_pre * gate
    residual = pooled @ params["sc_w"] + params["sc_b"]
    h = pooled @ params["fc1_w"] + params["fc1_b"]
    h = jnp.maximum(h * params["bn1_s"] + params["bn1_b"], 0.0)
    h = h @ params["fc2_w"] + params["fc2_b"]
    h = h * params["bn2_s"] + params["bn2_b"] + residual
    h = jnp.maximum(h, 0.0)
    logits = h @ params["fc3_w"] + params["fc3_b"]
    conf = jax.nn.sigmoid(h @ params["conf_w"] + params["conf_b"])
    return logits, conf


if __name__ == "__main__":
    B, C, H, W = 2, 64, 16, 16          # synthetic backbone feature map (NCHW)
    NUM_CLASSES = 6

    key = jax.random.PRNGKey(0)
    k_feat, k_params = jax.random.split(key)
    # Keep the feature map in the backbone's native bf16 (no host f32 upcast).
    feat = jax.random.normal(k_feat, (B, C, H, W), jnp.float32).astype(jnp.bfloat16)
    params = init_params(k_params, C, reduction=16, num_classes=NUM_CLASSES)
    kparams = fold_params(params, num_classes=NUM_CLASSES)

    logits, conf = plum_classifier_forward(feat, kparams, num_classes=NUM_CLASSES)
    jax.block_until_ready((logits, conf))

    ref_logits, ref_conf = reference_forward(feat.astype(jnp.float32), params)
    assert logits.shape == (B, NUM_CLASSES) and conf.shape == (B, 1)
    assert jnp.allclose(logits, ref_logits, atol=2e-2, rtol=2e-2)
    assert jnp.allclose(conf, ref_conf, atol=2e-2, rtol=2e-2)

    print("KERNEL_OK")
</pallas_src>

<mosaic_0001>
module attributes {stable_mosaic.version = 11 : i64} {
  func.func @plum_head_kernel(%arg0: i32, %arg1: i32, %arg2: memref<8x64x256xbf16, #tpu.memory_space<vmem>>, %arg3: memref<64x128xbf16, #tpu.memory_space<vmem>>, %arg4: memref<128x64xbf16, #tpu.memory_space<vmem>>, %arg5: memref<64x1536xbf16, #tpu.memory_space<vmem>>, %arg6: memref<1024x512xbf16, #tpu.memory_space<vmem>>, %arg7: memref<512x128xbf16, #tpu.memory_space<vmem>>, %arg8: memref<1x2176xf32, #tpu.memory_space<vmem>>, %arg9: memref<8x128xf32, #tpu.memory_space<vmem>>, %arg10: memref<8x64xf32, #tpu.memory_space<vmem>>) attributes {dimension_semantics = [#tpu.dimension_semantics<parallel>, #tpu.dimension_semantics<arbitrary>], iteration_bounds = array<i64: 1, 1>, scalar_prefetch = 0 : i64, scratch_operands = 1 : i64, tpu.core_type = #tpu.core_type<tc>, window_params = [{transform_indices = @transform_0, window_bounds = array<i64: 8, 64, 256>}, {pipeline_mode = #tpu.pipeline_mode<synchronous>, transform_indices = @transform_1, window_bounds = array<i64: 64, 128>}, {pipeline_mode = #tpu.pipeline_mode<synchronous>, transform_indices = @transform_2, window_bounds = array<i64: 128, 64>}, {pipeline_mode = #tpu.pipeline_mode<synchronous>, transform_indices = @transform_3, window_bounds = array<i64: 64, 1536>}, {pipeline_mode = #tpu.pipeline_mode<synchronous>, transform_indices = @transform_4, window_bounds = array<i64: 1024, 512>}, {pipeline_mode = #tpu.pipeline_mode<synchronous>, transform_indices = @transform_5, window_bounds = array<i64: 512, 128>}, {pipeline_mode = #tpu.pipeline_mode<synchronous>, transform_indices = @transform_6, window_bounds = array<i64: 1, 2176>}, {transform_indices = @transform_7, window_bounds = array<i64: 8, 128>}]} {
    %c0_i32 = arith.constant 0 : i32
    %0 = arith.cmpi eq, %arg1, %c0_i32 : i32
    %1 = arith.extui %0 : i1 to i32
    %c0_i32_0 = arith.constant 0 : i32
    %2 = arith.cmpi ne, %1, %c0_i32_0 : i32
    scf.if %2 {
      %cst_9 = arith.constant 0.000000e+00 : f32
      %12 = vector.broadcast %cst_9 : f32 to vector<8x64xf32>
      %c0_10 = arith.constant 0 : index
      %c0_11 = arith.constant 0 : index
      %13 = vector.load %arg10[%c0_10, %c0_11] : memref<8x64xf32, #tpu.memory_space<vmem>>, vector<8x64xf32>
      tpu.vector_store %arg10[%c0_10, %c0_11], %12 {strides = array<i32>} : memref<8x64xf32, #tpu.memory_space<vmem>>, vector<8x64xf32>,
    } else {
    }
    %c0 = arith.constant 0 : index
    %c0_1 = arith.constant 0 : index
    %3 = vector.load %arg10[%c0, %c0_1] : memref<8x64xf32, #tpu.memory_space<vmem>>, vector<8x64xf32>
    %c0_2 = arith.constant 0 : index
    %c0_3 = arith.constant 0 : index
    %c0_4 = arith.constant 0 : index
    %4 = vector.load %arg2[%c0_2, %c0_3, %c0_4] : memref<8x64x256xbf16, #tpu.memory_space<vmem>>, vector<8x64x256xbf16>
    %5 = arith.extf %4 : vector<8x64x256xbf16> to vector<8x64x256xf32>
    %cst = arith.constant dense<0.000000e+00> : vector<8x64xf32>
    %6 = vector.multi_reduction <add>, %5, %cst [2] : vector<8x64x256xf32> to vector<8x64xf32>
    %7 = arith.addf %3, %6 : vector<8x64xf32>
    %c0_5 = arith.constant 0 : index
    %c0_6 = arith.constant 0 : index
    %8 = vector.load %arg10[%c0_5, %c0_6] : memref<8x64xf32, #tpu.memory_space<vmem>>, vector<8x64xf32>
    tpu.vector_store %arg10[%c0_5, %c0_6], %7 {strides = array<i32>} : memref<8x64xf32, #tpu.memory_space<vmem>>, vector<8x64xf32>,
    %c0_i32_7 = arith.constant 0 : i32
    %9 = arith.cmpi eq, %arg1, %c0_i32_7 : i32
    %10 = arith.extui %9 : i1 to i32
    %c0_i32_8 = arith.constant 0 : i32
    %11 = arith.cmpi ne, %10, %c0_i32_8 : i32
    scf.if %11 {
      %c0_9 = arith.constant 0 : index
      %c0_10 = arith.constant 0 : index
      %12 = vector.load %arg10[%c0_9, %c0_10] : memref<8x64xf32, #tpu.memory_space<vmem>>, vector<8x64xf32>
      %cst_11 = arith.constant 3.906250e-03 : f32
      %13 = vector.broadcast %cst_11 : f32 to vector<8x64xf32>
      %14 = arith.mulf %12, %13 : vector<8x64xf32>
      %15 = arith.truncf %14 : vector<8x64xf32> to vector<8x64xbf16>
      %c0_12 = arith.constant 0 : index
      %c0_13 = arith.constant 0 : index
      %16 = vector.load %arg3[%c0_12, %c0_13] : memref<64x128xbf16, #tpu.memory_space<vmem>>, vector<64x128xbf16>
      %cst_14 = arith.constant dense<0.000000e+00> : vector<8x128xf32>
      %17 = tpu.matmul %15, %16, %cst_14 {dimension_numbers = #tpu.dot_dimension_numbers<[1], [0], [0], [1], [0, 0, 1, 1], [], []>} : vector<8x64xbf16>, vector<64x128xbf16>, vector<8x128xf32> -> vector<8x128xf32>
      %cst_15 = arith.constant 0.000000e+00 : f32
      %18 = vector.broadcast %cst_15 : f32 to vector<8x128xf32>
      %19 = arith.maximumf %17, %18 : vector<8x128xf32>
      %20 = arith.truncf %19 : vector<8x128xf32> to vector<8x128xbf16>
      %c0_16 = arith.constant 0 : index
      %c0_17 = arith.constant 0 : index
      %21 = vector.load %arg4[%c0_16, %c0_17] : memref<128x64xbf16, #tpu.memory_space<vmem>>, vector<128x64xbf16>
      %cst_18 = arith.constant dense<0.000000e+00> : vector<8x64xf32>
      %22 = tpu.matmul %20, %21, %cst_18 {dimension_numbers = #tpu.dot_dimension_numbers<[1], [0], [0], [1], [0, 0, 1, 1], [], []>} : vector<8x128xbf16>, vector<128x64xbf16>, vector<8x64xf32> -> vector<8x64xf32>
      %23 = arith.negf %22 : vector<8x64xf32>
      %24 = math.exp %23 : vector<8x64xf32>
      %cst_19 = arith.constant 1.000000e+00 : f32
      %25 = vector.broadcast %cst_19 : f32 to vector<8x64xf32>
      %26 = arith.addf %25, %24 : vector<8x64xf32>
      %27 = arith.divf %25, %26 : vector<8x64xf32>
      %28 = arith.mulf %14, %27 : vector<8x64xf32>
      %29 = arith.truncf %28 : vector<8x64xf32> to vector<8x64xbf16>
      %c0_20 = arith.constant 0 : index
      %c0_21 = arith.constant 0 : index
      %30 = vector.load %arg5[%c0_20, %c0_21] : memref<64x1536xbf16, #tpu.memory_space<vmem>>, vector<64x1536xbf16>
      %cst_22 = arith.constant dense<0.000000e+00> : vector<8x1536xf32>
      %31 = tpu.matmul %29, %30, %cst_22 {dimension_numbers = #tpu.dot_dimension_numbers<[1], [0], [0], [1], [0, 0, 1, 1], [], []>} : vector<8x64xbf16>, vector<64x1536xbf16>, vector<8x1536xf32> -> vector<8x1536xf32>
      %c0_23 = arith.constant 0 : index
      %c0_24 = arith.constant 0 : index
      %32 = vector.load %arg8[%c0_23, %c0_24] : memref<1x2176xf32, #tpu.memory_space<vmem>>, vector<1x1536xf32>
      %33 = vector.broadcast %32 : vector<1x1536xf32> to vector<8x1536xf32>
      %34 = arith.addf %31, %33 : vector<8x1536xf32>
      %35 = vector.extract_strided_slice %34 {offsets = [0, 0], sizes = [8, 1024], strides = [1, 1]} : vector<8x1536xf32> to vector<8x1024xf32>
      %cst_25 = arith.constant 0.000000e+00 : f32
      %36 = vector.broadcast %cst_25 : f32 to vector<8x1024xf32>
      %37 = arith.maximumf %35, %36 : vector<8x1024xf32>
      %38 = vector.extract_strided_slice %34 {offsets = [0, 1024], sizes = [8, 512], strides = [1, 1]} : vector<8x1536xf32> to vector<8x512xf32>
      %39 = arith.truncf %37 : vector<8x1024xf32> to vector<8x1024xbf16>
      %c0_26 = arith.constant 0 : index
      %c0_27 = arith.constant 0 : index
      %40 = vector.load %arg6[%c0_26, %c0_27] : memref<1024x512xbf16, #tpu.memory_space<vmem>>, vector<1024x512xbf16>
      %cst_28 = arith.constant dense<0.000000e+00> : vector<8x512xf32>
      %41 = tpu.matmul %39, %40, %cst_28 {dimension_numbers = #tpu.dot_dimension_numbers<[1], [0], [0], [1], [0, 0, 1, 1], [], []>} : vector<8x1024xbf16>, vector<1024x512xbf16>, vector<8x512xf32> -> vector<8x512xf32>
      %c0_29 = arith.constant 0 : index
      %c1536 = arith.constant 1536 : index
      %42 = vector.load %arg8[%c0_29, %c1536] : memref<1x2176xf32, #tpu.memory_space<vmem>>, vector<1x512xf32>
      %43 = vector.broadcast %42 : vector<1x512xf32> to vector<8x512xf32>
      %44 = arith.addf %41, %43 : vector<8x512xf32>
      %45 = arith.addf %44, %38 : vector<8x512xf32>
      %cst_30 = arith.constant 0.000000e+00 : f32
      %46 = vector.broadcast %cst_30 : f32 to vector<8x512xf32>
      %47 = arith.maximumf %45, %46 : vector<8x512xf32>
      %48 = arith.truncf %47 : vector<8x512xf32> to vector<8x512xbf16>
      %c0_31 = arith.constant 0 : index
      %c0_32 = arith.constant 0 : index
      %49 = vector.load %arg7[%c0_31, %c0_32] : memref<512x128xbf16, #tpu.memory_space<vmem>>, vector<512x128xbf16>
      %cst_33 = arith.constant dense<0.000000e+00> : vector<8x128xf32>
      %50 = tpu.matmul %48, %49, %cst_33 {dimension_numbers = #tpu.dot_dimension_numbers<[1], [0], [0], [1], [0, 0, 1, 1], [], []>} : vector<8x512xbf16>, vector<512x128xbf16>, vector<8x128xf32> -> vector<8x128xf32>
      %c0_34 = arith.constant 0 : index
      %c2048 = arith.constant 2048 : index
      %51 = vector.load %arg8[%c0_34, %c2048] : memref<1x2176xf32, #tpu.memory_space<vmem>>, vector<1x128xf32>
      %52 = vector.broadcast %51 : vector<1x128xf32> to vector<8x128xf32>
      %53 = arith.addf %50, %52 : vector<8x128xf32>
      %c0_35 = arith.constant 0 : index
      %c0_36 = arith.constant 0 : index
      %54 = vector.load %arg9[%c0_35, %c0_36] : memref<8x128xf32, #tpu.memory_space<vmem>>, vector<8x128xf32>
      tpu.vector_store %arg9[%c0_35, %c0_36], %53 {strides = array<i32>} : memref<8x128xf32, #tpu.memory_space<vmem>>, vector<8x128xf32>,
    } else {
    }
    return
  }
  func.func @transform_0(%arg0: i32, %arg1: i32) -> (i32, i32, i32) {
    %c0_i32 = arith.constant 0 : i32
    %c0_i32_0 = arith.constant 0 : i32
    return %arg0, %c0_i32, %arg1 : i32, i32, i32
  }
  func.func @transform_1(%arg0: i32, %arg1: i32) -> (i32, i32) {
    %c0_i32 = arith.constant 0 : i32
    %c0_i32_0 = arith.constant 0 : i32
    %c0_i32_1 = arith.constant 0 : i32
    return %c0_i32, %c0_i32_0 : i32, i32
  }
  func.func @transform_2(%arg0: i32, %arg1: i32) -> (i32, i32) {
    %c0_i32 = arith.constant 0 : i32
    %c0_i32_0 = arith.constant 0 : i32
    %c0_i32_1 = arith.constant 0 : i32
    return %c0_i32, %c0_i32_0 : i32, i32
  }
  func.func @transform_3(%arg0: i32, %arg1: i32) -> (i32, i32) {
    %c0_i32 = arith.constant 0 : i32
    %c0_i32_0 = arith.constant 0 : i32
    %c0_i32_1 = arith.constant 0 : i32
    return %c0_i32, %c0_i32_0 : i32, i32
  }
  func.func @transform_4(%arg0: i32, %arg1: i32) -> (i32, i32) {
    %c0_i32 = arith.constant 0 : i32
    %c0_i32_0 = arith.constant 0 : i32
    %c0_i32_1 = arith.constant 0 : i32
    return %c0_i32, %c0_i32_0 : i32, i32
  }
  func.func @transform_5(%arg0: i32, %arg1: i32) -> (i32, i32) {
    %c0_i32 = arith.constant 0 : i32
    %c0_i32_0 = arith.constant 0 : i32
    %c0_i32_1 = arith.constant 0 : i32
    return %c0_i32, %c0_i32_0 : i32, i32
  }
  func.func @transform_6(%arg0: i32, %arg1: i32) -> (i32, i32) {
    %c0_i32 = arith.constant 0 : i32
    %c0_i32_0 = arith.constant 0 : i32
    %c0_i32_1 = arith.constant 0 : i32
    return %c0_i32, %c0_i32_0 : i32, i32
  }
  func.func @transform_7(%arg0: i32, %arg1: i32) -> (i32, i32) {
    %c0_i32 = arith.constant 0 : i32
    %c0_i32_0 = arith.constant 0 : i32
    return %arg0, %c0_i32 : i32, i32
  }
}

module attributes {stable_mosaic.version = 11 : i64} {
  func.func @plum_head_kernel(%arg0: i32, %arg1: i32, %arg2: memref<8x64x256xbf16, #tpu.memory_space<vmem>>, %arg3: memref<64x128xbf16, #tpu.memory_space<vmem>>, %arg4: memref<128x64xbf16, #tpu.memory_space<vmem>>, %arg5: memref<64x1536xbf16, #tpu.memory_space<vmem>>, %arg6: memref<1024x512xbf16, #tpu.memory_space<vmem>>, %arg7: memref<512x128xbf16, #tpu.memory_space<vmem>>, %arg8: memref<1x2176xf32, #tpu.memory_space<vmem>>, %arg9: memref<8x128xf32, #tpu.memory_space<vmem>>, %arg10: memref<8x64xf32, #tpu.memory_space<vmem>>) attributes {dimension_semantics = [#tpu.dimension_semantics<parallel>, #tpu.dimension_semantics<arbitrary>], iteration_bounds = array<i64: 1, 1>, scalar_prefetch = 0 : i64, scratch_operands = 1 : i64, tpu.core_type = #tpu.core_type<tc>, window_params = [{transform_indices = @transform_0, window_bounds = array<i64: 8, 64, 256>}, {pipeline_mode = #tpu.pipeline_mode<synchronous>, transform_indices = @transform_1, window_bounds = array<i64: 64, 128>}, {pipeline_mode = #tpu.pipeline_mode<synchronous>, transform_indices = @transform_2, window_bounds = array<i64: 128, 64>}, {pipeline_mode = #tpu.pipeline_mode<synchronous>, transform_indices = @transform_3, window_bounds = array<i64: 64, 1536>}, {pipeline_mode = #tpu.pipeline_mode<synchronous>, transform_indices = @transform_4, window_bounds = array<i64: 1024, 512>}, {pipeline_mode = #tpu.pipeline_mode<synchronous>, transform_indices = @transform_5, window_bounds = array<i64: 512, 128>}, {pipeline_mode = #tpu.pipeline_mode<synchronous>, transform_indices = @transform_6, window_bounds = array<i64: 1, 2176>}, {transform_indices = @transform_7, window_bounds = array<i64: 8, 128>}]} {
    %c0_i32 = arith.constant 0 : i32
    %0 = arith.cmpi eq, %arg1, %c0_i32 : i32
    %1 = arith.extui %0 : i1 to i32
    %c0_i32_0 = arith.constant 0 : i32
    %2 = arith.cmpi ne, %1, %c0_i32_0 : i32
    scf.if %2 {
      %cst_9 = arith.constant 0.000000e+00 : f32
      %12 = vector.broadcast %cst_9 : f32 to vector<8x64xf32>
      %c0_10 = arith.constant 0 : index
      %c0_11 = arith.constant 0 : index
      %13 = vector.load %arg10[%c0_10, %c0_11] : memref<8x64xf32, #tpu.memory_space<vmem>>, vector<8x64xf32>
      tpu.vector_store %arg10[%c0_10, %c0_11], %12 {strides = array<i32>} : memref<8x64xf32, #tpu.memory_space<vmem>>, vector<8x64xf32>,
    } else {
    }
    %c0 = arith.constant 0 : index
    %c0_1 = arith.constant 0 : index
    %3 = vector.load %arg10[%c0, %c0_1] : memref<8x64xf32, #tpu.memory_space<vmem>>, vector<8x64xf32>
    %c0_2 = arith.constant 0 : index
    %c0_3 = arith.constant 0 : index
    %c0_4 = arith.constant 0 : index
    %4 = vector.load %arg2[%c0_2, %c0_3, %c0_4] : memref<8x64x256xbf16, #tpu.memory_space<vmem>>, vector<8x64x256xbf16>
    %5 = arith.extf %4 : vector<8x64x256xbf16> to vector<8x64x256xf32>
    %cst = arith.constant dense<0.000000e+00> : vector<8x64xf32>
    %6 = vector.multi_reduction <add>, %5, %cst [2] : vector<8x64x256xf32> to vector<8x64xf32>
    %7 = arith.addf %3, %6 : vector<8x64xf32>
    %c0_5 = arith.constant 0 : index
    %c0_6 = arith.constant 0 : index
    %8 = vector.load %arg10[%c0_5, %c0_6] : memref<8x64xf32, #tpu.memory_space<vmem>>, vector<8x64xf32>
    tpu.vector_store %arg10[%c0_5, %c0_6], %7 {strides = array<i32>} : memref<8x64xf32, #tpu.memory_space<vmem>>, vector<8x64xf32>,
    %c0_i32_7 = arith.constant 0 : i32
    %9 = arith.cmpi eq, %arg1, %c0_i32_7 : i32
    %10 = arith.extui %9 : i1 to i32
    %c0_i32_8 = arith.constant 0 : i32
    %11 = arith.cmpi ne, %10, %c0_i32_8 : i32
    scf.if %11 {
      %c0_9 = arith.constant 0 : index
      %c0_10 = arith.constant 0 : index
      %12 = vector.load %arg10[%c0_9, %c0_10] : memref<8x64xf32, #tpu.memory_space<vmem>>, vector<8x64xf32>
      %cst_11 = arith.constant 3.906250e-03 : f32
      %13 = vector.broadcast %cst_11 : f32 to vector<8x64xf32>
      %14 = arith.mulf %12, %13 : vector<8x64xf32>
      %15 = arith.truncf %14 : vector<8x64xf32> to vector<8x64xbf16>
      %c0_12 = arith.constant 0 : index
      %c0_13 = arith.constant 0 : index
      %16 = vector.load %arg3[%c0_12, %c0_13] : memref<64x128xbf16, #tpu.memory_space<vmem>>, vector<64x128xbf16>
      %cst_14 = arith.constant dense<0.000000e+00> : vector<8x128xf32>
      %17 = tpu.matmul %15, %16, %cst_14 {dimension_numbers = #tpu.dot_dimension_numbers<[1], [0], [0], [1], [0, 0, 1, 1], [], []>} : vector<8x64xbf16>, vector<64x128xbf16>, vector<8x128xf32> -> vector<8x128xf32>
      %cst_15 = arith.constant 0.000000e+00 : f32
      %18 = vector.broadcast %cst_15 : f32 to vector<8x128xf32>
      %19 = arith.maximumf %17, %18 : vector<8x128xf32>
      %20 = arith.truncf %19 : vector<8x128xf32> to vector<8x128xbf16>
      %c0_16 = arith.constant 0 : index
      %c0_17 = arith.constant 0 : index
      %21 = vector.load %arg4[%c0_16, %c0_17] : memref<128x64xbf16, #tpu.memory_space<vmem>>, vector<128x64xbf16>
      %cst_18 = arith.constant dense<0.000000e+00> : vector<8x64xf32>
      %22 = tpu.matmul %20, %21, %cst_18 {dimension_numbers = #tpu.dot_dimension_numbers<[1], [0], [0], [1], [0, 0, 1, 1], [], []>} : vector<8x128xbf16>, vector<128x64xbf16>, vector<8x64xf32> -> vector<8x64xf32>
      %23 = arith.negf %22 : vector<8x64xf32>
      %24 = math.exp %23 : vector<8x64xf32>
      %cst_19 = arith.constant 1.000000e+00 : f32
      %25 = vector.broadcast %cst_19 : f32 to vector<8x64xf32>
      %26 = arith.addf %25, %24 : vector<8x64xf32>
      %27 = arith.divf %25, %26 : vector<8x64xf32>
      %28 = arith.mulf %14, %27 : vector<8x64xf32>
      %29 = arith.truncf %28 : vector<8x64xf32> to vector<8x64xbf16>
      %c0_20 = arith.constant 0 : index
      %c0_21 = arith.constant 0 : index
      %30 = vector.load %arg5[%c0_20, %c0_21] : memref<64x1536xbf16, #tpu.memory_space<vmem>>, vector<64x1536xbf16>
      %cst_22 = arith.constant dense<0.000000e+00> : vector<8x1536xf32>
      %31 = tpu.matmul %29, %30, %cst_22 {dimension_numbers = #tpu.dot_dimension_numbers<[1], [0], [0], [1], [0, 0, 1, 1], [], []>} : vector<8x64xbf16>, vector<64x1536xbf16>, vector<8x1536xf32> -> vector<8x1536xf32>
      %c0_23 = arith.constant 0 : index
      %c0_24 = arith.constant 0 : index
      %32 = vector.load %arg8[%c0_23, %c0_24] : memref<1x2176xf32, #tpu.memory_space<vmem>>, vector<1x1536xf32>
      %33 = vector.broadcast %32 : vector<1x1536xf32> to vector<8x1536xf32>
      %34 = arith.addf %31, %33 : vector<8x1536xf32>
      %35 = vector.extract_strided_slice %34 {offsets = [0, 0], sizes = [8, 1024], strides = [1, 1]} : vector<8x1536xf32> to vector<8x1024xf32>
      %cst_25 = arith.constant 0.000000e+00 : f32
      %36 = vector.broadcast %cst_25 : f32 to vector<8x1024xf32>
      %37 = arith.maximumf %35, %36 : vector<8x1024xf32>
      %38 = vector.extract_strided_slice %34 {offsets = [0, 1024], sizes = [8, 512], strides = [1, 1]} : vector<8x1536xf32> to vector<8x512xf32>
      %39 = arith.truncf %37 : vector<8x1024xf32> to vector<8x1024xbf16>
      %c0_26 = arith.constant 0 : index
      %c0_27 = arith.constant 0 : index
      %40 = vector.load %arg6[%c0_26, %c0_27] : memref<1024x512xbf16, #tpu.memory_space<vmem>>, vector<1024x512xbf16>
      %cst_28 = arith.constant dense<0.000000e+00> : vector<8x512xf32>
      %41 = tpu.matmul %39, %40, %cst_28 {dimension_numbers = #tpu.dot_dimension_numbers<[1], [0], [0], [1], [0, 0, 1, 1], [], []>} : vector<8x1024xbf16>, vector<1024x512xbf16>, vector<8x512xf32> -> vector<8x512xf32>
      %c0_29 = arith.constant 0 : index
      %c1536 = arith.constant 1536 : index
      %42 = vector.load %arg8[%c0_29, %c1536] : memref<1x2176xf32, #tpu.memory_space<vmem>>, vector<1x512xf32>
      %43 = vector.broadcast %42 : vector<1x512xf32> to vector<8x512xf32>
      %44 = arith.addf %41, %43 : vector<8x512xf32>
      %45 = arith.addf %44, %38 : vector<8x512xf32>
      %cst_30 = arith.constant 0.000000e+00 : f32
      %46 = vector.broadcast %cst_30 : f32 to vector<8x512xf32>
      %47 = arith.maximumf %45, %46 : vector<8x512xf32>
      %48 = arith.truncf %47 : vector<8x512xf32> to vector<8x512xbf16>
      %c0_31 = arith.constant 0 : index
      %c0_32 = arith.constant 0 : index
      %49 = vector.load %arg7[%c0_31, %c0_32] : memref<512x128xbf16, #tpu.memory_space<vmem>>, vector<512x128xbf16>
      %cst_33 = arith.constant dense<0.000000e+00> : vector<8x128xf32>
      %50 = tpu.matmul %48, %49, %cst_33 {dimension_numbers = #tpu.dot_dimension_numbers<[1], [0], [0], [1], [0, 0, 1, 1], [], []>} : vector<8x512xbf16>, vector<512x128xbf16>, vector<8x128xf32> -> vector<8x128xf32>
      %c0_34 = arith.constant 0 : index
      %c2048 = arith.constant 2048 : index
      %51 = vector.load %arg8[%c0_34, %c2048] : memref<1x2176xf32, #tpu.memory_space<vmem>>, vector<1x128xf32>
      %52 = vector.broadcast %51 : vector<1x128xf32> to vector<8x128xf32>
      %53 = arith.addf %50, %52 : vector<8x128xf32>
      %c0_35 = arith.constant 0 : index
      %c0_36 = arith.constant 0 : index
      %54 = vector.load %arg9[%c0_35, %c0_36] : memref<8x128xf32, #tpu.memory_space<vmem>>, vector<8x128xf32>
      tpu.vector_store %arg9[%c0_35, %c0_36], %53 {strides = array<i32>} : memref<8x128xf32, #tpu.memory_space<vmem>>, vector<8x128xf32>,
    } else {
    }
    return
  }
  func.func @transform_0(%arg0: i32, %arg1: i32) -> (i32, i32, i32) {
    %c0_i32 = arith.constant 0 : i32
    %c0_i32_0 = arith.constant 0 : i32
    return %arg0, %c0_i32, %arg1 : i32, i32, i32
  }
  func.func @transform_1(%arg0: i32, %arg1: i32) -> (i32, i32) {
    %c0_i32 = arith.constant 0 : i32
    %c0_i32_0 = arith.constant 0 : i32
    %c0_i32_1 = arith.constant 0 : i32
    return %c0_i32, %c0_i32_0 : i32, i32
  }
  func.func @transform_2(%arg0: i32, %arg1: i32) -> (i32, i32) {
    %c0_i32 = arith.constant 0 : i32
    %c0_i32_0 = arith.constant 0 : i32
    %c0_i32_1 = arith.constant 0 : i32
    return %c0_i32, %c0_i32_0 : i32, i32
  }
  func.func @transform_3(%arg0: i32, %arg1: i32) -> (i32, i32) {
    %c0_i32 = arith.constant 0 : i32
    %c0_i32_0 = arith.constant 0 : i32
    %c0_i32_1 = arith.constant 0 : i32
    return %c0_i32, %c0_i32_0 : i32, i32
  }
  func.func @transform_4(%arg0: i32, %arg1: i32) -> (i32, i32) {
    %c0_i32 = arith.constant 0 : i32
    %c0_i32_0 = arith.constant 0 : i32
    %c0_i32_1 = arith.constant 0 : i32
    return %c0_i32, %c0_i32_0 : i32, i32
  }
  func.func @transform_5(%arg0: i32, %arg1: i32) -> (i32, i32) {
    %c0_i32 = arith.constant 0 : i32
    %c0_i32_0 = arith.constant 0 : i32
    %c0_i32_1 = arith.constant 0 : i32
    return %c0_i32, %c0_i32_0 : i32, i32
  }
  func.func @transform_6(%arg0: i32, %arg1: i32) -> (i32, i32) {
    %c0_i32 = arith.constant 0 : i32
    %c0_i32_0 = arith.constant 0 : i32
    %c0_i32_1 = arith.constant 0 : i32
    return %c0_i32, %c0_i32_0 : i32, i32
  }
  func.func @transform_7(%arg0: i32, %arg1: i32) -> (i32, i32) {
    %c0_i32 = arith.constant 0 : i32
    %c0_i32_0 = arith.constant 0 : i32
    return %arg0, %c0_i32 : i32, i32
  }
}

</mosaic_0001>

<bundles_post_ra>
// kernel: _forward_impl.1
= control target key start
LH: loop header
LB: loop body
LE: loop exit
PB: predicated region body
PF: predicated region fallthrough
CT: control target
= control target key end

     0   :  { %12 = vsyncpa [#allocation4], 0  ;;  %s4880_s24 = smov [#allocation3]   ;;  %s5742_s0 = inlined_call_operand.vmem [shape: bf16[8,64,256], index: 0, kind: input, shape index: {}]   ;;  %s5743_s1 = inlined_call_operand.vmem [shape: bf16[64,128], index: 1, kind: input, shape index: {}]   ;;  %s5744_s2 = inlined_call_operand.vmem [shape: bf16[128,64], index: 2, kind: input, shape index: {}]   ;;  %s5745_s3 = inlined_call_operand.vmem [shape: bf16[64,1536], index: 3, kind: input, shape index: {}]   ;;  %s5746_s4 = inlined_call_operand.hbm [shape: bf16[1024,512], index: 4, kind: input, shape index: {}]   ;;  %s5747_s5 = inlined_call_operand.vmem [shape: bf16[512,128], index: 5, kind: input, shape index: {}]   ;;  %s5748_s6 = inlined_call_operand.vmem [shape: f32[1,2176], index: 6, kind: input, shape index: {}]   ;;  %s5749_s7 = inlined_call_operand.vmem [shape: f32[8,128], index: 7, kind: output, shape index: {}]  }
   0x1   :  { %s26_s25 = sshll.u32 %s4880_s24, 4  ;;  %s27_s25 = int_to_ptr.vmem [resolvable:$true] %s26_s25 }
   0x2   :  { %s4866_s26 = scalar_lea.vmem %s27_s25, 32768  ;;  %p4871_p1 = scmp.lt.s32.totalorder %s27_s25, %s27_s25 }
   0x3   :  { %p4867_p0 = scmp.ne.s32.totalorder %s27_s25, %s4866_s26  ;;  %p4872_p2 = scmp.lt.s32.totalorder %s4866_s26, %s4866_s26 }
   0x5   :  { %p4873_p3 = por %p4872_p2, %p4871_p1 }
   0x7   :  { %p4874_p4 = pnand %p4873_p3, %p4867_p0 }
   0x9   :  { %4877 = shalt.err (!%p4874_p4)
}
   0xa   :  { %s4881_s27 = smov 256   ;;  %s4882_s28 = smov 16  }
   0xb   :  { %32 = dma.hbm_to_vmem [thread:$0]  %s5746_s4, 32768, %s27_s25, [#allocation4], %s4881_s27, %s4881_s27, %s4882_s28  }
   0xc   :  { %4878 = dma.done.wait [#allocation4], 32768  }
   0xd   :  { %4879 = vsyncadd [#allocation4], 4294934528  ;;  %v56_v0 = vld [vmem:[%s5742_s0 + $0x40] sm:$0xff]  ;;  %v57_v2 = vld [vmem:[%s5742_s0 + $0x48] sm:$0xff]  ;;  %vm45_vm0 = vcmask 523264   ;;  %vm507_vm1 = vcmask 130112  }
   0xe   :  { %v48_v1 = vld [vmem:[%s5742_s0] sm:$0xff]  ;;  %v128_v3 = vunpack.c.l.bf16 %v56_v0  ;;  %v129_v4 = vunpack.c.h.bf16 %v56_v0  ;;  %v49_v7 = vld [vmem:[%s5742_s0 + $0x8] sm:$0xff]  ;;  %v58_v8 = vld [vmem:[%s5742_s0 + $0x50] sm:$0xff]  ;;  %v130_v9 = vunpack.c.l.bf16 %v57_v2  ;;  %v131_v10 = vunpack.c.h.bf16 %v57_v2 }
   0xf   :  { %v112_v5 = vunpack.c.l.bf16 %v48_v1  ;;  %v113_v6 = vunpack.c.h.bf16 %v48_v1  ;;  %v114_v11 = vunpack.c.l.bf16 %v49_v7  ;;  %v115_v12 = vunpack.c.h.bf16 %v49_v7  ;;  %v50_v13 = vld [vmem:[%s5742_s0 + $0x10] sm:$0xff]  ;;  %v65_v22 = vld [vmem:[%s5742_s0 + $0x88] sm:$0xff]  ;;  %v64_v23 = vld [vmem:[%s5742_s0 + $0x80] sm:$0xff] }
  0x10   :  { %v264_v14 = vadd.f32 %v129_v4, %v128_v3  ;;  %v132_v16 = vunpack.c.l.bf16 %v58_v8  ;;  %v133_v17 = vunpack.c.h.bf16 %v58_v8  ;;  %v267_v18 = vadd.f32 %v131_v10, %v130_v9  ;;  %v59_v30 = vld [vmem:[%s5742_s0 + $0x58] sm:$0xff]  ;;  %v72_v38 = vld [vmem:[%s5742_s0 + $0xc0] sm:$0xff]  ;;  %v66_v39 = vld [vmem:[%s5742_s0 + $0x90] sm:$0xff] }
  0x11   :  { %v240_v15 = vadd.f32 %v113_v6, %v112_v5  ;;  %v243_v19 = vadd.f32 %v115_v12, %v114_v11  ;;  %v116_v20 = vunpack.c.l.bf16 %v50_v13  ;;  %v117_v21 = vunpack.c.h.bf16 %v50_v13  ;;  %v51_v31 = vld [vmem:[%s5742_s0 + $0x18] sm:$0xff]  ;;  %v52_v46 = vld [vmem:[%s5742_s0 + $0x20] sm:$0xff]  ;;  %v73_v47 = vld [vmem:[%s5742_s0 + $0xc8] sm:$0xff] }
  0x12   :  { %265 = vadd.xlane.f32.xlu1 %v264_v14  ;;  %v270_v24 = vadd.f32 %v133_v17, %v132_v16  ;;  %v146_v25 = vunpack.c.l.bf16 %v65_v22  ;;  %v147_v27 = vunpack.c.h.bf16 %v65_v22  ;;  %v144_v28 = vunpack.c.l.bf16 %v64_v23  ;;  %v67_v50 = vld [vmem:[%s5742_s0 + $0x98] sm:$0xff]  ;;  %v60_v55 = vld [vmem:[%s5742_s0 + $0x60] sm:$0xff]  ;;  %v74_v59 = vld [vmem:[%s5742_s0 + $0xd0] sm:$0xff] }
  0x13   :  { %241 = vadd.xlane.f32.xlu0 %v240_v15  ;;  %v246_v26 = vadd.f32 %v117_v21, %v116_v20  ;;  %v145_v29 = vunpack.c.h.bf16 %v64_v23  ;;  %v134_v32 = vunpack.c.l.bf16 %v59_v30  ;;  %v135_v33 = vunpack.c.h.bf16 %v59_v30  ;;  %v80_v56 = vld [vmem:[%s5742_s0 + $0x100] sm:$0xff]  ;;  %v53_v0 = vld [vmem:[%s5742_s0 + $0x28] sm:$0xff]  ;;  %v82_v16 = vld [vmem:[%s5742_s0 + $0x110] sm:$0xff] }
  0x14   :  { %v291_v34 = vadd.f32 %v147_v27, %v146_v25  ;;  %v118_v36 = vunpack.c.l.bf16 %v51_v31  ;;  %v119_v37 = vunpack.c.h.bf16 %v51_v31  ;;  %v160_v41 = vunpack.c.l.bf16 %v72_v38  ;;  %v81_v3 = vld [vmem:[%s5742_s0 + $0x108] sm:$0xff]  ;;  %v68_v8 = vld [vmem:[%s5742_s0 + $0xa0] sm:$0xff] }
  0x15   :  { %v288_v35 = vadd.f32 %v145_v29, %v144_v28  ;;  %v273_v40 = vadd.f32 %v135_v33, %v134_v32  ;;  %v161_v43 = vunpack.c.h.bf16 %v72_v38  ;;  %v148_v44 = vunpack.c.l.bf16 %v66_v39  ;;  %v61_v11 = vld [vmem:[%s5742_s0 + $0x68] sm:$0xff]  ;;  %v88_v27 = vld [vmem:[%s5742_s0 + $0x140] sm:$0xff]  ;;  %v62_v32 = vld [vmem:[%s5742_s0 + $0x70] sm:$0xff] }
  0x16   :  { %268 = vadd.xlane.f32.xlu1 %v267_v18  ;;  %v249_v42 = vadd.f32 %v119_v37, %v118_v36  ;;  %v149_v45 = vunpack.c.h.bf16 %v66_v39  ;;  %v120_v48 = vunpack.c.l.bf16 %v52_v46  ;;  %v121_v49 = vunpack.c.h.bf16 %v52_v46 }
  0x17   :  { %244 = vadd.xlane.f32.xlu0 %v243_v19  ;;  %v312_v51 = vadd.f32 %v161_v43, %v160_v41  ;;  %v162_v53 = vunpack.c.l.bf16 %v73_v47  ;;  %v163_v54 = vunpack.c.h.bf16 %v73_v47  ;;  %v150_v58 = vunpack.c.l.bf16 %v67_v50  ;;  %v75_v19 = vld [vmem:[%s5742_s0 + $0xd8] sm:$0xff]  ;;  %v69_v43 = vld [vmem:[%s5742_s0 + $0xa8] sm:$0xff] }
  0x18   :  { %v294_v52 = vadd.f32 %v149_v45, %v148_v44  ;;  %v252_v57 = vadd.f32 %v121_v49, %v120_v48  ;;  %v151_v61 = vunpack.c.h.bf16 %v67_v50  ;;  %v136_v62 = vunpack.c.l.bf16 %v60_v55  ;;  %v90_v48 = vld [vmem:[%s5742_s0 + $0x150] sm:$0xff] }
  0x19   :  { %v315_v60 = vadd.f32 %v163_v54, %v162_v53  ;;  %v137_v63 = vunpack.c.h.bf16 %v60_v55  ;;  %v176_v1 = vunpack.c.l.bf16 %v80_v56  ;;  %v177_v2 = vunpack.c.h.bf16 %v80_v56  ;;  %v97_v56 = vld [vmem:[%s5742_s0 + $0x188] sm:$0xff] }
  0x1a   :  { %271 = vadd.xlane.f32.xlu1 %v270_v24  ;;  %v297_v4 = vadd.f32 %v151_v61, %v150_v58  ;;  %v164_v6 = vunpack.c.l.bf16 %v74_v59  ;;  %v165_v7 = vunpack.c.h.bf16 %v74_v59  ;;  %v122_v10 = vunpack.c.l.bf16 %v53_v0  ;;  %v89_v24 = vld [vmem:[%s5742_s0 + $0x148] sm:$0xff]  ;;  %v96_v59 = vld [vmem:[%s5742_s0 + $0x180] sm:$0xff] }
  0x1b   :  { %247 = vadd.xlane.f32.xlu0 %v246_v26  ;;  %v276_v5 = vadd.f32 %v137_v63, %v136_v62  ;;  %v336_v9 = vadd.f32 %v177_v2, %v176_v1  ;;  %v123_v13 = vunpack.c.h.bf16 %v53_v0  ;;  %v178_v14 = vunpack.c.l.bf16 %v81_v3  ;;  %v63_v0 = vld [vmem:[%s5742_s0 + $0x78] sm:$0xff] }
  0x1c   :  { %v318_v12 = vadd.f32 %v165_v7, %v164_v6  ;;  %v179_v15 = vunpack.c.h.bf16 %v81_v3  ;;  %v152_v17 = vunpack.c.l.bf16 %v68_v8  ;;  %v153_v18 = vunpack.c.h.bf16 %v68_v8  ;;  %v55_v3 = vld [vmem:[%s5742_s0 + $0x38] sm:$0xff]  ;;  %v77_v8 = vld [vmem:[%s5742_s0 + $0xe8] sm:$0xff] }
  0x1d   :  { %v255_v20 = vadd.f32 %v123_v13, %v122_v10  ;;  %v138_v22 = vunpack.c.l.bf16 %v61_v11  ;;  %v139_v23 = vunpack.c.h.bf16 %v61_v11  ;;  %v180_v26 = vunpack.c.l.bf16 %v82_v16  ;;  %v70_v11 = vld [vmem:[%s5742_s0 + $0xb0] sm:$0xff] }
  0x1e   :  { %292 = vadd.xlane.f32.xlu1 %v291_v34  ;;  %v339_v21 = vadd.f32 %v179_v15, %v178_v14  ;;  %v300_v25 = vadd.f32 %v153_v18, %v152_v17  ;;  %v181_v29 = vunpack.c.h.bf16 %v82_v16  ;;  %v166_v30 = vunpack.c.l.bf16 %v75_v19  ;;  %v91_v16 = vld [vmem:[%s5742_s0 + $0x158] sm:$0xff] }
  0x1f   :  { %289 = vadd.xlane.f32.xlu0 %v288_v35  ;;  %v279_v28 = vadd.f32 %v139_v23, %v138_v22  ;;  %v167_v31 = vunpack.c.h.bf16 %v75_v19  ;;  %v194_v33 = vunpack.c.l.bf16 %v89_v24  ;;  %v195_v34 = vunpack.c.h.bf16 %v89_v24  ;;  %v54_v35 = vld [vmem:[%s5742_s0 + $0x30] sm:$0xff]  ;;  %v84_v19 = vld [vmem:[%s5742_s0 + $0x120] sm:$0xff] }
  0x20   :  { %v342_v36 = vadd.f32 %v181_v29, %v180_v26  ;;  %v192_v38 = vunpack.c.l.bf16 %v88_v27  ;;  %v193_v39 = vunpack.c.h.bf16 %v88_v27  ;;  %v141_v45 = vunpack.c.h.bf16 %v62_v32  ;;  %v104_v24 = vld [vmem:[%s5742_s0 + $0x1c0] sm:$0xff]  ;;  %v98_v27 = vld [vmem:[%s5742_s0 + $0x190] sm:$0xff] }
  0x21   :  { %v321_v37 = vadd.f32 %v167_v31, %v166_v30  ;;  %v363_v41 = vadd.f32 %v195_v34, %v194_v33  ;;  %v124_v46 = vunpack.c.l.bf16 %v54_v35  ;;  %v125_v47 = vunpack.c.h.bf16 %v54_v35  ;;  %v105_v35 = vld [vmem:[%s5742_s0 + $0x1c8] sm:$0xff] }
  0x22   :  { %274 = vadd.xlane.f32.xlu1 %v273_v40  ;;  %v76_v40 = vld [vmem:[%s5742_s0 + $0xe0] sm:$0xff]  ;;  %v360_v44 = vadd.f32 %v193_v39, %v192_v38  ;;  %v154_v54 = vunpack.c.l.bf16 %v69_v43  ;;  %v155_v55 = vunpack.c.h.bf16 %v69_v43  ;;  %v196_v58 = vunpack.c.l.bf16 %v90_v48  ;;  %v78_v43 = vld [vmem:[%s5742_s0 + $0xf0] sm:$0xff] }
  0x23   :  { %250 = vadd.xlane.f32.xlu0 %v249_v42  ;;  %v140_v42 = vunpack.c.l.bf16 %v62_v32  ;;  %v168_v49 = vunpack.c.l.bf16 %v76_v40  ;;  %v169_v50 = vunpack.c.h.bf16 %v76_v40  ;;  %v258_v53 = vadd.f32 %v125_v47, %v124_v46  ;;  %v71_v32 = vld [vmem:[%s5742_s0 + $0xb8] sm:$0xff]  ;;  %v85_v40 = vld [vmem:[%s5742_s0 + $0x128] sm:$0xff] }
  0x24   :  { %v197_v61 = vunpack.c.h.bf16 %v90_v48  ;;  %v210_v1 = vunpack.c.l.bf16 %v97_v56  ;;  %v211_v2 = vunpack.c.h.bf16 %v97_v56  ;;  %v208_v6 = vunpack.c.l.bf16 %v96_v59  ;;  %v99_v48 = vld [vmem:[%s5742_s0 + $0x198] sm:$0xff] }
  0x25   :  { %v209_v7 = vunpack.c.h.bf16 %v96_v59  ;;  %v142_v10 = vunpack.c.l.bf16 %v63_v0  ;;  %v143_v13 = vunpack.c.h.bf16 %v63_v0  ;;  %v126_v14 = vunpack.c.l.bf16 %v55_v3  ;;  %v79_v56 = vld [vmem:[%s5742_s0 + $0xf8] sm:$0xff]  ;;  %v106_v59 = vld [vmem:[%s5742_s0 + $0x1d0] sm:$0xff]  ;;  %v93_v0 = vld [vmem:[%s5742_s0 + $0x168] sm:$0xff] }
  0x26   :  { %313 = vadd.xlane.f32.xlu1 %v312_v51  ;;  %v83_v51 = vld [vmem:[%s5742_s0 + $0x118] sm:$0xff]  ;;  %v127_v15 = vunpack.c.h.bf16 %v55_v3  ;;  %v170_v17 = vunpack.c.l.bf16 %v77_v8  ;;  %v171_v18 = vunpack.c.h.bf16 %v77_v8  ;;  %v156_v22 = vunpack.c.l.bf16 %v70_v11  ;;  %v86_v3 = vld [vmem:[%s5742_s0 + $0x130] sm:$0xff] }
  0x27   :  { %295 = vadd.xlane.f32.xlu0 %v294_v52  ;;  %v282_v52 = vadd.f32 %v141_v45, %v140_v42  ;;  %v182_v62 = vunpack.c.l.bf16 %v83_v51  ;;  %v183_v63 = vunpack.c.h.bf16 %v83_v51  ;;  %v157_v23 = vunpack.c.h.bf16 %v70_v11  ;;  %v92_v51 = vld [vmem:[%s5742_s0 + $0x160] sm:$0xff]  ;;  %v107_v8 = vld [vmem:[%s5742_s0 + $0x1d8] sm:$0xff] }
  0x28   :  { %v198_v26 = vunpack.c.l.bf16 %v91_v16  ;;  %v199_v29 = vunpack.c.h.bf16 %v91_v16  ;;  %v184_v30 = vunpack.c.l.bf16 %v84_v19  ;;  %v185_v31 = vunpack.c.h.bf16 %v84_v19  ;;  %v100_v11 = vld [vmem:[%s5742_s0 + $0x1a0] sm:$0xff]  ;;  %v94_v16 = vld [vmem:[%s5742_s0 + $0x170] sm:$0xff]  ;;  %v87_v19 = vld [vmem:[%s5742_s0 + $0x138] sm:$0xff] }
  0x29   :  { %v224_v33 = vunpack.c.l.bf16 %v104_v24  ;;  %v225_v34 = vunpack.c.h.bf16 %v104_v24  ;;  %v212_v38 = vunpack.c.l.bf16 %v98_v27  ;;  %v213_v39 = vunpack.c.h.bf16 %v98_v27  ;;  %v108_v24 = vld [vmem:[%s5742_s0 + $0x1e0] sm:$0xff]  ;;  %v101_v27 = vld [vmem:[%s5742_s0 + $0x1a8] sm:$0xff] }
  0x2a   :  { %253 = vadd.xlane.f32.xlu1 %v252_v57  ;;  %v324_v57 = vadd.f32 %v169_v50, %v168_v49  ;;  %v158_v42 = vunpack.c.l.bf16 %v71_v32  ;;  %v159_v45 = vunpack.c.h.bf16 %v71_v32  ;;  %v226_v46 = vunpack.c.l.bf16 %v105_v35  ;;  %v102_v32 = vld [vmem:[%s5742_s0 + $0x1b0] sm:$0xff] }
  0x2b   :  { %316 = vadd.xlane.f32.xlu0 %v315_v60  ;;  %v303_v60 = vadd.f32 %v155_v55, %v154_v54  ;;  %v227_v47 = vunpack.c.h.bf16 %v105_v35  ;;  %v186_v49 = vunpack.c.l.bf16 %v85_v40  ;;  %v187_v50 = vunpack.c.h.bf16 %v85_v40  ;;  %v95_v35 = vld [vmem:[%s5742_s0 + $0x178] sm:$0xff] }
  0x2c   :  { %v172_v54 = vunpack.c.l.bf16 %v78_v43  ;;  %v173_v55 = vunpack.c.h.bf16 %v78_v43  ;;  %v103_v40 = vld [vmem:[%s5742_s0 + $0x1b8] sm:$0xff]  ;;  %v109_v43 = vld [vmem:[%s5742_s0 + $0x1e8] sm:$0xff]  ;;  %vm514_vm2 = vcmask 195712   ;;  %vm4884_vm3 = vmmov 0  }
  0x2d   :  { %vm521_vm4 = vcmask 261312   ;;  %vm528_vm5 = vcmask 326912   ;;  %vm535_vm6 = vcmask 392512   ;;  %vm542_vm7 = vcmask 458112  }
  0x2e   :  { %298 = vadd.xlane.f32.xlu1 %v297_v4  ;;  %v366_v4 = vadd.f32 %v197_v61, %v196_v58  ;;  %v214_v58 = vunpack.c.l.bf16 %v99_v48  ;;  %v215_v61 = vunpack.c.h.bf16 %v99_v48  ;;  %v110_v48 = vld [vmem:[%s5742_s0 + $0x1f0] sm:$0xff]  ;;  %vm549_vm8 = vcmask 523712  }
  0x2f   :  { %277 = vadd.xlane.f32.xlu0 %v276_v5  ;;  %v345_v5 = vadd.f32 %v183_v63, %v182_v62  ;;  %v200_v62 = vunpack.c.l.bf16 %v92_v51  ;;  %v201_v63 = vunpack.c.h.bf16 %v92_v51  ;;  %v111_v51 = vld [vmem:[%s5742_s0 + $0x1f8] sm:$0xff]  ;;  %vm824_vm9 = vcmask 1041409  }
  0x30   :  { %vm826_vm10 = vcmask 1042434   ;;  %vm828_vm11 = vcmask 1043459   ;;  %vm830_vm12 = vcmask 1044484   ;;  %vm832_vm13 = vcmask 1045509  }
  0x31   :  { %vm834_vm14 = vcmask 1046534   ;;  %vm836_vm15 = vcmask 1047559  }
  0x32   :  { %337 = vadd.xlane.f32.xlu1 %v336_v9  ;;  %v387_v9 = vadd.f32 %v211_v2, %v210_v1  ;;  %v174_v1 = vunpack.c.l.bf16 %v79_v56  ;;  %v175_v2 = vunpack.c.h.bf16 %v79_v56 }
  0x33   :  { %319 = vadd.xlane.f32.xlu0 %v318_v12  ;;  %v384_v12 = vadd.f32 %v209_v7, %v208_v6  ;;  %v228_v6 = vunpack.c.l.bf16 %v106_v59  ;;  %v229_v7 = vunpack.c.h.bf16 %v106_v59  ;;  %v237_v59 = vunpack.c.h.bf16 %v110_v48 }
  0x36   :  { %256 = vadd.xlane.f32.xlu1 %v255_v20  ;;  %v285_v20 = vadd.f32 %v143_v13, %v142_v10  ;;  %v202_v10 = vunpack.c.l.bf16 %v93_v0  ;;  %v203_v13 = vunpack.c.h.bf16 %v93_v0  ;;  %v496_v0 = vlaneseq }
  0x37   :  { %340 = vadd.xlane.f32.xlu0 %v339_v21  ;;  %v261_v21 = vadd.f32 %v127_v15, %v126_v14  ;;  %v188_v14 = vunpack.c.l.bf16 %v86_v3  ;;  %v189_v15 = vunpack.c.h.bf16 %v86_v3 }
  0x3a   :  { %301 = vadd.xlane.f32.xlu1 %v300_v25  ;;  %v327_v25 = vadd.f32 %v171_v18, %v170_v17  ;;  %v230_v17 = vunpack.c.l.bf16 %v107_v8  ;;  %v231_v18 = vunpack.c.h.bf16 %v107_v8 }
  0x3b   :  { %280 = vadd.xlane.f32.xlu0 %v279_v28  ;;  %v306_v28 = vadd.f32 %v157_v23, %v156_v22  ;;  %v216_v22 = vunpack.c.l.bf16 %v100_v11  ;;  %v217_v23 = vunpack.c.h.bf16 %v100_v11  ;;  %v4355_v11 = vld [vmem:[%s5743_s1 + $0x10] sm:$0xff]  }
  0x3e   :  { %343 = vadd.xlane.f32.xlu1 %v342_v36  ;;  %v369_v36 = vadd.f32 %v199_v29, %v198_v26  ;;  %v204_v26 = vunpack.c.l.bf16 %v94_v16  ;;  %v205_v29 = vunpack.c.h.bf16 %v94_v16 }
  0x3f   :  { %322 = vadd.xlane.f32.xlu0 %v321_v37  ;;  %v348_v37 = vadd.f32 %v185_v31, %v184_v30  ;;  %v190_v30 = vunpack.c.l.bf16 %v87_v19  ;;  %v191_v31 = vunpack.c.h.bf16 %v87_v19 }
  0x42   :  { %364 = vadd.xlane.f32.xlu1 %v363_v41  ;;  %v408_v41 = vadd.f32 %v225_v34, %v224_v33  ;;  %v232_v33 = vunpack.c.l.bf16 %v108_v24  ;;  %v233_v34 = vunpack.c.h.bf16 %v108_v24 }
  0x43   :  { %361 = vadd.xlane.f32.xlu0 %v360_v44  ;;  %v390_v44 = vadd.f32 %v213_v39, %v212_v38  ;;  %v218_v38 = vunpack.c.l.bf16 %v101_v27  ;;  %v219_v39 = vunpack.c.h.bf16 %v101_v27 }
  0x46   :  { %283 = vadd.xlane.f32.xlu1 %v282_v52  ;;  %v309_v52 = vadd.f32 %v159_v45, %v158_v42  ;;  %v220_v42 = vunpack.c.l.bf16 %v102_v32  ;;  %v221_v45 = vunpack.c.h.bf16 %v102_v32 }
  0x47   :  { %259 = vadd.xlane.f32.xlu0 %v258_v53  ;;  %v411_v53 = vadd.f32 %v227_v47, %v226_v46  ;;  %v206_v46 = vunpack.c.l.bf16 %v95_v35  ;;  %v207_v47 = vunpack.c.h.bf16 %v95_v35 }
  0x4a   :  { %325 = vadd.xlane.f32.xlu1 %v324_v57  ;;  %v351_v57 = vadd.f32 %v187_v50, %v186_v49  ;;  %v222_v49 = vunpack.c.l.bf16 %v103_v40  ;;  %v223_v50 = vunpack.c.h.bf16 %v103_v40 }
  0x4b   :  { %304 = vadd.xlane.f32.xlu0 %v303_v60  ;;  %v330_v60 = vadd.f32 %v173_v55, %v172_v54  ;;  %v234_v54 = vunpack.c.l.bf16 %v109_v43  ;;  %v235_v55 = vunpack.c.h.bf16 %v109_v43 }
  0x4c   :  { %v405_v56 = vadd.f32 %v223_v50, %v222_v49  ;;  %v4360_v49 = vld [vmem:[%s5744_s2 + $0x28] sm:$0xff]  }
  0x4e   :  { %367 = vadd.xlane.f32.xlu1 %v366_v4  ;;  %v393_v4 = vadd.f32 %v215_v61, %v214_v58  ;;  %v423_v58 = vadd.f32 %v235_v55, %v234_v54  ;;  %v239_v61 = vunpack.c.h.bf16 %v111_v51 }
  0x4f   :  { %346 = vadd.xlane.f32.xlu0 %v345_v5  ;;  %v372_v5 = vadd.f32 %v201_v63, %v200_v62 }
  0x52   :  { %388 = vadd.xlane.f32.xlu1 %v387_v9  ;;  %v333_v9 = vadd.f32 %v175_v2, %v174_v1  ;;  %v5121_v1 = vand.u32 127, %v496_v0  ;;  %v5123_v2 = vshrl.u32 %v496_v0, 7  ;;  %v4362_v0 = vld [vmem:[%s5744_s2 + $0x18] sm:$0xff]  }
  0x53   :  { %385 = vadd.xlane.f32.xlu0 %v384_v12  ;;  %v414_v12 = vadd.f32 %v229_v7, %v228_v6  ;;  %v4354_v6 = vld [vmem:[%s5743_s1 + $0x18] sm:$0xff]  }
  0x54   :  { %v502_v3 = vadd.s32 4294967288, %v5121_v1  ;;  %v5136_v7 = vsub.s32 %v5121_v1, %v5123_v2  ;;  %v516_v16 = vadd.s32 4294967272, %v5121_v1 }
  0x56   :  { %286 = vadd.xlane.f32.xlu1 %v285_v20  ;;  %v375_v20 = vadd.f32 %v203_v13, %v202_v10  ;;  %v5139_v10 = vsub.s32 %v502_v3, %v5123_v2 }
  0x57   :  { %262 = vadd.xlane.f32.xlu0 %v261_v21  ;;  %v354_v21 = vadd.f32 %v189_v15, %v188_v14 }
  0x5a   :  { %328 = vadd.xlane.f32.xlu1 %v327_v25  ;;  %v417_v25 = vadd.f32 %v231_v18, %v230_v17  ;;  %v4356_v17 = vld [vmem:[%s5743_s1 + $0x8] sm:$0xff]  }
  0x5b   :  { %307 = vadd.xlane.f32.xlu0 %v306_v28  ;;  %v396_v28 = vadd.f32 %v217_v23, %v216_v22  ;;  %v4357_v23 = vld [vmem:[%s5743_s1] sm:$0xff]  }
  0x5e   :  { %370 = vadd.xlane.f32.xlu1 %v369_v36  ;;  %v378_v36 = vadd.f32 %v205_v29, %v204_v26 }
  0x5f   :  { %349 = vadd.xlane.f32.xlu0 %v348_v37  ;;  %v357_v37 = vadd.f32 %v191_v31, %v190_v30 }
  0x62   :  { %409 = vadd.xlane.f32.xlu1 %v408_v41  ;;  %v420_v41 = vadd.f32 %v233_v34, %v232_v33  ;;  %v5172_v34 = vsub.s32 %v516_v16, %v5123_v2 }
  0x63   :  { %391 = vadd.xlane.f32.xlu0 %v390_v44  ;;  %v399_v44 = vadd.f32 %v219_v39, %v218_v38  ;;  %v4358_v38 = vld [vmem:[%s5744_s2 + $0x38] sm:$0xff]  }
  0x66   :  { %310 = vadd.xlane.f32.xlu1 %v309_v52  ;;  %v402_v52 = vadd.f32 %v221_v45, %v220_v42  ;;  %v4359_v42 = vld [vmem:[%s5744_s2 + $0x30] sm:$0xff]  }
  0x67   :  { %412 = vadd.xlane.f32.xlu0 %v411_v53  ;;  %v381_v53 = vadd.f32 %v207_v47, %v206_v46 }
  0x6a   :  { %352 = vadd.xlane.f32.xlu1 %v351_v57  ;;  %v236_v57 = vunpack.c.l.bf16 %v110_v48 }
  0x6b   :  { %331 = vadd.xlane.f32.xlu0 %v330_v60  ;;  %v238_v60 = vunpack.c.l.bf16 %v111_v51 }
  0x6c   :  { %v426_v62 = vadd.f32 %v237_v59, %v236_v57 }
  0x6d   :  { %v429_v63 = vadd.f32 %v239_v61, %v238_v60 }
  0x6e   :  { %394 = vadd.xlane.f32.xlu1 %v393_v4  ;;  %v4883_v4 = vmov 0.0  }
  0x6f   :  { %373 = vadd.xlane.f32.xlu0 %v372_v5  ;;  %46 = vst.msk [vmem:[#allocation2] sm:$0xff] %vm45_vm0, %v4883_v4  ;;  %4316 = vmatprep.subr.bf16.mxu0 %v4883_v4  ;;  %v509_v5 = vadd.s32 4294967280, %v5121_v1 }
  0x70   :  { %4328 = vmatprep.subr.bf16.mxu1 %v4883_v4  ;;  %4317 = vmatpush3.bf16.msra.mxu0 %v4354_v6 }
  0x71   :  { %4318 = vmatprep.subr.bf16.mxu0 %v4883_v4  ;;  %v5147_v15 = vsub.s32 %v509_v5, %v5123_v2  ;;  %4324 = vmatprep.mubr.msk.bf16.mxu0 %vm4884_vm3, %v4883_v4 }
  0x72   :  { %334 = vadd.xlane.f32.xlu1 %v333_v9  ;;  %4344 = vmatprep.mubr.msk.bf16.mxu1 %vm4884_vm3, %v4883_v4 }
  0x73   :  { %415 = vadd.xlane.f32.xlu0 %v414_v12  ;;  %4329 = vmatpush3.bf16.msra.mxu1 %v4358_v38 }
  0x74   :  { %4319 = vmatpush3.bf16.msra.mxu0 %v4355_v11  ;;  %4330 = vmatprep.subr.bf16.mxu1 %v4883_v4 }
  0x75   :  { %4320 = vmatprep.subr.bf16.mxu0 %v4883_v4 }
  0x76   :  { %376 = vadd.xlane.f32.xlu1 %v375_v20 }
  0x77   :  { %355 = vadd.xlane.f32.xlu0 %v354_v21  ;;  %4331 = vmatpush3.bf16.msra.mxu1 %v4359_v42 }
  0x78   :  { %4321 = vmatpush3.bf16.msra.mxu0 %v4356_v17  ;;  %4332 = vmatprep.subr.bf16.mxu1 %v4883_v4 }
  0x79   :  { %4322 = vmatprep.subr.bf16.mxu0 %v4883_v4 }
  0x7a   :  { %418 = vadd.xlane.f32.xlu1 %v417_v25 }
  0x7b   :  { %397 = vadd.xlane.f32.xlu0 %v396_v28  ;;  %4333 = vmatpush3.bf16.msra.mxu1 %v4360_v49 }
  0x7c   :  { %4323 = vmatpush3.bf16.msra.mxu0 %v4357_v23  ;;  %4334 = vmatprep.subr.bf16.mxu1 %v4883_v4 }
  0x7e   :  { %379 = vadd.xlane.f32.xlu1 %v378_v36 }
  0x7f   :  { %358 = vadd.xlane.f32.xlu0 %v357_v37 }
  0x82   :  { %421 = vadd.xlane.f32.xlu1 %v420_v41  ;;  %v523_v41 = vadd.s32 4294967264, %v5121_v1 }
  0x83   :  { %400 = vadd.xlane.f32.xlu0 %v399_v44 }
  0x84   :  { %v5189_v48 = vsub.s32 %v523_v41, %v5123_v2 }
  0x86   :  { %403 = vadd.xlane.f32.xlu1 %v402_v52 }
  0x87   :  { %382 = vadd.xlane.f32.xlu0 %v381_v53 }
  0x8a   :  { %406 = vadd.xlane.f32.xlu1 %v405_v56  ;;  %v4361_v56 = vld [vmem:[%s5744_s2 + $0x20] sm:$0xff]  }
  0x8b   :  { %424 = vadd.xlane.f32.xlu0 %v423_v58  ;;  %4335 = vmatpush3.bf16.msra.mxu1 %v4361_v56 }
  0x8c   :  { %4336 = vmatprep.subr.bf16.mxu1 %v4883_v4 }
  0x8e   :  { %430 = vadd.xlane.f32.xlu1 %v429_v63  ;;  %v530_v63 = vadd.s32 4294967256, %v5121_v1 }
  0x8f   :  { %427 = vadd.xlane.f32.xlu0 %v426_v62  ;;  %4337 = vmatpush3.bf16.msra.mxu1 %v4362_v0 }
  0x90   :  { %v5216_v11 = vsub.s32 %v530_v63, %v5123_v2  ;;  %4338 = vmatprep.subr.bf16.mxu1 %v4883_v4 }
  0x9b   :  { %v266_v8 = vpop.xlane.xlu1 %265 }
  0x9c   :  { %v242_v9 = vpop.xlane.xlu0 %241  ;;  %v554_v12 = vrot.slane %v266_v8, %v5136_v7 }
  0x9d   :  { %v501_v18 = vrot.slane %v242_v9, %v5136_v7 }
  0x9f   :  { %v269_v13 = vpop.xlane.xlu1 %268 }
  0xa0   :  { %v245_v14 = vpop.xlane.xlu0 %244  ;;  %v558_v19 = vrot.slane %v269_v13, %v5139_v10 }
  0xa1   :  { %v506_v20 = vrot.slane %v245_v14, %v5139_v10 }
  0xa2   :  { %v559_v21 = vsel %vm507_vm1, %v558_v19, %v554_v12  ;;  %v4363_v12 = vld [vmem:[%s5744_s2 + $0x10] sm:$0xff]  }
  0xa3   :  { %v508_v22 = vsel %vm507_vm1, %v506_v20, %v501_v18  ;;  %v272_v24 = vpop.xlane.xlu1 %271  ;;  %4339 = vmatpush3.bf16.msra.mxu1 %v4363_v12  ;;  %v4364_v20 = vld [vmem:[%s5744_s2 + $0x8] sm:$0xff]  }
  0xa4   :  { %v248_v25 = vpop.xlane.xlu0 %247  ;;  %v563_v26 = vrot.slane %v272_v24, %v5147_v15  ;;  %4340 = vmatprep.subr.bf16.mxu1 %v4883_v4 }
  0xa5   :  { %v513_v27 = vrot.slane %v248_v25, %v5147_v15 }
  0xa6   :  { %v564_v28 = vsel %vm514_vm2, %v563_v26, %v559_v21 }
  0xa7   :  { %v515_v29 = vsel %vm514_vm2, %v513_v27, %v508_v22  ;;  %v293_v30 = vpop.xlane.xlu1 %292  ;;  %4341 = vmatpush3.bf16.msra.mxu1 %v4364_v20 }
  0xa8   :  { %v290_v31 = vpop.xlane.xlu0 %289  ;;  %v597_v32 = vrot.slane %v293_v30, %v5139_v10  ;;  %4342 = vmatprep.subr.bf16.mxu1 %v4883_v4 }
  0xa9   :  { %v593_v33 = vrot.slane %v290_v31, %v5136_v7 }
  0xab   :  { %v598_v35 = vsel %vm507_vm1, %v597_v32, %v593_v33  ;;  %v275_v36 = vpop.xlane.xlu1 %274  ;;  %v537_v33 = vadd.s32 4294967248, %v5121_v1 }
  0xac   :  { %v251_v37 = vpop.xlane.xlu0 %250  ;;  %v568_v39 = vrot.slane %v275_v36, %v5172_v34 }
  0xad   :  { %v520_v40 = vrot.slane %v251_v37, %v5172_v34  ;;  %v5247_v4 = vsub.s32 %v537_v33, %v5123_v2 }
  0xae   :  { %v569_v43 = vsel %vm521_vm4, %v568_v39, %v564_v28 }
  0xaf   :  { %v522_v44 = vsel %vm521_vm4, %v520_v40, %v515_v29  ;;  %v314_v45 = vpop.xlane.xlu1 %313 }
  0xb0   :  { %v296_v46 = vpop.xlane.xlu0 %295  ;;  %v632_v53 = vrot.slane %v314_v45, %v5136_v7 }
  0xb1   :  { %v602_v47 = vrot.slane %v296_v46, %v5147_v15 }
  0xb3   :  { %v603_v50 = vsel %vm514_vm2, %v602_v47, %v598_v35  ;;  %v254_v51 = vpop.xlane.xlu1 %253 }
  0xb4   :  { %v317_v52 = vpop.xlane.xlu0 %316  ;;  %v527_v54 = vrot.slane %v254_v51, %v5189_v48 }
  0xb5   :  { %v636_v55 = vrot.slane %v317_v52, %v5139_v10 }
  0xb6   :  { %v529_v57 = vsel %vm528_vm5, %v527_v54, %v522_v44 }
  0xb7   :  { %v637_v58 = vsel %vm507_vm1, %v636_v55, %v632_v53  ;;  %v299_v59 = vpop.xlane.xlu1 %298  ;;  %v544_v53 = vadd.s32 4294967240, %v5121_v1 }
  0xb8   :  { %v278_v60 = vpop.xlane.xlu0 %277  ;;  %v607_v61 = vrot.slane %v299_v59, %v5172_v34 }
  0xb9   :  { %v573_v62 = vrot.slane %v278_v60, %v5189_v48  ;;  %v5264_v56 = vsub.s32 %v544_v53, %v5123_v2 }
  0xba   :  { %v608_v3 = vsel %vm521_vm4, %v607_v61, %v603_v50 }
  0xbb   :  { %v574_v5 = vsel %vm528_vm5, %v573_v62, %v569_v43  ;;  %v338_v6 = vpop.xlane.xlu1 %337 }
  0xbc   :  { %v320_v8 = vpop.xlane.xlu0 %319  ;;  %v671_v17 = vrot.slane %v338_v6, %v5136_v7 }
  0xbd   :  { %v641_v9 = vrot.slane %v320_v8, %v5147_v15 }
  0xbf   :  { %v642_v13 = vsel %vm514_vm2, %v641_v9, %v637_v58  ;;  %v257_v14 = vpop.xlane.xlu1 %256 }
  0xc0   :  { %v341_v16 = vpop.xlane.xlu0 %340  ;;  %v534_v18 = vrot.slane %v257_v14, %v5216_v11 }
  0xc1   :  { %v675_v19 = vrot.slane %v341_v16, %v5139_v10 }
  0xc2   :  { %v536_v21 = vsel %vm535_vm6, %v534_v18, %v529_v57 }
  0xc3   :  { %v676_v22 = vsel %vm507_vm1, %v675_v19, %v671_v17  ;;  %v302_v23 = vpop.xlane.xlu1 %301 }
  0xc4   :  { %v281_v24 = vpop.xlane.xlu0 %280  ;;  %v612_v25 = vrot.slane %v302_v23, %v5189_v48 }
  0xc5   :  { %v578_v26 = vrot.slane %v281_v24, %v5216_v11 }
  0xc6   :  { %v613_v27 = vsel %vm528_vm5, %v612_v25, %v608_v3 }
  0xc7   :  { %v579_v28 = vsel %vm535_vm6, %v578_v26, %v574_v5  ;;  %v344_v29 = vpop.xlane.xlu1 %343 }
  0xc8   :  { %v323_v30 = vpop.xlane.xlu0 %322  ;;  %v680_v31 = vrot.slane %v344_v29, %v5147_v15 }
  0xc9   :  { %v646_v32 = vrot.slane %v323_v30, %v5172_v34 }
  0xca   :  { %v5241_v35 = vsel %vm514_vm2, %v680_v31, %v676_v22 }
  0xcb   :  { %v647_v36 = vsel %vm521_vm4, %v646_v32, %v642_v13  ;;  %v365_v37 = vpop.xlane.xlu1 %364 }
  0xcc   :  { %v362_v38 = vpop.xlane.xlu0 %361  ;;  %v714_v39 = vrot.slane %v365_v37, %v5139_v10 }
  0xcd   :  { %v710_v40 = vrot.slane %v362_v38, %v5136_v7 }
  0xcf   :  { %v5250_v41 = vsel %vm507_vm1, %v714_v39, %v710_v40  ;;  %v284_v42 = vpop.xlane.xlu1 %283 }
  0xd0   :  { %v260_v43 = vpop.xlane.xlu0 %259  ;;  %v583_v44 = vrot.slane %v284_v42, %v5247_v4 }
  0xd1   :  { %v541_v45 = vrot.slane %v260_v43, %v5247_v4 }
  0xd2   :  { %v584_v46 = vsel %vm542_vm7, %v583_v44, %v579_v28 }
  0xd3   :  { %v543_v47 = vsel %vm542_vm7, %v541_v45, %v536_v21  ;;  %v326_v49 = vpop.xlane.xlu1 %325 }
  0xd4   :  { %v305_v50 = vpop.xlane.xlu0 %304  ;;  %v651_v23 = vrot.slane %v326_v49, %v5189_v48 }
  0xd5   :  { %v617_v9 = vrot.slane %v305_v50, %v5216_v11 }
  0xd7   :  { %v5256_v51 = vpop.xlane.xlu1 %367  ;;  %v618_v16 = vsel %vm535_vm6, %v617_v9, %v613_v27  ;;  %v652_v27 = vsel %vm528_vm5, %v651_v23, %v647_v36 }
  0xd8   :  { %v347_v52 = vpop.xlane.xlu0 %346 }
  0xd9   :  { %v685_v42 = vrot.slane %v347_v52, %v5172_v34 }
  0xdb   :  { %v5259_v54 = vpop.xlane.xlu1 %388 }
  0xdc   :  { %v5261_v55 = vpop.xlane.xlu0 %385  ;;  %v753_v9 = vrot.slane %v5259_v54, %v5139_v10 }
  0xdf   :  { %v287_v57 = vpop.xlane.xlu1 %286 }
  0xe0   :  { %v263_v58 = vpop.xlane.xlu0 %262  ;;  %v588_v59 = vrot.slane %v287_v57, %v5264_v56 }
  0xe1   :  { %v548_v60 = vrot.slane %v263_v58, %v5264_v56  ;;  %v719_v58 = vrot.slane %v5256_v51, %v5147_v15  ;;  %v749_v51 = vrot.slane %v5261_v55, %v5136_v7 }
  0xe2   :  { %v589_v61 = vsel %vm549_vm8, %v588_v59, %v584_v46 }
  0xe3   :  { %v550_v62 = vsel %vm549_vm8, %v548_v60, %v543_v47  ;;  %v329_v63 = vpop.xlane.xlu1 %328  ;;  %v686_v47 = vsel %vm521_vm4, %v685_v42, %v5241_v35  ;;  %v754_v55 = vsel %vm507_vm1, %v753_v9, %v749_v51  ;;  %v4377_v9 = vld [vmem:[%s5745_s3 + $0xd4] ss:$48 sps:$4 sm:$0xff]   ;;  %v4372_v51 = vld [vmem:[%s5745_s3 + $0xc0] ss:$48 sps:$4 sm:$0xff]  }
  0xe4   :  { %v825_v1 = vsel %vm824_vm9, %v589_v61, %v550_v62  ;;  %v308_v0 = vpop.xlane.xlu0 %307  ;;  %v656_v26 = vrot.slane %v329_v63, %v5216_v11 }
  0xe5   :  { %v622_v12 = vrot.slane %v308_v0, %v5247_v4 }
  0xe6   :  { %v657_v31 = vsel %vm535_vm6, %v656_v26, %v652_v27 }
  0xe7   :  { %v371_v3 = vpop.xlane.xlu1 %370  ;;  %v623_v18 = vsel %vm542_vm7, %v622_v12, %v618_v16 }
  0xe8   :  { %v350_v5 = vpop.xlane.xlu0 %349  ;;  %v724_v60 = vrot.slane %v371_v3, %v5172_v34 }
  0xe9   :  { %v690_v43 = vrot.slane %v350_v5, %v5189_v48  ;;  %v720_v5 = vsel %vm514_vm2, %v719_v58, %v5250_v41 }
  0xea   :  { %v725_v12 = vsel %vm521_vm4, %v724_v60, %v720_v5  ;;  %v4374_v5 = vld [vmem:[%s5745_s3 + $0xc4] ss:$48 sps:$4 sm:$0xff]  }
  0xeb   :  { %v5270_v6 = vpop.xlane.xlu1 %409  ;;  %v691_v49 = vsel %vm528_vm5, %v690_v43, %v686_v47 }
  0xec   :  { %v5272_v8 = vpop.xlane.xlu0 %391 }
  0xef   :  { %v311_v13 = vpop.xlane.xlu1 %310 }
  0xf0   :  { %v5276_v14 = vpop.xlane.xlu0 %412  ;;  %v627_v17 = vrot.slane %v311_v13, %v5264_v56  ;;  %v758_v13 = vrot.slane %v5272_v8, %v5147_v15 }
  0xf2   :  { %v628_v19 = vsel %vm549_vm8, %v627_v17, %v623_v18  ;;  %v759_v26 = vsel %vm514_vm2, %v758_v13, %v754_v55  ;;  %v4383_v13 = vld [vmem:[%s5745_s3 + $0x74] ss:$48 sps:$4 sm:$0xff]   ;;  %v4387_v55 = vld [vmem:[%s5745_s3 + $0x10] ss:$48 sps:$4 sm:$0xff]  }
  0xf3   :  { %v827_v20 = vsel %vm826_vm10, %v628_v19, %v825_v1  ;;  %v353_v21 = vpop.xlane.xlu1 %352 }
  0xf4   :  { %v332_v22 = vpop.xlane.xlu0 %331  ;;  %v695_v45 = vrot.slane %v353_v21, %v5216_v11 }
  0xf5   :  { %v661_v28 = vrot.slane %v332_v22, %v5247_v4  ;;  %v788_v22 = vrot.slane %v5270_v6, %v5136_v7 }
  0xf6   :  { %v696_v57 = vsel %vm535_vm6, %v695_v45, %v691_v49  ;;  %v47_v45 = vld [vmem:[#allocation2] sm:$0xff] }
  0xf7   :  { %v5283_v24 = vpop.xlane.xlu1 %394  ;;  %v662_v33 = vsel %vm542_vm7, %v661_v28, %v657_v31 }
  0xf8   :  { %v374_v25 = vpop.xlane.xlu0 %373  ;;  %v763_v41 = vrot.slane %v5283_v24, %v5172_v34 }
  0xf9   :  { %v729_v35 = vrot.slane %v374_v25, %v5189_v48 }
  0xfa   :  { %v764_v31 = vsel %vm521_vm4, %v763_v41, %v759_v26  ;;  %v4386_v41 = vld [vmem:[%s5745_s3 + $0x4] ss:$48 sps:$4 sm:$0xff]  }
  0xfb   :  { %v335_v29 = vpop.xlane.xlu1 %334  ;;  %v730_v16 = vsel %vm528_vm5, %v729_v35, %v725_v12  ;;  %v4380_v12 = vld [vmem:[%s5745_s3 + $0x64] ss:$48 sps:$4 sm:$0xff]  }
  0xfc   :  { %v5288_v30 = vpop.xlane.xlu0 %415  ;;  %v666_v32 = vrot.slane %v335_v29, %v5264_v56 }
  0xfd   :  { %v797_v23 = vrot.slane %v5288_v30, %v5147_v15 }
  0xfe   :  { %v667_v37 = vsel %vm549_vm8, %v666_v32, %v662_v33 }
  0xff   :  { %v829_v38 = vsel %vm828_vm11, %v667_v37, %v827_v20  ;;  %v377_v39 = vpop.xlane.xlu1 %376  ;;  %v792_v20 = vrot.slane %v5276_v14, %v5139_v10 }
 0x100   :  { %v356_v40 = vpop.xlane.xlu0 %355  ;;  %v734_v0 = vrot.slane %v377_v39, %v5216_v11 }
 0x101   :  { %v700_v46 = vrot.slane %v356_v40, %v5247_v4  ;;  %v793_v15 = vsel %vm507_vm1, %v792_v20, %v788_v22  ;;  %v4392_v20 = vld [vmem:[%s5745_s3 + $0x12c] ss:$48 sps:$4 sm:$0xff]  }
 0x102   :  { %v735_v19 = vsel %vm535_vm6, %v734_v0, %v730_v16  ;;  %v798_v33 = vsel %vm514_vm2, %v797_v23, %v793_v15  ;;  %v4369_v0 = vld [vmem:[%s5745_s3 + $0x130] ss:$48 sps:$4 sm:$0xff]   ;;  %v4885_v16 = vmov 0   ;;  %v4396_v15 = vld [vmem:[%s5745_s3 + $0xc8] ss:$48 sps:$4 sm:$0xff]  }
 0x103   :  { %v419_v36 = vpop.xlane.xlu1 %418  ;;  %v701_v59 = vsel %vm542_vm7, %v700_v46, %v696_v57 }
 0x104   :  { %v398_v44 = vpop.xlane.xlu0 %397  ;;  %v802_v28 = vrot.slane %v419_v36, %v5172_v34 }
 0x105   :  { %v768_v21 = vrot.slane %v398_v44, %v5189_v48 }
 0x106   :  { %v803_v37 = vsel %vm521_vm4, %v802_v28, %v798_v33  ;;  %v4407_v33 = vld [vmem:[%s5745_s3 + $0x84] ss:$48 sps:$4 sm:$0xff]  }
 0x107   :  { %v380_v50 = vpop.xlane.xlu1 %379  ;;  %v769_v30 = vsel %vm528_vm5, %v768_v21, %v764_v31  ;;  %v4395_v21 = vld [vmem:[%s5745_s3 + $0x144] ss:$48 sps:$4 sm:$0xff]  }
 0x108   :  { %v359_v53 = vpop.xlane.xlu0 %358  ;;  %v739_v3 = vrot.slane %v380_v50, %v5247_v4 }
 0x109   :  { %v705_v52 = vrot.slane %v359_v53, %v5264_v56 }
 0x10a   :  { %v740_v8 = vsel %vm542_vm7, %v739_v3, %v735_v19  ;;  %v4375_v3 = vld [vmem:[%s5745_s3 + $0xd0] ss:$48 sps:$4 sm:$0xff]   ;;  %v4389_v19 = vld [vmem:[%s5745_s3 + $0x14] ss:$48 sps:$4 sm:$0xff]  }
 0x10b   :  { %v706_v61 = vsel %vm549_vm8, %v705_v52, %v701_v59  ;;  %v422_v1 = vpop.xlane.xlu1 %421 }
 0x10c   :  { %v831_v62 = vsel %vm830_vm12, %v706_v61, %v829_v38  ;;  %v401_v63 = vpop.xlane.xlu0 %400  ;;  %v807_v7 = vrot.slane %v422_v1, %v5189_v48  ;;  %v4371_v1 = vld [vmem:[%s5745_s3 + $0x134] ss:$48 sps:$4 sm:$0xff]  }
 0x10d   :  { %v773_v24 = vrot.slane %v401_v63, %v5216_v11  ;;  %v4366_v63 = vld [vmem:[%s5745_s3 + $0x120] ss:$48 sps:$4 sm:$0xff]  }
 0x10e   :  { %v808_v48 = vsel %vm528_vm5, %v807_v7, %v803_v37  ;;  %v4398_v7 = vld [vmem:[%s5745_s3 + $0xcc] ss:$48 sps:$4 sm:$0xff]   ;;  %v4405_v37 = vld [vmem:[%s5745_s3 + $0x80] ss:$48 sps:$4 sm:$0xff]  }
 0x10f   :  { %v404_v17 = vpop.xlane.xlu1 %403  ;;  %v774_v34 = vsel %vm535_vm6, %v773_v24, %v769_v30  ;;  %v4399_v30 = vld [vmem:[%s5745_s3 + $0xe0] ss:$48 sps:$4 sm:$0xff]  }
 0x110   :  { %v383_v18 = vpop.xlane.xlu0 %382  ;;  %v778_v10 = vrot.slane %v404_v17, %v5247_v4  ;;  %v4378_v17 = vld [vmem:[%s5745_s3 + $0x60] ss:$48 sps:$4 sm:$0xff]  }
 0x111   :  { %v744_v54 = vrot.slane %v383_v18, %v5264_v56  ;;  %v4381_v18 = vld [vmem:[%s5745_s3 + $0x70] ss:$48 sps:$4 sm:$0xff]  }
 0x112   :  { %v779_v38 = vsel %vm542_vm7, %v778_v10, %v774_v34  ;;  %v4402_v34 = vld [vmem:[%s5745_s3 + $0x68] ss:$48 sps:$4 sm:$0xff]  }
 0x113   :  { %v745_v25 = vsel %vm549_vm8, %v744_v54, %v740_v8  ;;  %v407_v27 = vpop.xlane.xlu1 %406  ;;  %v4384_v54 = vld [vmem:[%s5745_s3] ss:$48 sps:$4 sm:$0xff]  }
 0x114   :  { %v833_v14 = vsel %vm832_vm13, %v745_v25, %v831_v62  ;;  %v425_v29 = vpop.xlane.xlu0 %424  ;;  %v783_v6 = vrot.slane %v407_v27, %v5264_v56  ;;  %v4368_v62 = vld [vmem:[%s5745_s3 + $0x124] ss:$48 sps:$4 sm:$0xff]   ;;  %v4390_v27 = vld [vmem:[%s5745_s3 + $0x128] ss:$48 sps:$4 sm:$0xff]  }
 0x115   :  { %v812_v32 = vrot.slane %v425_v29, %v5216_v11  ;;  %1400 = vmatprep.subr.bf16.mxu0 %v4368_v62  ;;  %v4393_v29 = vld [vmem:[%s5745_s3 + $0x140] ss:$48 sps:$4 sm:$0xff]   ;;  %v4453_v62 = vld [vmem:[#allocation3 + $0x60] ss:$16 sps:$4 sm:$0xff]  }
 0x116   :  { %v784_v42 = vsel %vm549_vm8, %v783_v6, %v779_v38  ;;  %v4401_v6 = vld [vmem:[%s5745_s3 + $0xe4] ss:$48 sps:$4 sm:$0xff]   ;;  %v4410_v38 = vld [vmem:[%s5745_s3 + $0xc] ss:$48 sps:$4 sm:$0xff]  }
 0x117   :  { %v431_v40 = vpop.xlane.xlu1 %430  ;;  %v813_v11 = vsel %vm535_vm6, %v812_v32, %v808_v48  ;;  %v835_v46 = vsel %vm834_vm14, %v784_v42, %v833_v14  ;;  %v4404_v32 = vld [vmem:[%s5745_s3 + $0x6c] ss:$48 sps:$4 sm:$0xff]   ;;  %v4411_v48 = vld [vmem:[%s5745_s3 + $0x20] ss:$48 sps:$4 sm:$0xff]  }
 0x118   :  { %v428_v39 = vpop.xlane.xlu0 %427  ;;  %v822_v36 = vrot.slane %v431_v40, %v5264_v56  ;;  %v4408_v40 = vld [vmem:[%s5745_s3 + $0x8] ss:$48 sps:$4 sm:$0xff]   ;;  %v4416_v42 = vld [vmem:[%s5745_s3 + $0x13c] ss:$48 sps:$4 sm:$0xff]  }
 0x119   :  { %v817_v43 = vrot.slane %v428_v39, %v5247_v4  ;;  %v4365_v4 = vld [vmem:[%s5744_s2] sm:$0xff]  }
 0x11a   :  { %4343 = vmatpush3.bf16.msra.mxu1 %v4365_v4  ;;  %v4413_v39 = vld [vmem:[%s5745_s3 + $0x24] ss:$48 sps:$4 sm:$0xff]   ;;  %v4449_v4 = vld [vmem:[#allocation3 + $0x84] ss:$16 sps:$4 sm:$0xff]  }
 0x11b   :  { %v818_v44 = vsel %vm542_vm7, %v817_v43, %v813_v11  ;;  %1482 = vmatprep.subr.bf16.mxu1 %v4371_v1  ;;  %v4440_v43 = vld [vmem:[#allocation3 + $0xe4] ss:$16 sps:$4 sm:$0xff]  }
 0x11c   :  { %v823_v47 = vsel %vm549_vm8, %v822_v36, %v818_v44  ;;  %v4414_v36 = vld [vmem:[%s5745_s3 + $0x138] ss:$48 sps:$4 sm:$0xff]   ;;  %v4419_v11 = vld [vmem:[%s5745_s3 + $0xdc] ss:$48 sps:$4 sm:$0xff]  }
 0x11d   :  { %v837_v49 = vsel %vm836_vm15, %v823_v47, %v835_v46  ;;  %v4438_v44 = vld [vmem:[#allocation3 + $0xe0] ss:$16 sps:$4 sm:$0xff]   ;;  %v4422_v47 = vld [vmem:[%s5745_s3 + $0x7c] ss:$48 sps:$4 sm:$0xff]  }
 0x11e   :  { %v839_v50 = vadd.f32 %v837_v49, %v47_v45  ;;  %v4443_v45 = vld [vmem:[#allocation3 + $0xc4] ss:$16 sps:$4 sm:$0xff]   ;;  %v4417_v46 = vld [vmem:[%s5745_s3 + $0xd8] ss:$48 sps:$4 sm:$0xff]  }
 0x11f   :  { %v4441_v49 = vld [vmem:[#allocation3 + $0xc0] ss:$16 sps:$4 sm:$0xff]   ;;  %v4461_v1 = vld [vmem:[#allocation3 + $0x44] ss:$16 sps:$4 sm:$0xff]  }
 0x120   :  { %841 = vst.msk [vmem:[#allocation2] sm:$0xff] %vm45_vm0, %v839_v50  ;;  %v4446_v50 = vld [vmem:[#allocation3 + $0xa4] ss:$16 sps:$4 sm:$0xff]  }
 0x127   :  { %v845_v53 = vld [vmem:[#allocation2] sm:$0xff] }
 0x128   :  { %v846_v57 = vmul.f32 0.00390625, %v845_v53  ;;  %v4420_v53 = vld [vmem:[%s5745_s3 + $0x78] ss:$48 sps:$4 sm:$0xff]  }
 0x12a   :  { %v847_v52 = vpack.c.bf16 %v846_v57, %v846_v57 }
 0x12c   :  { %4325 = vmatmul.mubr.msk.bf16.vlgmr.msra.gmra.mxu0 %vm45_vm0, %v847_v52  ;;  %v4444_v52 = vld [vmem:[#allocation3 + $0xa0] ss:$16 sps:$4 sm:$0xff]  }
 0x12d   :  { %1401 = vmatpush1.bf16.msra.mxu0 %v4366_v63  ;;  %1424 = vmatprep.mubr.bf16.mxu0 %v4885_v16  ;;  %v4429_v63 = vld [vmem:[%s5745_s3 + $0xe8] ss:$48 sps:$4 sm:$0xff]  }
 0x12e   :  { %1402 = vmatprep.subr.bf16.mxu0 %v4374_v5  ;;  %v4459_v5 = vld [vmem:[#allocation3 + $0x40] ss:$16 sps:$4 sm:$0xff]  }
 0x131   :  { %1403 = vmatpush1.bf16.msra.mxu0 %v4372_v51  ;;  %v4432_v51 = vld [vmem:[%s5745_s3 + $0x88] ss:$48 sps:$4 sm:$0xff]  }
 0x132   :  { %1404 = vmatprep.subr.bf16.mxu0 %v4380_v12  ;;  %v4465_v12 = vld [vmem:[#allocation3 + $0x20] ss:$16 sps:$4 sm:$0xff]  }
 0x135   :  { %1405 = vmatpush1.bf16.msra.mxu0 %v4378_v17  ;;  %v4452_v17 = vld [vmem:[#allocation3 + $0x2e4] ss:$16 sps:$4 sm:$0xff]  }
 0x136   :  { %1406 = vmatprep.subr.bf16.mxu0 %v4386_v41  ;;  %v4479_v41 = vld [vmem:[#allocation3 + $0x1e4] ss:$16 sps:$4 sm:$0xff]  }
 0x139   :  { %1407 = vmatpush1.bf16.msra.mxu0 %v4384_v54  ;;  %v4458_v54 = vld [vmem:[#allocation3 + $0x2c4] ss:$16 sps:$4 sm:$0xff]  }
 0x13a   :  { %1441 = vmatprep.subr.bf16.mxu0 %v4392_v20  ;;  %v4485_v20 = vld [vmem:[#allocation3 + $0x1c4] ss:$16 sps:$4 sm:$0xff]  }
 0x1ec   :  { %v917_v56 = vpop.f32.mrf.mxu0 }
 0x1ed   :  { %v923_v58 = vmax.f32 %v917_v56, 0.0  ;;  %v4423_v56 = vld [vmem:[%s5745_s3 + $0x18] ss:$48 sps:$4 sm:$0xff]  }
 0x1ee   :  { %v4326_v59 = vpop.f32.mrf.mxu0 }
 0x1ef   :  { %v924_v60 = vpack.c.bf16 %v923_v58, %v923_v58  ;;  %v4428_v58 = vld [vmem:[%s5745_s3 + $0x14c] ss:$48 sps:$4 sm:$0xff]   ;;  %v4447_v59 = vld [vmem:[#allocation3 + $0x80] ss:$16 sps:$4 sm:$0xff]  }
 0x1f0   :  { %v920_v61 = vpop.f32.mrf.mxu0 }
 0x1f1   :  { %4345 = vmatmul.mubr.bf16.vlgmr.msra.gmra.mxu1 %v924_v60  ;;  %v4455_v60 = vld [vmem:[#allocation3 + $0x64] ss:$16 sps:$4 sm:$0xff]   ;;  %v4426_v61 = vld [vmem:[%s5745_s3 + $0x148] ss:$48 sps:$4 sm:$0xff]  }
 0x1f2   :  { %v4327_v35 = vpop.f32.mrf.mxu0  ;;  %1483 = vmatpush1.bf16.msra.mxu1 %v4369_v0  ;;  %1506 = vmatprep.mubr.bf16.mxu1 %v4885_v16  ;;  %v4434_v0 = vld [vmem:[%s5745_s3 + $0x8c] ss:$48 sps:$4 sm:$0xff]  }
 0x1f3   :  { %1484 = vmatprep.subr.bf16.mxu1 %v4377_v9  ;;  %v4431_v35 = vld [vmem:[%s5745_s3 + $0xec] ss:$48 sps:$4 sm:$0xff]  }
 0x1f4   :  { %v4467_v9 = vld [vmem:[#allocation3 + $0x24] ss:$16 sps:$4 sm:$0xff]  }
 0x1f6   :  { %1485 = vmatpush1.bf16.msra.mxu1 %v4375_v3  ;;  %v4437_v3 = vld [vmem:[%s5745_s3 + $0x2c] ss:$48 sps:$4 sm:$0xff]  }
 0x1f7   :  { %1486 = vmatprep.subr.bf16.mxu1 %v4383_v13  ;;  %v4473_v13 = vld [vmem:[#allocation3 + $0x4] ss:$16 sps:$4 sm:$0xff]  }
 0x1fa   :  { %1487 = vmatpush1.bf16.msra.mxu1 %v4381_v18  ;;  %v4471_v18 = vld [vmem:[#allocation3] ss:$16 sps:$4 sm:$0xff]  }
 0x1fb   :  { %1488 = vmatprep.subr.bf16.mxu1 %v4389_v19  ;;  %v4450_v19 = vld [vmem:[#allocation3 + $0x2e0] ss:$16 sps:$4 sm:$0xff]  }
 0x1fe   :  { %1489 = vmatpush1.bf16.msra.mxu1 %v4387_v55  ;;  %v4477_v55 = vld [vmem:[#allocation3 + $0x1e0] ss:$16 sps:$4 sm:$0xff]  }
 0x1ff   :  { %1564 = vmatprep.subr.bf16.mxu1 %v4395_v21  ;;  %v4456_v21 = vld [vmem:[#allocation3 + $0x2c0] ss:$16 sps:$4 sm:$0xff]  }
 0x2b1   :  { %v1023_v8 = vpop.f32.mrf.mxu1 }
 0x2b2   :  { %v3914_v22 = vmul.f32 -1.442695, %v1023_v8  ;;  %v4464_v8 = vld [vmem:[#allocation3 + $0x2a4] ss:$16 sps:$4 sm:$0xff]  }
 0x2b3   :  { %v4346_v23 = vpop.f32.mrf.mxu1 }
 0x2b4   :  { %4854 = vpow2.f32 %v3914_v22  ;;  %v4483_v22 = vld [vmem:[#allocation3 + $0x1c0] ss:$16 sps:$4 sm:$0xff]   ;;  %v4491_v23 = vld [vmem:[#allocation3 + $0x1a4] ss:$16 sps:$4 sm:$0xff]  }
 0x2b5   :  { %v1026_v24 = vpop.f32.mrf.mxu1 }
 0x2b6   :  { %v4462_v24 = vld [vmem:[#allocation3 + $0x2a0] ss:$16 sps:$4 sm:$0xff]  }
 0x2b7   :  { %v4347_v25 = vpop.f32.mrf.mxu1 }
 0x2b8   :  { %v4470_v25 = vld [vmem:[#allocation3 + $0x284] ss:$16 sps:$4 sm:$0xff]  }
 0x2c1   :  { %v4855_v26 = vpop.eup %4854 }
 0x2c2   :  { %v1032_v28 = vadd.f32 1.0, %v4855_v26  ;;  %v4489_v26 = vld [vmem:[#allocation3 + $0x1a0] ss:$16 sps:$4 sm:$0xff]  }
 0x2c4   :  { %4856 = vrcp.f32 %v1032_v28  ;;  %v4497_v28 = vld [vmem:[#allocation3 + $0x184] ss:$16 sps:$4 sm:$0xff]  }
 0x2d1   :  { %v4857_v10 = vpop.eup %4856 }
 0x2d2   :  { %v1035_v14 = vmul.f32 %v4857_v10, %v846_v57  ;;  %v4425_v57 = vld [vmem:[%s5745_s3 + $0x1c] ss:$48 sps:$4 sm:$0xff]   ;;  %v4468_v10 = vld [vmem:[#allocation3 + $0x280] ss:$16 sps:$4 sm:$0xff]  }
 0x2d4   :  { %v5423_v31 = vpack.c.bf16 %v1035_v14, %v1035_v14  ;;  %v4476_v14 = vld [vmem:[#allocation3 + $0x264] ss:$16 sps:$4 sm:$0xff]  }
 0x2d6   :  { %3963 = vmatmul.mubr.msk.bf16.vlgmr.msra.gmra.mxu0 %vm45_vm0, %v5423_v31  ;;  %3965 = vmatmul.mubr.msk.bf16.vlgmr.msra.gmra.mxu1 %vm45_vm0, %v5423_v31 }
 0x2d7   :  { %1442 = vmatpush1.bf16.msra.mxu0 %v4390_v27  ;;  %1565 = vmatpush1.bf16.msra.mxu1 %v4393_v29  ;;  %v4495_v27 = vld [vmem:[#allocation3 + $0x180] ss:$16 sps:$4 sm:$0xff]   ;;  %v4503_v29 = vld [vmem:[#allocation3 + $0x164] ss:$16 sps:$4 sm:$0xff]  }
 0x2d8   :  { %1443 = vmatprep.subr.bf16.mxu0 %v4398_v7  ;;  %1566 = vmatprep.subr.bf16.mxu1 %v4401_v6  ;;  %v4482_v7 = vld [vmem:[#allocation3 + $0x244] ss:$16 sps:$4 sm:$0xff]   ;;  %v4501_v6 = vld [vmem:[#allocation3 + $0x160] ss:$16 sps:$4 sm:$0xff]  }
 0x2d9   :  { %1465 = vmatprep.mubr.bf16.mxu0 %v4885_v16  ;;  %1588 = vmatprep.mubr.bf16.mxu1 %v4885_v16 }
 0x2db   :  { %1444 = vmatpush1.bf16.msra.mxu0 %v4396_v15  ;;  %1567 = vmatpush1.bf16.msra.mxu1 %v4399_v30  ;;  %v4509_v15 = vld [vmem:[#allocation3 + $0x144] ss:$16 sps:$4 sm:$0xff]   ;;  %v4480_v30 = vld [vmem:[#allocation3 + $0x240] ss:$16 sps:$4 sm:$0xff]  }
 0x2dc   :  { %1445 = vmatprep.subr.bf16.mxu0 %v4404_v32  ;;  %1568 = vmatprep.subr.bf16.mxu1 %v4407_v33  ;;  %v4488_v32 = vld [vmem:[#allocation3 + $0x224] ss:$16 sps:$4 sm:$0xff]   ;;  %v4507_v33 = vld [vmem:[#allocation3 + $0x140] ss:$16 sps:$4 sm:$0xff]  }
 0x2df   :  { %1446 = vmatpush1.bf16.msra.mxu0 %v4402_v34  ;;  %1569 = vmatpush1.bf16.msra.mxu1 %v4405_v37  ;;  %v4515_v34 = vld [vmem:[#allocation3 + $0x124] ss:$16 sps:$4 sm:$0xff]   ;;  %v4486_v37 = vld [vmem:[#allocation3 + $0x220] ss:$16 sps:$4 sm:$0xff]  }
 0x2e0   :  { %1447 = vmatprep.subr.bf16.mxu0 %v4410_v38  ;;  %1570 = vmatprep.subr.bf16.mxu1 %v4413_v39  ;;  %v4494_v38 = vld [vmem:[#allocation3 + $0x204] ss:$16 sps:$4 sm:$0xff]   ;;  %v4513_v39 = vld [vmem:[#allocation3 + $0x120] ss:$16 sps:$4 sm:$0xff]  }
 0x2e3   :  { %1448 = vmatpush1.bf16.msra.mxu0 %v4408_v40  ;;  %1571 = vmatpush1.bf16.msra.mxu1 %v4411_v48  ;;  %v4521_v40 = vld [vmem:[#allocation3 + $0x104] ss:$16 sps:$4 sm:$0xff]   ;;  %v4492_v48 = vld [vmem:[#allocation3 + $0x200] ss:$16 sps:$4 sm:$0xff]  }
 0x2e4   :  { %1523 = vmatprep.subr.bf16.mxu0 %v4416_v42  ;;  %3212 = vmatprep.subr.bf16.mxu1 %v4440_v43  ;;  %v4500_v42 = vld [vmem:[#allocation3 + $0x3e4] ss:$16 sps:$4 sm:$0xff]   ;;  %v4519_v43 = vld [vmem:[#allocation3 + $0x100] ss:$16 sps:$4 sm:$0xff]  }
 0x2e6   :  { %3964 = vmatmul.mubr.msk.bf16.vlgmr.msra.gmra.mxu0 %vm45_vm0, %v5423_v31  ;;  %3967 = vmatmul.mubr.msk.bf16.vlgmr.msra.gmra.mxu1 %vm45_vm0, %v5423_v31 }
 0x2e7   :  { %1524 = vmatpush1.bf16.msra.mxu0 %v4414_v36  ;;  %1547 = vmatprep.mubr.bf16.mxu0 %v4885_v16  ;;  %v4527_v36 = vld [vmem:[#allocation3 + $0x4e4] ss:$16 sps:$4 sm:$0xff]  }
 0x2e8   :  { %1525 = vmatprep.subr.bf16.mxu0 %v4419_v11  ;;  %3213 = vmatpush1.bf16.msra.mxu1 %v4438_v44  ;;  %v4498_v11 = vld [vmem:[#allocation3 + $0x3e0] ss:$16 sps:$4 sm:$0xff]   ;;  %v4506_v44 = vld [vmem:[#allocation3 + $0x3c4] ss:$16 sps:$4 sm:$0xff]  }
 0x2e9   :  { %3214 = vmatprep.subr.bf16.mxu1 %v4443_v45  ;;  %v4504_v45 = vld [vmem:[#allocation3 + $0x3c0] ss:$16 sps:$4 sm:$0xff]  }
 0x2eb   :  { %1526 = vmatpush1.bf16.msra.mxu0 %v4417_v46  ;;  %v4512_v46 = vld [vmem:[#allocation3 + $0x3a4] ss:$16 sps:$4 sm:$0xff]  }
 0x2ec   :  { %1527 = vmatprep.subr.bf16.mxu0 %v4422_v47  ;;  %3215 = vmatpush1.bf16.msra.mxu1 %v4441_v49  ;;  %v4510_v47 = vld [vmem:[#allocation3 + $0x3a0] ss:$16 sps:$4 sm:$0xff]   ;;  %v4518_v49 = vld [vmem:[#allocation3 + $0x384] ss:$16 sps:$4 sm:$0xff]  }
 0x2ed   :  { %3216 = vmatprep.subr.bf16.mxu1 %v4446_v50  ;;  %v4516_v50 = vld [vmem:[#allocation3 + $0x380] ss:$16 sps:$4 sm:$0xff]  }
 0x2ef   :  { %1528 = vmatpush1.bf16.msra.mxu0 %v4420_v53  ;;  %v4524_v53 = vld [vmem:[#allocation3 + $0x364] ss:$16 sps:$4 sm:$0xff]  }
 0x2f0   :  { %1529 = vmatprep.subr.bf16.mxu0 %v4425_v57  ;;  %3217 = vmatpush1.bf16.msra.mxu1 %v4444_v52  ;;  %v4522_v57 = vld [vmem:[#allocation3 + $0x360] ss:$16 sps:$4 sm:$0xff]   ;;  %v4530_v52 = vld [vmem:[#allocation3 + $0x344] ss:$16 sps:$4 sm:$0xff]  }
 0x2f1   :  { %3218 = vmatprep.subr.bf16.mxu1 %v4449_v4  ;;  %v4528_v4 = vld [vmem:[#allocation3 + $0x340] ss:$16 sps:$4 sm:$0xff]  }
 0x2f3   :  { %1530 = vmatpush1.bf16.msra.mxu0 %v4423_v56  ;;  %v4536_v56 = vld [vmem:[#allocation3 + $0x324] ss:$16 sps:$4 sm:$0xff]  }
 0x2f4   :  { %1605 = vmatprep.subr.bf16.mxu0 %v4428_v58  ;;  %3219 = vmatpush1.bf16.msra.mxu1 %v4447_v59  ;;  %v4534_v58 = vld [vmem:[#allocation3 + $0x320] ss:$16 sps:$4 sm:$0xff]   ;;  %v4542_v59 = vld [vmem:[#allocation3 + $0x304] ss:$16 sps:$4 sm:$0xff]  }
 0x2f5   :  { %3220 = vmatprep.subr.bf16.mxu1 %v4455_v60  ;;  %v4540_v60 = vld [vmem:[#allocation3 + $0x300] ss:$16 sps:$4 sm:$0xff]  }
 0x2f6   :  { %3966 = vmatmul.mubr.msk.bf16.vlgmr.msra.gmra.mxu0 %vm45_vm0, %v5423_v31 }
 0x2f7   :  { %1606 = vmatpush1.bf16.msra.mxu0 %v4426_v61  ;;  %1629 = vmatprep.mubr.bf16.mxu0 %v4885_v16  ;;  %v4435_v16 = vld [vmem:[%s5745_s3 + $0x28] ss:$48 sps:$4 sm:$0xff]   ;;  %v4548_v61 = vld [vmem:[#allocation3 + $0x6e4] ss:$16 sps:$4 sm:$0xff]  }
 0x2f8   :  { %1607 = vmatprep.subr.bf16.mxu0 %v4431_v35  ;;  %3221 = vmatpush1.bf16.msra.mxu1 %v4453_v62  ;;  %v5526_v35 = vsub.s32 0, %v5123_v2  ;;  %v5531_v62 = vld [vmem:[%s5748_s6] sm:$0xff] }
 0x2f9   :  { %3222 = vmatprep.subr.bf16.mxu1 %v4461_v1  ;;  %v5534_v1 = vsub.s32 1, %v5123_v2 }
 0x2fb   :  { %1608 = vmatpush1.bf16.msra.mxu0 %v4429_v63  ;;  %v1111_v63 = vsub.s32 5, %v5123_v2 }
 0x2fc   :  { %1609 = vmatprep.subr.bf16.mxu0 %v4434_v0  ;;  %3223 = vmatpush1.bf16.msra.mxu1 %v4459_v5  ;;  %v1092_v0 = vrot.slane %v5531_v62, %v5526_v35  ;;  %v1096_v5 = vrot.slane %v5531_v62, %v5534_v1 }
 0x2fd   :  { %3224 = vmatprep.subr.bf16.mxu1 %v4467_v9  ;;  %v1112_v9 = vrot.slane %v5531_v62, %v1111_v63  ;;  %v4566_v63 = vld [vmem:[#allocation3 + $0x684] ss:$16 sps:$4 sm:$0xff]  }
 0x2ff   :  { %1610 = vmatpush1.bf16.msra.mxu0 %v4432_v51 }
 0x300   :  { %1611 = vmatprep.subr.bf16.mxu0 %v4437_v3  ;;  %3225 = vmatpush1.bf16.msra.mxu1 %v4465_v12 }
 0x301   :  { %3226 = vmatprep.subr.bf16.mxu1 %v4473_v13 }
 0x303   :  { %1612 = vmatpush1.bf16.msra.mxu0 %v4435_v16 }
 0x304   :  { %3253 = vmatprep.subr.bf16.mxu0 %v4452_v17  ;;  %3227 = vmatpush1.bf16.msra.mxu1 %v4471_v18 }
 0x305   :  { %3228 = vmatprep.subr.bf16.mxu1 %v4479_v41 }
 0x306   :  { %3968 = vmatmul.mubr.msk.bf16.vlgmr.msra.gmra.mxu0 %vm45_vm0, %v5423_v31  ;;  %v4474_v31 = vld [vmem:[#allocation3 + $0x260] ss:$16 sps:$4 sm:$0xff]  }
 0x307   :  { %3254 = vmatpush1.bf16.msra.mxu0 %v4450_v19 }
 0x308   :  { %3255 = vmatprep.subr.bf16.mxu0 %v4458_v54  ;;  %3229 = vmatpush2.bf16.msra.mxu1 %v4477_v55 }
 0x309   :  { %3230 = vmatprep.subr.bf16.mxu1 %v4485_v20 }
 0x30b   :  { %3256 = vmatpush1.bf16.msra.mxu0 %v4456_v21 }
 0x30c   :  { %3257 = vmatprep.subr.bf16.mxu0 %v4464_v8  ;;  %3231 = vmatpush2.bf16.msra.mxu1 %v4483_v22 }
 0x30d   :  { %3232 = vmatprep.subr.bf16.mxu1 %v4491_v23  ;;  %v4525_v23 = vld [vmem:[#allocation3 + $0x4e0] ss:$16 sps:$4 sm:$0xff]  }
 0x30f   :  { %3258 = vmatpush1.bf16.msra.mxu0 %v4462_v24 }
 0x310   :  { %3259 = vmatprep.subr.bf16.mxu0 %v4470_v25  ;;  %3233 = vmatpush2.bf16.msra.mxu1 %v4489_v26  ;;  %v4533_v25 = vld [vmem:[#allocation3 + $0x4c4] ss:$16 sps:$4 sm:$0xff]  }
 0x311   :  { %3234 = vmatprep.subr.bf16.mxu1 %v4497_v28  ;;  %v5552_v28 = vsub.s32 2, %v5123_v2 }
 0x313   :  { %3260 = vmatpush1.bf16.msra.mxu0 %v4468_v10  ;;  %v4531_v10 = vld [vmem:[#allocation3 + $0x4c0] ss:$16 sps:$4 sm:$0xff]  }
 0x314   :  { %3261 = vmatprep.subr.bf16.mxu0 %v4476_v14  ;;  %3235 = vmatpush2.bf16.msra.mxu1 %v4495_v27  ;;  %v5557_v14 = vsub.s32 3, %v5123_v2  ;;  %v4539_v27 = vld [vmem:[#allocation3 + $0x4a4] ss:$16 sps:$4 sm:$0xff]  }
 0x315   :  { %3236 = vmatprep.subr.bf16.mxu1 %v4503_v29  ;;  %v1100_v29 = vrot.slane %v5531_v62, %v5552_v28 }
 0x317   :  { %3262 = vmatpush1.bf16.msra.mxu0 %v4474_v31  ;;  %v1104_v31 = vrot.slane %v5531_v62, %v5557_v14 }
 0x318   :  { %3263 = vmatprep.subr.bf16.mxu0 %v4482_v7  ;;  %3237 = vmatpush2.bf16.msra.mxu1 %v4501_v6  ;;  %v4537_v7 = vld [vmem:[#allocation3 + $0x4a0] ss:$16 sps:$4 sm:$0xff]  }
 0x319   :  { %3238 = vmatprep.subr.bf16.mxu1 %v4509_v15 }
 0x31b   :  { %3264 = vmatpush1.bf16.msra.mxu0 %v4480_v30  ;;  %v4545_v30 = vld [vmem:[#allocation3 + $0x484] ss:$16 sps:$4 sm:$0xff]  }
 0x31c   :  { %3265 = vmatprep.subr.bf16.mxu0 %v4488_v32  ;;  %3239 = vmatpush2.bf16.msra.mxu1 %v4507_v33 }
 0x31d   :  { %3240 = vmatprep.subr.bf16.mxu1 %v4515_v34 }
 0x31f   :  { %3266 = vmatpush1.bf16.msra.mxu0 %v4486_v37 }
 0x320   :  { %3267 = vmatprep.subr.bf16.mxu0 %v4494_v38  ;;  %3241 = vmatpush2.bf16.msra.mxu1 %v4513_v39  ;;  %v4543_v38 = vld [vmem:[#allocation3 + $0x480] ss:$16 sps:$4 sm:$0xff]  }
 0x321   :  { %3242 = vmatprep.subr.bf16.mxu1 %v4521_v40 }
 0x323   :  { %3268 = vmatpush1.bf16.msra.mxu0 %v4492_v48 }
 0x324   :  { %3269 = vmatprep.subr.bf16.mxu0 %v4500_v42  ;;  %3243 = vmatpush2.bf16.msra.mxu1 %v4519_v43  ;;  %v4551_v42 = vld [vmem:[#allocation3 + $0x464] ss:$16 sps:$4 sm:$0xff]  }
 0x325   :  { %3294 = vmatprep.subr.bf16.mxu1 %v4527_v36 }
 0x327   :  { %3270 = vmatpush2.bf16.msra.mxu0 %v4498_v11 }
 0x328   :  { %3271 = vmatprep.subr.bf16.mxu0 %v4506_v44 }
 0x32b   :  { %3272 = vmatpush2.bf16.msra.mxu0 %v4504_v45  ;;  %v4546_v45 = vld [vmem:[#allocation3 + $0x6e0] ss:$16 sps:$4 sm:$0xff]  }
 0x32c   :  { %3273 = vmatprep.subr.bf16.mxu0 %v4512_v46  ;;  %v4549_v46 = vld [vmem:[#allocation3 + $0x460] ss:$16 sps:$4 sm:$0xff]  }
 0x32f   :  { %3274 = vmatpush2.bf16.msra.mxu0 %v4510_v47 }
 0x330   :  { %3275 = vmatprep.subr.bf16.mxu0 %v4518_v49  ;;  %v4554_v49 = vld [vmem:[#allocation3 + $0x6c4] ss:$16 sps:$4 sm:$0xff]  }
 0x333   :  { %3276 = vmatpush2.bf16.msra.mxu0 %v4516_v50  ;;  %v4557_v50 = vld [vmem:[#allocation3 + $0x444] ss:$16 sps:$4 sm:$0xff]  }
 0x334   :  { %3277 = vmatprep.subr.bf16.mxu0 %v4524_v53  ;;  %v4552_v53 = vld [vmem:[#allocation3 + $0x6c0] ss:$16 sps:$4 sm:$0xff]  }
 0x337   :  { %3278 = vmatpush2.bf16.msra.mxu0 %v4522_v57  ;;  %v4555_v57 = vld [vmem:[#allocation3 + $0x440] ss:$16 sps:$4 sm:$0xff]  }
 0x338   :  { %3279 = vmatprep.subr.bf16.mxu0 %v4530_v52  ;;  %v1119_v52 = vsub.s32 7, %v5123_v2 }
 0x33b   :  { %3280 = vmatpush2.bf16.msra.mxu0 %v4528_v4  ;;  %v4560_v4 = vld [vmem:[#allocation3 + $0x6a4] ss:$16 sps:$4 sm:$0xff]  }
 0x33c   :  { %3281 = vmatprep.subr.bf16.mxu0 %v4536_v56  ;;  %v4563_v56 = vld [vmem:[#allocation3 + $0x424] ss:$16 sps:$4 sm:$0xff]  }
 0x33f   :  { %3282 = vmatpush2.bf16.msra.mxu0 %v4534_v58  ;;  %v4558_v58 = vld [vmem:[#allocation3 + $0x6a0] ss:$16 sps:$4 sm:$0xff]  }
 0x340   :  { %3283 = vmatprep.subr.bf16.mxu0 %v4542_v59  ;;  %v1120_v59 = vrot.slane %v5531_v62, %v1119_v52  ;;  %v4603_v52 = vld [vmem:[#allocation3 + $0x540] ss:$16 sps:$4 sm:$0xff]  }
 0x343   :  { %3284 = vmatpush2.bf16.msra.mxu0 %v4540_v60  ;;  %v4561_v60 = vld [vmem:[#allocation3 + $0x420] ss:$16 sps:$4 sm:$0xff]  }
 0x344   :  { %3335 = vmatprep.subr.bf16.mxu0 %v4548_v61 }
 0x396   :  { %v1426_v51 = vpop.f32.mrf.mxu0  ;;  %v5542_v3 = vpop.f32.mrf.mxu1 }
 0x397   :  { %v1427_v12 = vadd.f32 %v1426_v51, %v1092_v0  ;;  %v4569_v0 = vld [vmem:[#allocation3 + $0x404] ss:$16 sps:$4 sm:$0xff]   ;;  %v4564_v51 = vld [vmem:[#allocation3 + $0x680] ss:$16 sps:$4 sm:$0xff]  }
 0x398   :  { %v1428_v13 = vpop.f32.mrf.mxu0  ;;  %v1510_v16 = vpop.f32.mrf.mxu1 }
 0x399   :  { %v1429_v17 = vadd.f32 %v1428_v13, %v1096_v5  ;;  %v1511_v18 = vadd.f32 %v1510_v16, %v1112_v9  ;;  %v1638_v41 = vmax.f32 %v1427_v12, 0.0  ;;  %v4567_v12 = vld [vmem:[#allocation3 + $0x400] ss:$16 sps:$4 sm:$0xff]   ;;  %v4572_v16 = vld [vmem:[#allocation3 + $0x664] ss:$16 sps:$4 sm:$0xff]  }
 0x39a   :  { %v1430_v19 = vpop.f32.mrf.mxu0  ;;  %v1512_v54 = vpop.f32.mrf.mxu1 }
 0x39b   :  { %v1639_v55 = vmax.f32 %v1429_v17, 0.0  ;;  %v1643_v20 = vmax.f32 %v1511_v18, 0.0  ;;  %v5546_v24 = vpack.c.bf16 %v1638_v41, %v1638_v41  ;;  %v4575_v17 = vld [vmem:[#allocation3 + $0x5e4] ss:$16 sps:$4 sm:$0xff]   ;;  %v4570_v54 = vld [vmem:[#allocation3 + $0x660] ss:$16 sps:$4 sm:$0xff]  }
 0x39c   :  { %v1431_v21 = vpop.f32.mrf.mxu0  ;;  %v1513_v8 = vpop.f32.mrf.mxu1 }
 0x39d   :  { %v5544_v22 = vpack.c.bf16 %v1639_v55, %v1639_v55  ;;  %v5548_v26 = vpack.c.bf16 %v1643_v20, %v1643_v20  ;;  %v4573_v55 = vld [vmem:[#allocation3 + $0x5e0] ss:$16 sps:$4 sm:$0xff]   ;;  %v4578_v20 = vld [vmem:[#allocation3 + $0x644] ss:$16 sps:$4 sm:$0xff]  }
 0x39e   :  { %v4581_v21 = vld [vmem:[#allocation3 + $0x5c4] ss:$16 sps:$4 sm:$0xff]   ;;  %v4576_v8 = vld [vmem:[#allocation3 + $0x640] ss:$16 sps:$4 sm:$0xff]  }
 0x39f   :  { %3244 = vmatprep.mubr.bf16.mxu1 %v5544_v22 }
 0x3a0   :  { %3245 = vmatmul.mubr.bf16.vlgmr.msra.gmra.mxu1 %v5546_v24 }
 0x3a1   :  { %3295 = vmatpush1.bf16.msra.mxu1 %v4525_v23  ;;  %3326 = vmatprep.mubr.bf16.mxu1 %v5548_v26  ;;  %v4579_v23 = vld [vmem:[#allocation3 + $0x5c0] ss:$16 sps:$4 sm:$0xff]  }
 0x3a2   :  { %3296 = vmatprep.subr.bf16.mxu1 %v4533_v25  ;;  %v5583_v25 = vld [vmem:[%s5748_s6 + $0x8] sm:$0xf] }
 0x3a5   :  { %3297 = vmatpush1.bf16.msra.mxu1 %v4531_v10  ;;  %v4584_v10 = vld [vmem:[#allocation3 + $0x624] ss:$16 sps:$4 sm:$0xff]  }
 0x3a6   :  { %v1467_v6 = vpop.f32.mrf.mxu0  ;;  %v5563_v15 = vpop.f32.mrf.mxu1  ;;  %3298 = vmatprep.subr.bf16.mxu1 %v4539_v27  ;;  %v4587_v27 = vld [vmem:[#allocation3 + $0x5a4] ss:$16 sps:$4 sm:$0xff]  }
 0x3a7   :  { %v1468_v32 = vadd.f32 %v1467_v6, %v1100_v29  ;;  %v1132_v29 = vrot.slane %v5583_v25, %v5552_v28  ;;  %v4585_v6 = vld [vmem:[#allocation3 + $0x5a0] ss:$16 sps:$4 sm:$0xff]  }
 0x3a8   :  { %v1469_v33 = vpop.f32.mrf.mxu0  ;;  %v5565_v34 = vpop.f32.mrf.mxu1 }
 0x3a9   :  { %v1470_v37 = vadd.f32 %v1469_v33, %v1104_v31  ;;  %3299 = vmatpush1.bf16.msra.mxu1 %v4537_v7  ;;  %v1640_v39 = vmax.f32 %v1468_v32, 0.0  ;;  %v4582_v31 = vld [vmem:[#allocation3 + $0x620] ss:$16 sps:$4 sm:$0xff]   ;;  %v1136_v7 = vrot.slane %v5583_v25, %v5557_v14  ;;  %v4590_v32 = vld [vmem:[#allocation3 + $0x604] ss:$16 sps:$4 sm:$0xff]  }
 0x3aa   :  { %v1471_v40 = vpop.f32.mrf.mxu0  ;;  %v1594_v48 = vpop.f32.mrf.mxu1  ;;  %3300 = vmatprep.subr.bf16.mxu1 %v4545_v30  ;;  %v4593_v33 = vld [vmem:[#allocation3 + $0x584] ss:$16 sps:$4 sm:$0xff]  }
 0x3ab   :  { %v1641_v43 = vmax.f32 %v1470_v37, 0.0  ;;  %v5569_v47 = vpack.c.bf16 %v1640_v39, %v1640_v39  ;;  %v4588_v40 = vld [vmem:[#allocation3 + $0x600] ss:$16 sps:$4 sm:$0xff]  }
 0x3ac   :  { %v1472_v36 = vpop.f32.mrf.mxu0  ;;  %v1595_v11 = vpop.f32.mrf.mxu1  ;;  %v4591_v48 = vld [vmem:[#allocation3 + $0x580] ss:$16 sps:$4 sm:$0xff]  }
 0x3ad   :  { %v5567_v44 = vpack.c.bf16 %v1641_v43, %v1641_v43  ;;  %3301 = vmatpush1.bf16.msra.mxu1 %v4543_v38  ;;  %v4596_v43 = vld [vmem:[#allocation3 + $0x7e4] ss:$16 sps:$4 sm:$0xff]  }
 0x3ae   :  { %3302 = vmatprep.subr.bf16.mxu1 %v4551_v42  ;;  %v4599_v36 = vld [vmem:[#allocation3 + $0x564] ss:$16 sps:$4 sm:$0xff]  }
 0x3af   :  { %3285 = vmatprep.mubr.bf16.mxu0 %v5567_v44 }
 0x3b0   :  { %3286 = vmatmul.mubr.bf16.vlgmr.msra.gmra.mxu0 %v5569_v47 }
 0x3b1   :  { %3336 = vmatpush1.bf16.msra.mxu0 %v4546_v45  ;;  %3303 = vmatpush1.bf16.msra.mxu1 %v4549_v46  ;;  %v4594_v45 = vld [vmem:[#allocation3 + $0x7e0] ss:$16 sps:$4 sm:$0xff]  }
 0x3b2   :  { %3337 = vmatprep.subr.bf16.mxu0 %v4554_v49  ;;  %3304 = vmatprep.subr.bf16.mxu1 %v4557_v50  ;;  %v4597_v46 = vld [vmem:[#allocation3 + $0x560] ss:$16 sps:$4 sm:$0xff]   ;;  %v1107_v49 = vsub.s32 4, %v5123_v2  ;;  %v4602_v50 = vld [vmem:[#allocation3 + $0x7c4] ss:$16 sps:$4 sm:$0xff]  }
 0x3b5   :  { %3338 = vmatpush1.bf16.msra.mxu0 %v4552_v53  ;;  %3305 = vmatpush1.bf16.msra.mxu1 %v4555_v57  ;;  %v4605_v53 = vld [vmem:[#allocation3 + $0x544] ss:$16 sps:$4 sm:$0xff]   ;;  %v4600_v57 = vld [vmem:[#allocation3 + $0x7c0] ss:$16 sps:$4 sm:$0xff]  }
 0x3b6   :  { %v5575_v61 = vpop.f32.mrf.mxu0  ;;  %3339 = vmatprep.subr.bf16.mxu0 %v4560_v4  ;;  %3306 = vmatprep.subr.bf16.mxu1 %v4563_v56  ;;  %v1108_v4 = vrot.slane %v5531_v62, %v1107_v49  ;;  %v4608_v56 = vld [vmem:[#allocation3 + $0x7a4] ss:$16 sps:$4 sm:$0xff]   ;;  %v4662_v49 = vld [vmem:[#allocation3 + $0x28c] ss:$16 sps:$4 sm:$0xff]  }
 0x3b8   :  { %v1551_v5 = vpop.f32.mrf.mxu0 }
 0x3b9   :  { %v1552_v9 = vadd.f32 %v1551_v5, %v1120_v59  ;;  %3340 = vmatpush1.bf16.msra.mxu0 %v4558_v58  ;;  %3307 = vmatpush1.bf16.msra.mxu1 %v4561_v60  ;;  %v4611_v58 = vld [vmem:[#allocation3 + $0x524] ss:$16 sps:$4 sm:$0xff]   ;;  %v4606_v59 = vld [vmem:[#allocation3 + $0x7a0] ss:$16 sps:$4 sm:$0xff]  }
 0x3ba   :  { %v1553_v13 = vpop.f32.mrf.mxu0  ;;  %3341 = vmatprep.subr.bf16.mxu0 %v4566_v63  ;;  %3308 = vmatprep.subr.bf16.mxu1 %v4569_v0  ;;  %v4609_v60 = vld [vmem:[#allocation3 + $0x520] ss:$16 sps:$4 sm:$0xff]   ;;  %v1509_v63 = vadd.f32 %v5542_v3, %v1108_v4  ;;  %v4614_v0 = vld [vmem:[#allocation3 + $0x784] ss:$16 sps:$4 sm:$0xff]   ;;  %v1115_v3 = vsub.s32 6, %v5123_v2 }
 0x3bb   :  { %v1645_v18 = vmax.f32 %v1552_v9, 0.0  ;;  %v4617_v5 = vld [vmem:[#allocation3 + $0x504] ss:$16 sps:$4 sm:$0xff]   ;;  %v4612_v9 = vld [vmem:[#allocation3 + $0x780] ss:$16 sps:$4 sm:$0xff]  }
 0x3bc   :  { %v1554_v41 = vpop.f32.mrf.mxu0  ;;  %v4620_v13 = vld [vmem:[#allocation3 + $0x764] ss:$16 sps:$4 sm:$0xff]   ;;  %v4630_v2 = vld [vmem:[#allocation3 + $0x720] ss:$16 sps:$4 sm:$0xff]   ;;  %v4666_v4 = vld [vmem:[#allocation3 + $0x268] ss:$16 sps:$4 sm:$0xff]  }
 0x3bd   :  { %v5577_v19 = vpack.c.bf16 %v1645_v18, %v1645_v18  ;;  %3342 = vmatpush1.bf16.msra.mxu0 %v4564_v51  ;;  %3309 = vmatpush1.bf16.msra.mxu1 %v4567_v12  ;;  %v4615_v51 = vld [vmem:[#allocation3 + $0x500] ss:$16 sps:$4 sm:$0xff]   ;;  %v1642_v12 = vmax.f32 %v1509_v63, 0.0  ;;  %v4621_v18 = vld [vmem:[#allocation3 + $0xe8] ss:$16 sps:$4 sm:$0xff]  }
 0x3be   :  { %3343 = vmatprep.subr.bf16.mxu0 %v4572_v16  ;;  %3310 = vmatprep.subr.bf16.mxu1 %v4575_v17  ;;  %v4623_v16 = vld [vmem:[#allocation3 + $0xec] ss:$16 sps:$4 sm:$0xff]   ;;  %v4618_v17 = vld [vmem:[#allocation3 + $0x760] ss:$16 sps:$4 sm:$0xff]   ;;  %v4675_v63 = vld [vmem:[#allocation3 + $0x1c8] ss:$16 sps:$4 sm:$0xff]  }
 0x3bf   :  { %3367 = vmatprep.mubr.bf16.mxu0 %v5577_v19  ;;  %v5596_v41 = vpack.c.bf16 %v1642_v12, %v1642_v12  ;;  %v4686_v12 = vld [vmem:[#allocation3 + $0x20c] ss:$16 sps:$4 sm:$0xff]  }
 0x3c1   :  { %3344 = vmatpush1.bf16.msra.mxu0 %v4570_v54  ;;  %3311 = vmatpush2.bf16.msra.mxu1 %v4573_v55  ;;  %v4626_v54 = vld [vmem:[#allocation3 + $0x744] ss:$16 sps:$4 sm:$0xff]   ;;  %v4629_v55 = vld [vmem:[#allocation3 + $0xcc] ss:$16 sps:$4 sm:$0xff]  }
 0x3c2   :  { %3345 = vmatprep.subr.bf16.mxu0 %v4578_v20  ;;  %3312 = vmatprep.subr.bf16.mxu1 %v4581_v21  ;;  %v4624_v20 = vld [vmem:[#allocation3 + $0x740] ss:$16 sps:$4 sm:$0xff]   ;;  %v4627_v21 = vld [vmem:[#allocation3 + $0xc8] ss:$16 sps:$4 sm:$0xff]  }
 0x3c5   :  { %3346 = vmatpush1.bf16.msra.mxu0 %v4576_v8  ;;  %3313 = vmatpush2.bf16.msra.mxu1 %v4579_v23  ;;  %v1116_v8 = vrot.slane %v5531_v62, %v1115_v3  ;;  %v4632_v23 = vld [vmem:[#allocation3 + $0x724] ss:$16 sps:$4 sm:$0xff]   ;;  %v4639_v62 = vld [vmem:[#allocation3 + $0x88] ss:$16 sps:$4 sm:$0xff]   ;;  %v4695_v3 = vld [vmem:[#allocation3 + $0x16c] ss:$16 sps:$4 sm:$0xff]  }
 0x3c6   :  { %v1631_v30 = vpop.f32.mrf.mxu0  ;;  %3347 = vmatprep.subr.bf16.mxu0 %v4584_v10  ;;  %3314 = vmatprep.subr.bf16.mxu1 %v4587_v27  ;;  %v4635_v10 = vld [vmem:[#allocation3 + $0xac] ss:$16 sps:$4 sm:$0xff]   ;;  %v4633_v27 = vld [vmem:[#allocation3 + $0xa8] ss:$16 sps:$4 sm:$0xff]  }
 0x3c7   :  { %v5589_v37 = vadd.f32 %v1631_v30, %v1132_v29  ;;  %v1550_v29 = vadd.f32 %v5575_v61, %v1116_v8  ;;  %v4645_v61 = vld [vmem:[#allocation3 + $0x68] ss:$16 sps:$4 sm:$0xff]  }
 0x3c8   :  { %v1633_v38 = vpop.f32.mrf.mxu0  ;;  %v4696_v8 = vld [vmem:[#allocation3 + $0x3c8] ss:$16 sps:$4 sm:$0xff]  }
 0x3c9   :  { %v5591_v39 = vadd.f32 %v1633_v38, %v1136_v7  ;;  %3348 = vmatpush1.bf16.msra.mxu0 %v4582_v31  ;;  %3315 = vmatpush2.bf16.msra.mxu1 %v4585_v6  ;;  %v4638_v31 = vld [vmem:[#allocation3 + $0x704] ss:$16 sps:$4 sm:$0xff]   ;;  %v4641_v7 = vld [vmem:[#allocation3 + $0x8c] ss:$16 sps:$4 sm:$0xff]   ;;  %v4636_v6 = vld [vmem:[#allocation3 + $0x700] ss:$16 sps:$4 sm:$0xff]  }
 0x3ca   :  { %v1635_v42 = vpop.f32.mrf.mxu0  ;;  %3349 = vmatprep.subr.bf16.mxu0 %v4590_v32  ;;  %3316 = vmatprep.subr.bf16.mxu1 %v4593_v33  ;;  %v1644_v30 = vmax.f32 %v1550_v29, 0.0  ;;  %v4647_v32 = vld [vmem:[#allocation3 + $0x6c] ss:$16 sps:$4 sm:$0xff]   ;;  %v4642_v33 = vld [vmem:[#allocation3 + $0x2e8] ss:$16 sps:$4 sm:$0xff]  }
 0x3cb   :  { %v4648_v42 = vld [vmem:[#allocation3 + $0x2c8] ss:$16 sps:$4 sm:$0xff]  }
 0x3cc   :  { %v1636_v11 = vpop.f32.mrf.mxu0  ;;  %v5603_v38 = vpack.c.bf16 %v1644_v30, %v1644_v30  ;;  %v4705_v29 = vld [vmem:[#allocation3 + $0x128] ss:$16 sps:$4 sm:$0xff]   ;;  %v4716_v30 = vld [vmem:[#allocation3 + $0x36c] ss:$16 sps:$4 sm:$0xff]  }
 0x3cd   :  { %3350 = vmatpush1.bf16.msra.mxu0 %v4588_v40  ;;  %3317 = vmatpush2.bf16.msra.mxu1 %v4591_v48  ;;  %v4650_v40 = vld [vmem:[#allocation3 + $0x2cc] ss:$16 sps:$4 sm:$0xff]  }
 0x3ce   :  { %3351 = vmatprep.subr.bf16.mxu0 %v4596_v43  ;;  %3318 = vmatprep.subr.bf16.mxu1 %v4599_v36  ;;  %v4653_v48 = vld [vmem:[#allocation3 + $0x4c] ss:$16 sps:$4 sm:$0xff]   ;;  %v4651_v43 = vld [vmem:[#allocation3 + $0x48] ss:$16 sps:$4 sm:$0xff]  }
 0x3cf   :  { %v4656_v36 = vld [vmem:[#allocation3 + $0x2ac] ss:$16 sps:$4 sm:$0xff]  }
 0x3d0   :  { %v4659_v11 = vld [vmem:[#allocation3 + $0x2c] ss:$16 sps:$4 sm:$0xff]  }
 0x3d1   :  { %3352 = vmatpush2.bf16.msra.mxu0 %v4594_v45  ;;  %3319 = vmatpush2.bf16.msra.mxu1 %v4597_v46  ;;  %v4654_v45 = vld [vmem:[#allocation3 + $0x2a8] ss:$16 sps:$4 sm:$0xff]  }
 0x3d2   :  { %3353 = vmatprep.subr.bf16.mxu0 %v4602_v50  ;;  %3320 = vmatprep.subr.bf16.mxu1 %v4605_v53  ;;  %v4657_v46 = vld [vmem:[#allocation3 + $0x28] ss:$16 sps:$4 sm:$0xff]   ;;  %v4665_v50 = vld [vmem:[#allocation3 + $0xc] ss:$16 sps:$4 sm:$0xff]  }
 0x3d3   :  { %v4660_v53 = vld [vmem:[#allocation3 + $0x288] ss:$16 sps:$4 sm:$0xff]  }
 0x3d5   :  { %3354 = vmatpush2.bf16.msra.mxu0 %v4600_v57  ;;  %3321 = vmatpush2.bf16.msra.mxu1 %v4603_v52  ;;  %v4668_v57 = vld [vmem:[#allocation3 + $0x26c] ss:$16 sps:$4 sm:$0xff]  }
 0x3d6   :  { %3355 = vmatprep.subr.bf16.mxu0 %v4608_v56  ;;  %3322 = vmatprep.subr.bf16.mxu1 %v4611_v58  ;;  %v4671_v52 = vld [vmem:[#allocation3 + $0x1ec] ss:$16 sps:$4 sm:$0xff]   ;;  %v4669_v56 = vld [vmem:[#allocation3 + $0x1e8] ss:$16 sps:$4 sm:$0xff]  }
 0x3d7   :  { %v4674_v58 = vld [vmem:[#allocation3 + $0x24c] ss:$16 sps:$4 sm:$0xff]  }
 0x3d9   :  { %3356 = vmatpush2.bf16.msra.mxu0 %v4606_v59  ;;  %3323 = vmatpush2.bf16.msra.mxu1 %v4609_v60  ;;  %v4677_v59 = vld [vmem:[#allocation3 + $0x1cc] ss:$16 sps:$4 sm:$0xff]   ;;  %v4672_v60 = vld [vmem:[#allocation3 + $0x248] ss:$16 sps:$4 sm:$0xff]  }
 0x3da   :  { %3357 = vmatprep.subr.bf16.mxu0 %v4614_v0  ;;  %3324 = vmatprep.subr.bf16.mxu1 %v4617_v5  ;;  %v4680_v0 = vld [vmem:[#allocation3 + $0x22c] ss:$16 sps:$4 sm:$0xff]  }
 0x3db   :  { %v4683_v5 = vld [vmem:[#allocation3 + $0x1ac] ss:$16 sps:$4 sm:$0xff]  }
 0x3dd   :  { %3358 = vmatpush2.bf16.msra.mxu0 %v4612_v9  ;;  %3325 = vmatpush2.bf16.msra.mxu1 %v4615_v51  ;;  %v4678_v9 = vld [vmem:[#allocation3 + $0x228] ss:$16 sps:$4 sm:$0xff]  }
 0x3de   :  { %3359 = vmatprep.subr.bf16.mxu0 %v4620_v13  ;;  %3376 = vmatprep.subr.bf16.mxu1 %v4623_v16  ;;  %v4681_v51 = vld [vmem:[#allocation3 + $0x1a8] ss:$16 sps:$4 sm:$0xff]   ;;  %v4689_v13 = vld [vmem:[#allocation3 + $0x18c] ss:$16 sps:$4 sm:$0xff]  }
 0x3df   :  { %v4684_v16 = vld [vmem:[#allocation3 + $0x208] ss:$16 sps:$4 sm:$0xff]  }
 0x3e0   :  { %3327 = vmatmul.mubr.bf16.vlgmr.msra.gmra.mxu1 %v5596_v41 }
 0x3e1   :  { %3360 = vmatpush2.bf16.msra.mxu0 %v4618_v17  ;;  %3377 = vmatpush1.bf16.msra.mxu1 %v4621_v18  ;;  %v4687_v17 = vld [vmem:[#allocation3 + $0x188] ss:$16 sps:$4 sm:$0xff]   ;;  %v4692_v18 = vld [vmem:[#allocation3 + $0x3ec] ss:$16 sps:$4 sm:$0xff]  }
 0x3e2   :  { %3408 = vmatprep.mubr.bf16.mxu1 %v5544_v22  ;;  %3361 = vmatprep.subr.bf16.mxu0 %v4626_v54  ;;  %v4644_v22 = vld [vmem:[#allocation3 + $0x2ec] ss:$16 sps:$4 sm:$0xff]   ;;  %v4690_v54 = vld [vmem:[#allocation3 + $0x3e8] ss:$16 sps:$4 sm:$0xff]  }
 0x3e3   :  { %3378 = vmatprep.subr.bf16.mxu1 %v4629_v55  ;;  %v4693_v55 = vld [vmem:[#allocation3 + $0x168] ss:$16 sps:$4 sm:$0xff]  }
 0x3e5   :  { %3362 = vmatpush2.bf16.msra.mxu0 %v4624_v20  ;;  %3379 = vmatpush1.bf16.msra.mxu1 %v4627_v21  ;;  %v4698_v20 = vld [vmem:[#allocation3 + $0x3cc] ss:$16 sps:$4 sm:$0xff]  }
 0x3e6   :  { %3363 = vmatprep.subr.bf16.mxu0 %v4632_v23  ;;  %3380 = vmatprep.subr.bf16.mxu1 %v4635_v10  ;;  %v4701_v21 = vld [vmem:[#allocation3 + $0x14c] ss:$16 sps:$4 sm:$0xff]   ;;  %v4699_v23 = vld [vmem:[#allocation3 + $0x148] ss:$16 sps:$4 sm:$0xff]  }
 0x3e7   :  { %v4704_v10 = vld [vmem:[#allocation3 + $0x3ac] ss:$16 sps:$4 sm:$0xff]  }
 0x3e9   :  { %3364 = vmatpush2.bf16.msra.mxu0 %v4630_v2  ;;  %3381 = vmatpush1.bf16.msra.mxu1 %v4633_v27  ;;  %v4707_v2 = vld [vmem:[#allocation3 + $0x12c] ss:$16 sps:$4 sm:$0xff]   ;;  %v4702_v27 = vld [vmem:[#allocation3 + $0x3a8] ss:$16 sps:$4 sm:$0xff]  }
 0x3ea   :  { %3365 = vmatprep.subr.bf16.mxu0 %v4638_v31  ;;  %3382 = vmatprep.subr.bf16.mxu1 %v4641_v7  ;;  %v4710_v31 = vld [vmem:[#allocation3 + $0x38c] ss:$16 sps:$4 sm:$0xff]  }
 0x3eb   :  { %v4713_v7 = vld [vmem:[#allocation3 + $0x10c] ss:$16 sps:$4 sm:$0xff]  }
 0x3ed   :  { %3366 = vmatpush2.bf16.msra.mxu0 %v4636_v6  ;;  %3383 = vmatpush1.bf16.msra.mxu1 %v4639_v62  ;;  %v4708_v6 = vld [vmem:[#allocation3 + $0x388] ss:$16 sps:$4 sm:$0xff]  }
 0x3ee   :  { %3417 = vmatprep.subr.bf16.mxu0 %v4644_v22  ;;  %3384 = vmatprep.subr.bf16.mxu1 %v4647_v32  ;;  %v4711_v62 = vld [vmem:[#allocation3 + $0x108] ss:$16 sps:$4 sm:$0xff]   ;;  %v4719_v22 = vld [vmem:[#allocation3 + $0x4ec] ss:$16 sps:$4 sm:$0xff]  }
 0x3ef   :  { %v4714_v32 = vld [vmem:[#allocation3 + $0x368] ss:$16 sps:$4 sm:$0xff]  }
 0x3f0   :  { %3368 = vmatmul.mubr.bf16.vlgmr.msra.gmra.mxu0 %v5603_v38 }
 0x3f1   :  { %3418 = vmatpush1.bf16.msra.mxu0 %v4642_v33  ;;  %3449 = vmatprep.mubr.bf16.mxu0 %v5567_v44  ;;  %v4663_v44 = vld [vmem:[#allocation3 + $0x8] ss:$16 sps:$4 sm:$0xff]  }
 0x3f2   :  { %3385 = vmatpush1.bf16.msra.mxu1 %v4645_v61  ;;  %3419 = vmatprep.subr.bf16.mxu0 %v4650_v40  ;;  %v4717_v33 = vld [vmem:[#allocation3 + $0x4e8] ss:$16 sps:$4 sm:$0xff]   ;;  %v4722_v61 = vld [vmem:[#allocation3 + $0x34c] ss:$16 sps:$4 sm:$0xff]  }
 0x3f3   :  { %3386 = vmatprep.subr.bf16.mxu1 %v4653_v48  ;;  %v4725_v40 = vld [vmem:[#allocation3 + $0x4cc] ss:$16 sps:$4 sm:$0xff]   ;;  %v4720_v48 = vld [vmem:[#allocation3 + $0x348] ss:$16 sps:$4 sm:$0xff]  }
 0x3f5   :  { %3420 = vmatpush1.bf16.msra.mxu0 %v4648_v42  ;;  %v4723_v42 = vld [vmem:[#allocation3 + $0x4c8] ss:$16 sps:$4 sm:$0xff]  }
 0x3f6   :  { %3387 = vmatpush1.bf16.msra.mxu1 %v4651_v43  ;;  %3421 = vmatprep.subr.bf16.mxu0 %v4656_v36  ;;  %v4728_v43 = vld [vmem:[#allocation3 + $0x32c] ss:$16 sps:$4 sm:$0xff]  }
 0x3f7   :  { %3388 = vmatprep.subr.bf16.mxu1 %v4659_v11  ;;  %v4731_v36 = vld [vmem:[#allocation3 + $0x4ac] ss:$16 sps:$4 sm:$0xff]   ;;  %v4726_v11 = vld [vmem:[#allocation3 + $0x328] ss:$16 sps:$4 sm:$0xff]  }
 0x3f9   :  { %3422 = vmatpush1.bf16.msra.mxu0 %v4654_v45  ;;  %v4729_v45 = vld [vmem:[#allocation3 + $0x4a8] ss:$16 sps:$4 sm:$0xff]  }
 0x3fa   :  { %3389 = vmatpush1.bf16.msra.mxu1 %v4657_v46  ;;  %3423 = vmatprep.subr.bf16.mxu0 %v4662_v49  ;;  %v4734_v46 = vld [vmem:[#allocation3 + $0x30c] ss:$16 sps:$4 sm:$0xff]  }
 0x3fb   :  { %3390 = vmatprep.subr.bf16.mxu1 %v4665_v50  ;;  %v4737_v49 = vld [vmem:[#allocation3 + $0x48c] ss:$16 sps:$4 sm:$0xff]   ;;  %v4735_v50 = vld [vmem:[#allocation3 + $0x488] ss:$16 sps:$4 sm:$0xff]  }
 0x3fd   :  { %3424 = vmatpush1.bf16.msra.mxu0 %v4660_v53  ;;  %v4740_v53 = vld [vmem:[#allocation3 + $0x6ec] ss:$16 sps:$4 sm:$0xff]  }
 0x3fe   :  { %3391 = vmatpush1.bf16.msra.mxu1 %v4663_v44  ;;  %3425 = vmatprep.subr.bf16.mxu0 %v4668_v57  ;;  %v4738_v44 = vld [vmem:[#allocation3 + $0x6e8] ss:$16 sps:$4 sm:$0xff]  }
 0x3ff   :  { %3392 = vmatprep.subr.bf16.mxu1 %v4671_v52  ;;  %v4741_v57 = vld [vmem:[#allocation3 + $0x468] ss:$16 sps:$4 sm:$0xff]   ;;  %v4746_v52 = vld [vmem:[#allocation3 + $0x6cc] ss:$16 sps:$4 sm:$0xff]  }
 0x401   :  { %3426 = vmatpush1.bf16.msra.mxu0 %v4666_v4  ;;  %v4749_v4 = vld [vmem:[#allocation3 + $0x44c] ss:$16 sps:$4 sm:$0xff]  }
 0x402   :  { %3393 = vmatpush2.bf16.msra.mxu1 %v4669_v56  ;;  %3427 = vmatprep.subr.bf16.mxu0 %v4674_v58  ;;  %v4744_v56 = vld [vmem:[#allocation3 + $0x6c8] ss:$16 sps:$4 sm:$0xff]  }
 0x403   :  { %3394 = vmatprep.subr.bf16.mxu1 %v4677_v59  ;;  %v4747_v58 = vld [vmem:[#allocation3 + $0x448] ss:$16 sps:$4 sm:$0xff]   ;;  %v4752_v59 = vld [vmem:[#allocation3 + $0x6ac] ss:$16 sps:$4 sm:$0xff]  }
 0x405   :  { %3428 = vmatpush1.bf16.msra.mxu0 %v4672_v60  ;;  %v4755_v60 = vld [vmem:[#allocation3 + $0x42c] ss:$16 sps:$4 sm:$0xff]  }
 0x406   :  { %3395 = vmatpush2.bf16.msra.mxu1 %v4675_v63  ;;  %3429 = vmatprep.subr.bf16.mxu0 %v4680_v0  ;;  %v4750_v63 = vld [vmem:[#allocation3 + $0x6a8] ss:$16 sps:$4 sm:$0xff]  }
 0x407   :  { %3396 = vmatprep.subr.bf16.mxu1 %v4683_v5  ;;  %v4753_v0 = vld [vmem:[#allocation3 + $0x428] ss:$16 sps:$4 sm:$0xff]   ;;  %v4758_v5 = vld [vmem:[#allocation3 + $0x68c] ss:$16 sps:$4 sm:$0xff]  }
 0x409   :  { %3430 = vmatpush1.bf16.msra.mxu0 %v4678_v9  ;;  %v4761_v9 = vld [vmem:[#allocation3 + $0x40c] ss:$16 sps:$4 sm:$0xff]  }
 0x40a   :  { %3397 = vmatpush2.bf16.msra.mxu1 %v4681_v51  ;;  %3431 = vmatprep.subr.bf16.mxu0 %v4686_v12  ;;  %v4764_v51 = vld [vmem:[#allocation3 + $0x66c] ss:$16 sps:$4 sm:$0xff]  }
 0x40b   :  { %3398 = vmatprep.subr.bf16.mxu1 %v4689_v13  ;;  %v4767_v12 = vld [vmem:[#allocation3 + $0x5ec] ss:$16 sps:$4 sm:$0xff]   ;;  %v4762_v13 = vld [vmem:[#allocation3 + $0x668] ss:$16 sps:$4 sm:$0xff]  }
 0x40d   :  { %3432 = vmatpush1.bf16.msra.mxu0 %v4684_v16  ;;  %v4765_v16 = vld [vmem:[#allocation3 + $0x5e8] ss:$16 sps:$4 sm:$0xff]  }
 0x40e   :  { %3399 = vmatpush2.bf16.msra.mxu1 %v4687_v17  ;;  %3433 = vmatprep.subr.bf16.mxu0 %v4692_v18  ;;  %v4770_v17 = vld [vmem:[#allocation3 + $0x64c] ss:$16 sps:$4 sm:$0xff]  }
 0x40f   :  { %3400 = vmatprep.subr.bf16.mxu1 %v4695_v3  ;;  %v4773_v18 = vld [vmem:[#allocation3 + $0x5cc] ss:$16 sps:$4 sm:$0xff]   ;;  %v4768_v3 = vld [vmem:[#allocation3 + $0x648] ss:$16 sps:$4 sm:$0xff]  }
 0x411   :  { %3434 = vmatpush2.bf16.msra.mxu0 %v4690_v54  ;;  %v4771_v54 = vld [vmem:[#allocation3 + $0x5c8] ss:$16 sps:$4 sm:$0xff]  }
 0x412   :  { %3401 = vmatpush2.bf16.msra.mxu1 %v4693_v55  ;;  %3435 = vmatprep.subr.bf16.mxu0 %v4698_v20  ;;  %v4776_v55 = vld [vmem:[#allocation3 + $0x62c] ss:$16 sps:$4 sm:$0xff]  }
 0x413   :  { %3402 = vmatprep.subr.bf16.mxu1 %v4701_v21  ;;  %v4779_v20 = vld [vmem:[#allocation3 + $0x5ac] ss:$16 sps:$4 sm:$0xff]   ;;  %v4774_v21 = vld [vmem:[#allocation3 + $0x628] ss:$16 sps:$4 sm:$0xff]  }
 0x415   :  { %3436 = vmatpush2.bf16.msra.mxu0 %v4696_v8  ;;  %v4777_v8 = vld [vmem:[#allocation3 + $0x5a8] ss:$16 sps:$4 sm:$0xff]  }
 0x416   :  { %3403 = vmatpush2.bf16.msra.mxu1 %v4699_v23  ;;  %3437 = vmatprep.subr.bf16.mxu0 %v4704_v10  ;;  %v4782_v23 = vld [vmem:[#allocation3 + $0x60c] ss:$16 sps:$4 sm:$0xff]  }
 0x417   :  { %3404 = vmatprep.subr.bf16.mxu1 %v4707_v2  ;;  %v4785_v10 = vld [vmem:[#allocation3 + $0x58c] ss:$16 sps:$4 sm:$0xff]   ;;  %v4780_v2 = vld [vmem:[#allocation3 + $0x608] ss:$16 sps:$4 sm:$0xff]  }
 0x419   :  { %3438 = vmatpush2.bf16.msra.mxu0 %v4702_v27  ;;  %v4783_v27 = vld [vmem:[#allocation3 + $0x588] ss:$16 sps:$4 sm:$0xff]  }
 0x41a   :  { %3405 = vmatpush2.bf16.msra.mxu1 %v4705_v29  ;;  %3439 = vmatprep.subr.bf16.mxu0 %v4710_v31  ;;  %v4788_v29 = vld [vmem:[#allocation3 + $0x7ec] ss:$16 sps:$4 sm:$0xff]  }
 0x41b   :  { %3406 = vmatprep.subr.bf16.mxu1 %v4713_v7  ;;  %v4791_v31 = vld [vmem:[#allocation3 + $0x56c] ss:$16 sps:$4 sm:$0xff]   ;;  %v4786_v7 = vld [vmem:[#allocation3 + $0x7e8] ss:$16 sps:$4 sm:$0xff]  }
 0x41d   :  { %3440 = vmatpush2.bf16.msra.mxu0 %v4708_v6  ;;  %v4789_v6 = vld [vmem:[#allocation3 + $0x568] ss:$16 sps:$4 sm:$0xff]  }
 0x41e   :  { %3407 = vmatpush2.bf16.msra.mxu1 %v4711_v62  ;;  %3441 = vmatprep.subr.bf16.mxu0 %v4716_v30  ;;  %v4794_v62 = vld [vmem:[#allocation3 + $0x7cc] ss:$16 sps:$4 sm:$0xff]  }
 0x41f   :  { %3458 = vmatprep.subr.bf16.mxu1 %v4719_v22  ;;  %v4797_v30 = vld [vmem:[#allocation3 + $0x54c] ss:$16 sps:$4 sm:$0xff]   ;;  %v4792_v22 = vld [vmem:[#allocation3 + $0x7c8] ss:$16 sps:$4 sm:$0xff]  }
 0x421   :  { %3409 = vmatmul.mubr.bf16.vlgmr.msra.gmra.mxu1 %v5546_v24  ;;  %3442 = vmatpush2.bf16.msra.mxu0 %v4714_v32  ;;  %v4732_v24 = vld [vmem:[#allocation3 + $0x308] ss:$16 sps:$4 sm:$0xff]  }
 0x422   :  { %3459 = vmatpush1.bf16.msra.mxu1 %v4717_v33  ;;  %3490 = vmatprep.mubr.bf16.mxu1 %v5548_v26  ;;  %v4743_v26 = vld [vmem:[#allocation3 + $0x46c] ss:$16 sps:$4 sm:$0xff]   ;;  %v4795_v32 = vld [vmem:[#allocation3 + $0x548] ss:$16 sps:$4 sm:$0xff]  }
 0x423   :  { %3443 = vmatprep.subr.bf16.mxu0 %v4722_v61  ;;  %3460 = vmatprep.subr.bf16.mxu1 %v4725_v40  ;;  %v4800_v33 = vld [vmem:[#allocation3 + $0x7ac] ss:$16 sps:$4 sm:$0xff]   ;;  %v4798_v40 = vld [vmem:[#allocation3 + $0x7a8] ss:$16 sps:$4 sm:$0xff]  }
 0x424   :  { %v4803_v61 = vld [vmem:[#allocation3 + $0x52c] ss:$16 sps:$4 sm:$0xff]  }
 0x425   :  { %3444 = vmatpush2.bf16.msra.mxu0 %v4720_v48  ;;  %v4801_v48 = vld [vmem:[#allocation3 + $0x528] ss:$16 sps:$4 sm:$0xff]  }
 0x426   :  { %3461 = vmatpush1.bf16.msra.mxu1 %v4723_v42  ;;  %3445 = vmatprep.subr.bf16.mxu0 %v4728_v43  ;;  %v4806_v42 = vld [vmem:[#allocation3 + $0x78c] ss:$16 sps:$4 sm:$0xff]  }
 0x427   :  { %3462 = vmatprep.subr.bf16.mxu1 %v4731_v36  ;;  %v4809_v43 = vld [vmem:[#allocation3 + $0x50c] ss:$16 sps:$4 sm:$0xff]   ;;  %v4804_v36 = vld [vmem:[#allocation3 + $0x788] ss:$16 sps:$4 sm:$0xff]  }
 0x429   :  { %3446 = vmatpush2.bf16.msra.mxu0 %v4726_v11  ;;  %v4807_v11 = vld [vmem:[#allocation3 + $0x508] ss:$16 sps:$4 sm:$0xff]  }
 0x42a   :  { %3463 = vmatpush1.bf16.msra.mxu1 %v4729_v45  ;;  %3447 = vmatprep.subr.bf16.mxu0 %v4734_v46  ;;  %v4812_v45 = vld [vmem:[#allocation3 + $0x76c] ss:$16 sps:$4 sm:$0xff]   ;;  %v4822_v46 = vld [vmem:[%s5747_s5 + $0x78] sm:$0xff]  }
 0x42b   :  { %3464 = vmatprep.subr.bf16.mxu1 %v4737_v49  ;;  %v4810_v49 = vld [vmem:[#allocation3 + $0x768] ss:$16 sps:$4 sm:$0xff]  }
 0x42d   :  { %3448 = vmatpush2.bf16.msra.mxu0 %v4732_v24  ;;  %v4815_v24 = vld [vmem:[#allocation3 + $0x74c] ss:$16 sps:$4 sm:$0xff]  }
 0x42e   :  { %3465 = vmatpush1.bf16.msra.mxu1 %v4735_v50  ;;  %3499 = vmatprep.subr.bf16.mxu0 %v4740_v53  ;;  %v4823_v50 = vld [vmem:[%s5747_s5 + $0x38] sm:$0xff]   ;;  %v4824_v53 = vld [vmem:[%s5747_s5 + $0x70] sm:$0xff]  }
 0x42f   :  { %3466 = vmatprep.subr.bf16.mxu1 %v4743_v26 }
 0x430   :  { %3450 = vmatmul.mubr.bf16.vlgmr.msra.gmra.mxu0 %v5569_v47  ;;  %v4756_v47 = vld [vmem:[#allocation3 + $0x688] ss:$16 sps:$4 sm:$0xff]  }
 0x431   :  { %3500 = vmatpush1.bf16.msra.mxu0 %v4738_v44  ;;  %3531 = vmatprep.mubr.bf16.mxu0 %v5577_v19  ;;  %v4759_v19 = vld [vmem:[#allocation3 + $0x408] ss:$16 sps:$4 sm:$0xff]  }
 0x432   :  { %3467 = vmatpush1.bf16.msra.mxu1 %v4741_v57  ;;  %3501 = vmatprep.subr.bf16.mxu0 %v4746_v52  ;;  %v4813_v44 = vld [vmem:[#allocation3 + $0x748] ss:$16 sps:$4 sm:$0xff]   ;;  %v4818_v52 = vld [vmem:[#allocation3 + $0x72c] ss:$16 sps:$4 sm:$0xff]  }
 0x433   :  { %3468 = vmatprep.subr.bf16.mxu1 %v4749_v4  ;;  %v4825_v4 = vld [vmem:[%s5747_s5 + $0x30] sm:$0xff]  }
 0x435   :  { %3502 = vmatpush1.bf16.msra.mxu0 %v4744_v56  ;;  %v4826_v56 = vld [vmem:[%s5747_s5 + $0x68] sm:$0xff]  }
 0x436   :  { %3469 = vmatpush1.bf16.msra.mxu1 %v4747_v58  ;;  %3503 = vmatprep.subr.bf16.mxu0 %v4752_v59  ;;  %v4816_v59 = vld [vmem:[#allocation3 + $0x728] ss:$16 sps:$4 sm:$0xff]  }
 0x437   :  { %3470 = vmatprep.subr.bf16.mxu1 %v4755_v60  ;;  %v4821_v60 = vld [vmem:[#allocation3 + $0x70c] ss:$16 sps:$4 sm:$0xff]  }
 0x439   :  { %3504 = vmatpush1.bf16.msra.mxu0 %v4750_v63  ;;  %v4827_v63 = vld [vmem:[%s5747_s5 + $0x28] sm:$0xff]  }
 0x43a   :  { %3471 = vmatpush1.bf16.msra.mxu1 %v4753_v0  ;;  %3505 = vmatprep.subr.bf16.mxu0 %v4758_v5  ;;  %v4828_v0 = vld [vmem:[%s5747_s5 + $0x60] sm:$0xff]  }
 0x43b   :  { %3472 = vmatprep.subr.bf16.mxu1 %v4761_v9  ;;  %v4819_v5 = vld [vmem:[#allocation3 + $0x708] ss:$16 sps:$4 sm:$0xff]  }
 0x43c   :  { %v4829_v9 = vld [vmem:[%s5747_s5 + $0x20] sm:$0xff]  }
 0x43d   :  { %3506 = vmatpush1.bf16.msra.mxu0 %v4756_v47  ;;  %v4830_v47 = vld [vmem:[%s5747_s5 + $0x58] sm:$0xff]  }
 0x43e   :  { %3473 = vmatpush1.bf16.msra.mxu1 %v4759_v19  ;;  %3507 = vmatprep.subr.bf16.mxu0 %v4764_v51  ;;  %v4831_v19 = vld [vmem:[%s5747_s5 + $0x18] sm:$0xff]   ;;  %v4832_v51 = vld [vmem:[%s5747_s5 + $0x50] sm:$0xff]  }
 0x43f   :  { %3474 = vmatprep.subr.bf16.mxu1 %v4767_v12 }
 0x441   :  { %3508 = vmatpush1.bf16.msra.mxu0 %v4762_v13 }
 0x442   :  { %3475 = vmatpush2.bf16.msra.mxu1 %v4765_v16  ;;  %3509 = vmatprep.subr.bf16.mxu0 %v4770_v17  ;;  %v4833_v16 = vld [vmem:[%s5747_s5 + $0x10] sm:$0xff]   ;;  %v4834_v17 = vld [vmem:[%s5747_s5 + $0x48] sm:$0xff]  }
 0x443   :  { %3476 = vmatprep.subr.bf16.mxu1 %v4773_v18 }
 0x445   :  { %3510 = vmatpush1.bf16.msra.mxu0 %v4768_v3  ;;  %v4835_v3 = vld [vmem:[%s5747_s5 + $0x8] sm:$0xff]  }
 0x446   :  { %3477 = vmatpush2.bf16.msra.mxu1 %v4771_v54  ;;  %3511 = vmatprep.subr.bf16.mxu0 %v4776_v55  ;;  %v4839_v55 = vld [vmem:[%s5747_s5 + $0xb8] sm:$0xff]  }
 0x447   :  { %3478 = vmatprep.subr.bf16.mxu1 %v4779_v20  ;;  %v4840_v20 = vld [vmem:[%s5747_s5 + $0xf0] sm:$0xff]  }
 0x449   :  { %3512 = vmatpush1.bf16.msra.mxu0 %v4774_v21  ;;  %v4836_v21 = vld [vmem:[%s5747_s5 + $0x40] sm:$0xff]  }
 0x44a   :  { %3479 = vmatpush2.bf16.msra.mxu1 %v4777_v8  ;;  %3513 = vmatprep.subr.bf16.mxu0 %v4782_v23  ;;  %v4837_v8 = vld [vmem:[%s5747_s5] sm:$0xff]   ;;  %v4841_v23 = vld [vmem:[%s5747_s5 + $0xb0] sm:$0xff]  }
 0x44b   :  { %3480 = vmatprep.subr.bf16.mxu1 %v4785_v10 }
 0x44d   :  { %3514 = vmatpush1.bf16.msra.mxu0 %v4780_v2 }
 0x44e   :  { %3481 = vmatpush2.bf16.msra.mxu1 %v4783_v27  ;;  %3515 = vmatprep.subr.bf16.mxu0 %v4788_v29  ;;  %v4842_v27 = vld [vmem:[%s5747_s5 + $0xe8] sm:$0xff]  }
 0x44f   :  { %3482 = vmatprep.subr.bf16.mxu1 %v4791_v31  ;;  %v4843_v29 = vld [vmem:[%s5747_s5 + $0xa8] sm:$0xff]  }
 0x450   :  { %v5686_v31 = vld [vmem:[%s5748_s6 + $0xc] sm:$0xf] }
 0x451   :  { %3516 = vmatpush2.bf16.msra.mxu0 %v4786_v7 }
 0x452   :  { %3483 = vmatpush2.bf16.msra.mxu1 %v4789_v6  ;;  %3517 = vmatprep.subr.bf16.mxu0 %v4794_v62  ;;  %v4844_v62 = vld [vmem:[%s5747_s5 + $0xe0] sm:$0xff]  }
 0x453   :  { %3484 = vmatprep.subr.bf16.mxu1 %v4797_v30  ;;  %v1915_v30 = vrot.slane %v5686_v31, %v5526_v35 }
 0x455   :  { %3518 = vmatpush2.bf16.msra.mxu0 %v4792_v22  ;;  %v4845_v22 = vld [vmem:[%s5747_s5 + $0xa0] sm:$0xff]  }
 0x456   :  { %3485 = vmatpush2.bf16.msra.mxu1 %v4795_v32  ;;  %3519 = vmatprep.subr.bf16.mxu0 %v4800_v33  ;;  %v4846_v32 = vld [vmem:[%s5747_s5 + $0xd8] sm:$0xff]   ;;  %v1919_v33 = vrot.slane %v5686_v31, %v5534_v1 }
 0x457   :  { %3486 = vmatprep.subr.bf16.mxu1 %v4803_v61  ;;  %v4847_v61 = vld [vmem:[%s5747_s5 + $0x98] sm:$0xff]  }
 0x459   :  { %3520 = vmatpush2.bf16.msra.mxu0 %v4798_v40 }
 0x45a   :  { %3487 = vmatpush2.bf16.msra.mxu1 %v4801_v48  ;;  %3521 = vmatprep.subr.bf16.mxu0 %v4806_v42  ;;  %v1124_v48 = vrot.slane %v5583_v25, %v5526_v35 }
 0x45b   :  { %3488 = vmatprep.subr.bf16.mxu1 %v4809_v43 }
 0x45c   :  { %v1591_v35 = vadd.f32 %v5563_v15, %v1124_v48 }
 0x45d   :  { %3522 = vmatpush2.bf16.msra.mxu0 %v4804_v36  ;;  %v4848_v36 = vld [vmem:[%s5747_s5 + $0xd0] sm:$0xff]  }
 0x45e   :  { %3489 = vmatpush2.bf16.msra.mxu1 %v4807_v11  ;;  %3523 = vmatprep.subr.bf16.mxu0 %v4812_v45  ;;  %v1128_v11 = vrot.slane %v5583_v25, %v5534_v1 }
 0x45f   :  { %4272 = vmatprep.subr.bf16.mxu1 %v4822_v46 }
 0x460   :  { %v5620_v26 = vpop.f32.mrf.mxu1  ;;  %v1593_v1 = vadd.f32 %v5565_v34, %v1128_v11  ;;  %v4853_v34 = vld [vmem:[%s5747_s5 + $0x80] sm:$0xff]  }
 0x461   :  { %3491 = vmatmul.mubr.bf16.vlgmr.msra.gmra.mxu1 %v5596_v41  ;;  %3524 = vmatpush2.bf16.msra.mxu0 %v4810_v49  ;;  %v3247_v40 = vadd.f32 %v5620_v26, %v1915_v30  ;;  %v4849_v49 = vld [vmem:[%s5747_s5 + $0x90] sm:$0xff]  }
 0x462   :  { %v5623_v57 = vpop.f32.mrf.mxu1  ;;  %3525 = vmatprep.subr.bf16.mxu0 %v4815_v24  ;;  %4273 = vmatpush3.bf16.msra.mxu1 %v4823_v50 }
 0x463   :  { %4274 = vmatprep.subr.bf16.mxu1 %v4824_v53  ;;  %v3249_v42 = vadd.f32 %v5623_v57, %v1919_v33 }
 0x464   :  { %v3250_v58 = vpop.f32.mrf.mxu1 }
 0x465   :  { %3526 = vmatpush2.bf16.msra.mxu0 %v4813_v44  ;;  %v4850_v44 = vld [vmem:[%s5747_s5 + $0xc8] sm:$0xff]  }
 0x466   :  { %v3251_v41 = vpop.f32.mrf.mxu1  ;;  %3527 = vmatprep.subr.bf16.mxu0 %v4818_v52  ;;  %4275 = vmatpush3.bf16.msra.mxu1 %v4825_v4  ;;  %v4851_v52 = vld [vmem:[%s5747_s5 + $0x88] sm:$0xff]  }
 0x467   :  { %4276 = vmatprep.subr.bf16.mxu1 %v4826_v56 }
 0x469   :  { %3528 = vmatpush2.bf16.msra.mxu0 %v4816_v59  ;;  %v4852_v59 = vld [vmem:[%s5747_s5 + $0xc0] sm:$0xff]  }
 0x46a   :  { %3529 = vmatprep.subr.bf16.mxu0 %v4821_v60  ;;  %4277 = vmatpush3.bf16.msra.mxu1 %v4827_v63 }
 0x46b   :  { %4278 = vmatprep.subr.bf16.mxu1 %v4828_v0 }
 0x46d   :  { %3530 = vmatpush2.bf16.msra.mxu0 %v4819_v5 }
 0x46e   :  { %4279 = vmatpush3.bf16.msra.mxu1 %v4829_v9 }
 0x46f   :  { %4280 = vmatprep.subr.bf16.mxu1 %v4830_v47 }
 0x470   :  { %3532 = vmatmul.mubr.bf16.vlgmr.msra.gmra.mxu0 %v5603_v38  ;;  %v3287_v12 = vpop.f32.mrf.mxu0  ;;  %v4838_v38 = vld [vmem:[%s5747_s5 + $0xf8] sm:$0xff]  }
 0x471   :  { %4294 = vmatprep.subr.bf16.mxu0 %v4838_v38  ;;  %v3288_v43 = vadd.f32 %v3287_v12, %v3247_v40  ;;  %v1927_v38 = vrot.slane %v5686_v31, %v5557_v14 }
 0x472   :  { %v3289_v13 = vpop.f32.mrf.mxu0  ;;  %4281 = vmatpush3.bf16.msra.mxu1 %v4831_v19  ;;  %4295 = vmatpush3.bf16.msra.mxu0 %v4839_v55 }
 0x473   :  { %4282 = vmatprep.subr.bf16.mxu1 %v4832_v51  ;;  %4296 = vmatprep.subr.bf16.mxu0 %v4840_v20  ;;  %v3290_v45 = vadd.f32 %v3289_v13, %v3249_v42 }
 0x474   :  { %v3291_v18 = vpop.f32.mrf.mxu0 }
 0x476   :  { %v3292_v54 = vpop.f32.mrf.mxu0  ;;  %4283 = vmatpush3.bf16.msra.mxu1 %v4833_v16  ;;  %4297 = vmatpush3.bf16.msra.mxu0 %v4841_v23 }
 0x477   :  { %4284 = vmatprep.subr.bf16.mxu1 %v4834_v17  ;;  %4298 = vmatprep.subr.bf16.mxu0 %v4842_v27 }
 0x47a   :  { %4285 = vmatpush3.bf16.msra.mxu1 %v4835_v3  ;;  %4299 = vmatpush3.bf16.msra.mxu0 %v4843_v29  ;;  %v1923_v3 = vrot.slane %v5686_v31, %v5552_v28 }
 0x47b   :  { %4286 = vmatprep.subr.bf16.mxu1 %v4836_v21  ;;  %4300 = vmatprep.subr.bf16.mxu0 %v4844_v62 }
 0x47e   :  { %4287 = vmatpush3.bf16.msra.mxu1 %v4837_v8  ;;  %4301 = vmatpush3.bf16.msra.mxu0 %v4845_v22 }
 0x47f   :  { %4302 = vmatprep.subr.bf16.mxu0 %v4846_v32 }
 0x482   :  { %4303 = vmatpush3.bf16.msra.mxu0 %v4847_v61 }
 0x483   :  { %4304 = vmatprep.subr.bf16.mxu0 %v4848_v36 }
 0x486   :  { %4305 = vmatpush3.bf16.msra.mxu0 %v4849_v49 }
 0x487   :  { %4306 = vmatprep.subr.bf16.mxu0 %v4850_v44 }
 0x48a   :  { %4307 = vmatpush3.bf16.msra.mxu0 %v4851_v52 }
 0x48b   :  { %4308 = vmatprep.subr.bf16.mxu0 %v4852_v59 }
 0x48e   :  { %4309 = vmatpush3.bf16.msra.mxu0 %v4853_v34 }
 0x4a0   :  { %v3328_v10 = vpop.f32.mrf.mxu1 }
 0x4a1   :  { %v3329_v46 = vadd.f32 %v3328_v10, %v3288_v43 }
 0x4a2   :  { %v3330_v2 = vpop.f32.mrf.mxu1 }
 0x4a3   :  { %v3331_v50 = vadd.f32 %v3330_v2, %v3290_v45 }
 0x4a4   :  { %v3332_v7 = vpop.f32.mrf.mxu1 }
 0x4a6   :  { %v3333_v6 = vpop.f32.mrf.mxu1 }
 0x4b0   :  { %v3369_v24 = vpop.f32.mrf.mxu0 }
 0x4b1   :  { %v3370_v53 = vadd.f32 %v3369_v24, %v3329_v46 }
 0x4b2   :  { %v3371_v26 = vpop.f32.mrf.mxu0 }
 0x4b3   :  { %v3540_v25 = vadd.f32 %v3370_v53, %v1591_v35  ;;  %v3372_v57 = vadd.f32 %v3371_v26, %v3331_v50 }
 0x4b4   :  { %v3373_v4 = vpop.f32.mrf.mxu0 }
 0x4b5   :  { %v3541_v56 = vadd.f32 %v3372_v57, %v1593_v1  ;;  %v3544_v15 = vmax.f32 %v3540_v25, 0.0 }
 0x4b6   :  { %v3374_v58 = vpop.f32.mrf.mxu0 }
 0x4b7   :  { %v3545_v41 = vmax.f32 %v3541_v56, 0.0  ;;  %v3548_v63 = vpack.c.bf16 %v3544_v15, %v3544_v15 }
 0x4b9   :  { %v3549_v60 = vpack.c.bf16 %v3545_v41, %v3545_v41 }
 0x4bb   :  { %3847 = vmatprep.mubr.bf16.mxu1 %v3549_v60 }
 0x4bc   :  { %3848 = vmatmul.mubr.bf16.vlgmr.msra.gmra.mxu1 %v3548_v63 }
 0x4e1   :  { %v3410_v0 = vpop.f32.mrf.mxu1 }
 0x4e2   :  { %v3411_v55 = vadd.f32 %v3410_v0, %v1923_v3 }
 0x4e3   :  { %v3412_v5 = vpop.f32.mrf.mxu1 }
 0x4e4   :  { %v3413_v20 = vadd.f32 %v3412_v5, %v1927_v38 }
 0x4e5   :  { %v3414_v9 = vpop.f32.mrf.mxu1 }
 0x4e7   :  { %v3415_v47 = vpop.f32.mrf.mxu1 }
 0x4f0   :  { %v3451_v19 = vpop.f32.mrf.mxu0 }
 0x4f1   :  { %v3452_v21 = vadd.f32 %v3451_v19, %v3411_v55 }
 0x4f2   :  { %v3453_v51 = vpop.f32.mrf.mxu0 }
 0x4f3   :  { %v3454_v8 = vadd.f32 %v3453_v51, %v3413_v20 }
 0x4f4   :  { %v3455_v12 = vpop.f32.mrf.mxu0 }
 0x4f6   :  { %v3456_v13 = vpop.f32.mrf.mxu0 }
 0x521   :  { %v3492_v16 = vpop.f32.mrf.mxu1 }
 0x522   :  { %v3493_v23 = vadd.f32 %v3492_v16, %v3452_v21 }
 0x523   :  { %v3494_v17 = vpop.f32.mrf.mxu1 }
 0x524   :  { %v3495_v2 = vadd.f32 %v3494_v17, %v3454_v8 }
 0x525   :  { %v3496_v18 = vpop.f32.mrf.mxu1 }
 0x527   :  { %v3497_v54 = vpop.f32.mrf.mxu1 }
 0x530   :  { %v3533_v10 = vpop.f32.mrf.mxu0 }
 0x531   :  { %v3534_v27 = vadd.f32 %v3533_v10, %v3493_v23 }
 0x532   :  { %v3535_v29 = vpop.f32.mrf.mxu0 }
 0x533   :  { %v3542_v7 = vadd.f32 %v3534_v27, %v5589_v37  ;;  %v3536_v6 = vadd.f32 %v3535_v29, %v3495_v2  ;;  %v4225_v37 = vld [vmem:[%s5748_s6 + $0x10] ss:$0 sm:$0xff] }
 0x534   :  { %v3537_v62 = vpop.f32.mrf.mxu0 }
 0x535   :  { %v3543_v30 = vadd.f32 %v3536_v6, %v5591_v39  ;;  %v3546_v28 = vmax.f32 %v3542_v7, 0.0 }
 0x536   :  { %v3538_v22 = vpop.f32.mrf.mxu0 }
 0x537   :  { %v3547_v32 = vmax.f32 %v3543_v30, 0.0  ;;  %v3550_v14 = vpack.c.bf16 %v3546_v28, %v3546_v28 }
 0x539   :  { %v3551_v33 = vpack.c.bf16 %v3547_v32, %v3547_v32 }
 0x53b   :  { %3887 = vmatprep.mubr.bf16.mxu0 %v3551_v33 }
 0x53c   :  { %3888 = vmatmul.mubr.bf16.vlgmr.msra.gmra.mxu0 %v3550_v14 }
 0x57c   :  { %v4288_v31 = vpop.f32.mrf.mxu1 }
 0x57e   :  { %v4289_v61 = vpop.f32.mrf.mxu1 }
 0x57f   :  { %v4290_v40 = vadd.f32 %v4289_v61, %v4288_v31 }
 0x580   :  { %v4291_v48 = vpop.f32.mrf.mxu1 }
 0x581   :  { %v3850_v11 = vadd.f32 %v4290_v40, %v4225_v37 }
 0x582   :  { %v4292_v42 = vpop.f32.mrf.mxu1 }
 0x5fc   :  { %v4310_v43 = vpop.f32.mrf.mxu0 }
 0x5fe   :  { %v4311_v36 = vpop.f32.mrf.mxu0 }
 0x5ff   :  { %v4312_v39 = vadd.f32 %v4311_v36, %v4310_v43 }
 0x600   :  { %v4313_v45 = vpop.f32.mrf.mxu0 }
 0x601   :  { %v3890_v46 = vadd.f32 %v4312_v39, %v3850_v11 }
 0x602   :  { %v4314_v49 = vpop.f32.mrf.mxu0 }
 0x603   :  { %3895 = vst [vmem:[%s5749_s7] sm:$0xff] %v3890_v46 }
 0x604   :  { %3900 = vsyncpa [#allocation4], 1 }

// kernel: _forward_impl.1
= control target key start
LH: loop header
LB: loop body
LE: loop exit
PB: predicated region body
PF: predicated region fallthrough
CT: control target
= control target key end

     0   :  { %12 = vsyncpa [#allocation4], 0  ;;  %s4880_s24 = smov [#allocation3]   ;;  %s5742_s0 = inlined_call_operand.vmem [shape: bf16[8,64,256], index: 0, kind: input, shape index: {}]   ;;  %s5743_s1 = inlined_call_operand.vmem [shape: bf16[64,128], index: 1, kind: input, shape index: {}]   ;;  %s5744_s2 = inlined_call_operand.vmem [shape: bf16[128,64], index: 2, kind: input, shape index: {}]   ;;  %s5745_s3 = inlined_call_operand.vmem [shape: bf16[64,1536], index: 3, kind: input, shape index: {}]   ;;  %s5746_s4 = inlined_call_operand.hbm [shape: bf16[1024,512], index: 4, kind: input, shape index: {}]   ;;  %s5747_s5 = inlined_call_operand.vmem [shape: bf16[512,128], index: 5, kind: input, shape index: {}]   ;;  %s5748_s6 = inlined_call_operand.vmem [shape: f32[1,2176], index: 6, kind: input, shape index: {}]   ;;  %s5749_s7 = inlined_call_operand.vmem [shape: f32[8,128], index: 7, kind: output, shape index: {}]  }
   0x1   :  { %s26_s25 = sshll.u32 %s4880_s24, 4  ;;  %s27_s25 = int_to_ptr.vmem [resolvable:$true] %s26_s25 }
   0x2   :  { %s4866_s26 = scalar_lea.vmem %s27_s25, 32768  ;;  %p4871_p1 = scmp.lt.s32.totalorder %s27_s25, %s27_s25 }
   0x3   :  { %p4867_p0 = scmp.ne.s32.totalorder %s27_s25, %s4866_s26  ;;  %p4872_p2 = scmp.lt.s32.totalorder %s4866_s26, %s4866_s26 }
   0x5   :  { %p4873_p3 = por %p4872_p2, %p4871_p1 }
   0x7   :  { %p4874_p4 = pnand %p4873_p3, %p4867_p0 }
   0x9   :  { %4877 = shalt.err (!%p4874_p4)
}
   0xa   :  { %s4881_s27 = smov 256   ;;  %s4882_s28 = smov 16  }
   0xb   :  { %32 = dma.hbm_to_vmem [thread:$0]  %s5746_s4, 32768, %s27_s25, [#allocation4], %s4881_s27, %s4881_s27, %s4882_s28  }
   0xc   :  { %4878 = dma.done.wait [#allocation4], 32768  }
   0xd   :  { %4879 = vsyncadd [#allocation4], 4294934528  ;;  %v56_v0 = vld [vmem:[%s5742_s0 + $0x40] sm:$0xff]  ;;  %v57_v2 = vld [vmem:[%s5742_s0 + $0x48] sm:$0xff]  ;;  %vm45_vm0 = vcmask 523264   ;;  %vm507_vm1 = vcmask 130112  }
   0xe   :  { %v48_v1 = vld [vmem:[%s5742_s0] sm:$0xff]  ;;  %v128_v3 = vunpack.c.l.bf16 %v56_v0  ;;  %v129_v4 = vunpack.c.h.bf16 %v56_v0  ;;  %v49_v7 = vld [vmem:[%s5742_s0 + $0x8] sm:$0xff]  ;;  %v58_v8 = vld [vmem:[%s5742_s0 + $0x50] sm:$0xff]  ;;  %v130_v9 = vunpack.c.l.bf16 %v57_v2  ;;  %v131_v10 = vunpack.c.h.bf16 %v57_v2 }
   0xf   :  { %v112_v5 = vunpack.c.l.bf16 %v48_v1  ;;  %v113_v6 = vunpack.c.h.bf16 %v48_v1  ;;  %v114_v11 = vunpack.c.l.bf16 %v49_v7  ;;  %v115_v12 = vunpack.c.h.bf16 %v49_v7  ;;  %v50_v13 = vld [vmem:[%s5742_s0 + $0x10] sm:$0xff]  ;;  %v65_v22 = vld [vmem:[%s5742_s0 + $0x88] sm:$0xff]  ;;  %v64_v23 = vld [vmem:[%s5742_s0 + $0x80] sm:$0xff] }
  0x10   :  { %v264_v14 = vadd.f32 %v129_v4, %v128_v3  ;;  %v132_v16 = vunpack.c.l.bf16 %v58_v8  ;;  %v133_v17 = vunpack.c.h.bf16 %v58_v8  ;;  %v267_v18 = vadd.f32 %v131_v10, %v130_v9  ;;  %v59_v30 = vld [vmem:[%s5742_s0 + $0x58] sm:$0xff]  ;;  %v72_v38 = vld [vmem:[%s5742_s0 + $0xc0] sm:$0xff]  ;;  %v66_v39 = vld [vmem:[%s5742_s0 + $0x90] sm:$0xff] }
  0x11   :  { %v240_v15 = vadd.f32 %v113_v6, %v112_v5  ;;  %v243_v19 = vadd.f32 %v115_v12, %v114_v11  ;;  %v116_v20 = vunpack.c.l.bf16 %v50_v13  ;;  %v117_v21 = vunpack.c.h.bf16 %v50_v13  ;;  %v51_v31 = vld [vmem:[%s5742_s0 + $0x18] sm:$0xff]  ;;  %v52_v46 = vld [vmem:[%s5742_s0 + $0x20] sm:$0xff]  ;;  %v73_v47 = vld [vmem:[%s5742_s0 + $0xc8] sm:$0xff] }
  0x12   :  { %265 = vadd.xlane.f32.xlu1 %v264_v14  ;;  %v270_v24 = vadd.f32 %v133_v17, %v132_v16  ;;  %v146_v25 = vunpack.c.l.bf16 %v65_v22  ;;  %v147_v27 = vunpack.c.h.bf16 %v65_v22  ;;  %v144_v28 = vunpack.c.l.bf16 %v64_v23  ;;  %v67_v50 = vld [vmem:[%s5742_s0 + $0x98] sm:$0xff]  ;;  %v60_v55 = vld [vmem:[%s5742_s0 + $0x60] sm:$0xff]  ;;  %v74_v59 = vld [vmem:[%s5742_s0 + $0xd0] sm:$0xff] }
  0x13   :  { %241 = vadd.xlane.f32.xlu0 %v240_v15  ;;  %v246_v26 = vadd.f32 %v117_v21, %v116_v20  ;;  %v145_v29 = vunpack.c.h.bf16 %v64_v23  ;;  %v134_v32 = vunpack.c.l.bf16 %v59_v30  ;;  %v135_v33 = vunpack.c.h.bf16 %v59_v30  ;;  %v80_v56 = vld [vmem:[%s5742_s0 + $0x100] sm:$0xff]  ;;  %v53_v0 = vld [vmem:[%s5742_s0 + $0x28] sm:$0xff]  ;;  %v82_v16 = vld [vmem:[%s5742_s0 + $0x110] sm:$0xff] }
  0x14   :  { %v291_v34 = vadd.f32 %v147_v27, %v146_v25  ;;  %v118_v36 = vunpack.c.l.bf16 %v51_v31  ;;  %v119_v37 = vunpack.c.h.bf16 %v51_v31  ;;  %v160_v41 = vunpack.c.l.bf16 %v72_v38  ;;  %v81_v3 = vld [vmem:[%s5742_s0 + $0x108] sm:$0xff]  ;;  %v68_v8 = vld [vmem:[%s5742_s0 + $0xa0] sm:$0xff] }
  0x15   :  { %v288_v35 = vadd.f32 %v145_v29, %v144_v28  ;;  %v273_v40 = vadd.f32 %v135_v33, %v134_v32  ;;  %v161_v43 = vunpack.c.h.bf16 %v72_v38  ;;  %v148_v44 = vunpack.c.l.bf16 %v66_v39  ;;  %v61_v11 = vld [vmem:[%s5742_s0 + $0x68] sm:$0xff]  ;;  %v88_v27 = vld [vmem:[%s5742_s0 + $0x140] sm:$0xff]  ;;  %v62_v32 = vld [vmem:[%s5742_s0 + $0x70] sm:$0xff] }
  0x16   :  { %268 = vadd.xlane.f32.xlu1 %v267_v18  ;;  %v249_v42 = vadd.f32 %v119_v37, %v118_v36  ;;  %v149_v45 = vunpack.c.h.bf16 %v66_v39  ;;  %v120_v48 = vunpack.c.l.bf16 %v52_v46  ;;  %v121_v49 = vunpack.c.h.bf16 %v52_v46 }
  0x17   :  { %244 = vadd.xlane.f32.xlu0 %v243_v19  ;;  %v312_v51 = vadd.f32 %v161_v43, %v160_v41  ;;  %v162_v53 = vunpack.c.l.bf16 %v73_v47  ;;  %v163_v54 = vunpack.c.h.bf16 %v73_v47  ;;  %v150_v58 = vunpack.c.l.bf16 %v67_v50  ;;  %v75_v19 = vld [vmem:[%s5742_s0 + $0xd8] sm:$0xff]  ;;  %v69_v43 = vld [vmem:[%s5742_s0 + $0xa8] sm:$0xff] }
  0x18   :  { %v294_v52 = vadd.f32 %v149_v45, %v148_v44  ;;  %v252_v57 = vadd.f32 %v121_v49, %v120_v48  ;;  %v151_v61 = vunpack.c.h.bf16 %v67_v50  ;;  %v136_v62 = vunpack.c.l.bf16 %v60_v55  ;;  %v90_v48 = vld [vmem:[%s5742_s0 + $0x150] sm:$0xff] }
  0x19   :  { %v315_v60 = vadd.f32 %v163_v54, %v162_v53  ;;  %v137_v63 = vunpack.c.h.bf16 %v60_v55  ;;  %v176_v1 = vunpack.c.l.bf16 %v80_v56  ;;  %v177_v2 = vunpack.c.h.bf16 %v80_v56  ;;  %v97_v56 = vld [vmem:[%s5742_s0 + $0x188] sm:$0xff] }
  0x1a   :  { %271 = vadd.xlane.f32.xlu1 %v270_v24  ;;  %v297_v4 = vadd.f32 %v151_v61, %v150_v58  ;;  %v164_v6 = vunpack.c.l.bf16 %v74_v59  ;;  %v165_v7 = vunpack.c.h.bf16 %v74_v59  ;;  %v122_v10 = vunpack.c.l.bf16 %v53_v0  ;;  %v89_v24 = vld [vmem:[%s5742_s0 + $0x148] sm:$0xff]  ;;  %v96_v59 = vld [vmem:[%s5742_s0 + $0x180] sm:$0xff] }
  0x1b   :  { %247 = vadd.xlane.f32.xlu0 %v246_v26  ;;  %v276_v5 = vadd.f32 %v137_v63, %v136_v62  ;;  %v336_v9 = vadd.f32 %v177_v2, %v176_v1  ;;  %v123_v13 = vunpack.c.h.bf16 %v53_v0  ;;  %v178_v14 = vunpack.c.l.bf16 %v81_v3  ;;  %v63_v0 = vld [vmem:[%s5742_s0 + $0x78] sm:$0xff] }
  0x1c   :  { %v318_v12 = vadd.f32 %v165_v7, %v164_v6  ;;  %v179_v15 = vunpack.c.h.bf16 %v81_v3  ;;  %v152_v17 = vunpack.c.l.bf16 %v68_v8  ;;  %v153_v18 = vunpack.c.h.bf16 %v68_v8  ;;  %v55_v3 = vld [vmem:[%s5742_s0 + $0x38] sm:$0xff]  ;;  %v77_v8 = vld [vmem:[%s5742_s0 + $0xe8] sm:$0xff] }
  0x1d   :  { %v255_v20 = vadd.f32 %v123_v13, %v122_v10  ;;  %v138_v22 = vunpack.c.l.bf16 %v61_v11  ;;  %v139_v23 = vunpack.c.h.bf16 %v61_v11  ;;  %v180_v26 = vunpack.c.l.bf16 %v82_v16  ;;  %v70_v11 = vld [vmem:[%s5742_s0 + $0xb0] sm:$0xff] }
  0x1e   :  { %292 = vadd.xlane.f32.xlu1 %v291_v34  ;;  %v339_v21 = vadd.f32 %v179_v15, %v178_v14  ;;  %v300_v25 = vadd.f32 %v153_v18, %v152_v17  ;;  %v181_v29 = vunpack.c.h.bf16 %v82_v16  ;;  %v166_v30 = vunpack.c.l.bf16 %v75_v19  ;;  %v91_v16 = vld [vmem:[%s5742_s0 + $0x158] sm:$0xff] }
  0x1f   :  { %289 = vadd.xlane.f32.xlu0 %v288_v35  ;;  %v279_v28 = vadd.f32 %v139_v23, %v138_v22  ;;  %v167_v31 = vunpack.c.h.bf16 %v75_v19  ;;  %v194_v33 = vunpack.c.l.bf16 %v89_v24  ;;  %v195_v34 = vunpack.c.h.bf16 %v89_v24  ;;  %v54_v35 = vld [vmem:[%s5742_s0 + $0x30] sm:$0xff]  ;;  %v84_v19 = vld [vmem:[%s5742_s0 + $0x120] sm:$0xff] }
  0x20   :  { %v342_v36 = vadd.f32 %v181_v29, %v180_v26  ;;  %v192_v38 = vunpack.c.l.bf16 %v88_v27  ;;  %v193_v39 = vunpack.c.h.bf16 %v88_v27  ;;  %v141_v45 = vunpack.c.h.bf16 %v62_v32  ;;  %v104_v24 = vld [vmem:[%s5742_s0 + $0x1c0] sm:$0xff]  ;;  %v98_v27 = vld [vmem:[%s5742_s0 + $0x190] sm:$0xff] }
  0x21   :  { %v321_v37 = vadd.f32 %v167_v31, %v166_v30  ;;  %v363_v41 = vadd.f32 %v195_v34, %v194_v33  ;;  %v124_v46 = vunpack.c.l.bf16 %v54_v35  ;;  %v125_v47 = vunpack.c.h.bf16 %v54_v35  ;;  %v105_v35 = vld [vmem:[%s5742_s0 + $0x1c8] sm:$0xff] }
  0x22   :  { %274 = vadd.xlane.f32.xlu1 %v273_v40  ;;  %v76_v40 = vld [vmem:[%s5742_s0 + $0xe0] sm:$0xff]  ;;  %v360_v44 = vadd.f32 %v193_v39, %v192_v38  ;;  %v154_v54 = vunpack.c.l.bf16 %v69_v43  ;;  %v155_v55 = vunpack.c.h.bf16 %v69_v43  ;;  %v196_v58 = vunpack.c.l.bf16 %v90_v48  ;;  %v78_v43 = vld [vmem:[%s5742_s0 + $0xf0] sm:$0xff] }
  0x23   :  { %250 = vadd.xlane.f32.xlu0 %v249_v42  ;;  %v140_v42 = vunpack.c.l.bf16 %v62_v32  ;;  %v168_v49 = vunpack.c.l.bf16 %v76_v40  ;;  %v169_v50 = vunpack.c.h.bf16 %v76_v40  ;;  %v258_v53 = vadd.f32 %v125_v47, %v124_v46  ;;  %v71_v32 = vld [vmem:[%s5742_s0 + $0xb8] sm:$0xff]  ;;  %v85_v40 = vld [vmem:[%s5742_s0 + $0x128] sm:$0xff] }
  0x24   :  { %v197_v61 = vunpack.c.h.bf16 %v90_v48  ;;  %v210_v1 = vunpack.c.l.bf16 %v97_v56  ;;  %v211_v2 = vunpack.c.h.bf16 %v97_v56  ;;  %v208_v6 = vunpack.c.l.bf16 %v96_v59  ;;  %v99_v48 = vld [vmem:[%s5742_s0 + $0x198] sm:$0xff] }
  0x25   :  { %v209_v7 = vunpack.c.h.bf16 %v96_v59  ;;  %v142_v10 = vunpack.c.l.bf16 %v63_v0  ;;  %v143_v13 = vunpack.c.h.bf16 %v63_v0  ;;  %v126_v14 = vunpack.c.l.bf16 %v55_v3  ;;  %v79_v56 = vld [vmem:[%s5742_s0 + $0xf8] sm:$0xff]  ;;  %v106_v59 = vld [vmem:[%s5742_s0 + $0x1d0] sm:$0xff]  ;;  %v93_v0 = vld [vmem:[%s5742_s0 + $0x168] sm:$0xff] }
  0x26   :  { %313 = vadd.xlane.f32.xlu1 %v312_v51  ;;  %v83_v51 = vld [vmem:[%s5742_s0 + $0x118] sm:$0xff]  ;;  %v127_v15 = vunpack.c.h.bf16 %v55_v3  ;;  %v170_v17 = vunpack.c.l.bf16 %v77_v8  ;;  %v171_v18 = vunpack.c.h.bf16 %v77_v8  ;;  %v156_v22 = vunpack.c.l.bf16 %v70_v11  ;;  %v86_v3 = vld [vmem:[%s5742_s0 + $0x130] sm:$0xff] }
  0x27   :  { %295 = vadd.xlane.f32.xlu0 %v294_v52  ;;  %v282_v52 = vadd.f32 %v141_v45, %v140_v42  ;;  %v182_v62 = vunpack.c.l.bf16 %v83_v51  ;;  %v183_v63 = vunpack.c.h.bf16 %v83_v51  ;;  %v157_v23 = vunpack.c.h.bf16 %v70_v11  ;;  %v92_v51 = vld [vmem:[%s5742_s0 + $0x160] sm:$0xff]  ;;  %v107_v8 = vld [vmem:[%s5742_s0 + $0x1d8] sm:$0xff] }
  0x28   :  { %v198_v26 = vunpack.c.l.bf16 %v91_v16  ;;  %v199_v29 = vunpack.c.h.bf16 %v91_v16  ;;  %v184_v30 = vunpack.c.l.bf16 %v84_v19  ;;  %v185_v31 = vunpack.c.h.bf16 %v84_v19  ;;  %v100_v11 = vld [vmem:[%s5742_s0 + $0x1a0] sm:$0xff]  ;;  %v94_v16 = vld [vmem:[%s5742_s0 + $0x170] sm:$0xff]  ;;  %v87_v19 = vld [vmem:[%s5742_s0 + $0x138] sm:$0xff] }
  0x29   :  { %v224_v33 = vunpack.c.l.bf16 %v104_v24  ;;  %v225_v34 = vunpack.c.h.bf16 %v104_v24  ;;  %v212_v38 = vunpack.c.l.bf16 %v98_v27  ;;  %v213_v39 = vunpack.c.h.bf16 %v98_v27  ;;  %v108_v24 = vld [vmem:[%s5742_s0 + $0x1e0] sm:$0xff]  ;;  %v101_v27 = vld [vmem:[%s5742_s0 + $0x1a8] sm:$0xff] }
  0x2a   :  { %253 = vadd.xlane.f32.xlu1 %v252_v57  ;;  %v324_v57 = vadd.f32 %v169_v50, %v168_v49  ;;  %v158_v42 = vunpack.c.l.bf16 %v71_v32  ;;  %v159_v45 = vunpack.c.h.bf16 %v71_v32  ;;  %v226_v46 = vunpack.c.l.bf16 %v105_v35  ;;  %v102_v32 = vld [vmem:[%s5742_s0 + $0x1b0] sm:$0xff] }
  0x2b   :  { %316 = vadd.xlane.f32.xlu0 %v315_v60  ;;  %v303_v60 = vadd.f32 %v155_v55, %v154_v54  ;;  %v227_v47 = vunpack.c.h.bf16 %v105_v35  ;;  %v186_v49 = vunpack.c.l.bf16 %v85_v40  ;;  %v187_v50 = vunpack.c.h.bf16 %v85_v40  ;;  %v95_v35 = vld [vmem:[%s5742_s0 + $0x178] sm:$0xff] }
  0x2c   :  { %v172_v54 = vunpack.c.l.bf16 %v78_v43  ;;  %v173_v55 = vunpack.c.h.bf16 %v78_v43  ;;  %v103_v40 = vld [vmem:[%s5742_s0 + $0x1b8] sm:$0xff]  ;;  %v109_v43 = vld [vmem:[%s5742_s0 + $0x1e8] sm:$0xff]  ;;  %vm514_vm2 = vcmask 195712   ;;  %vm4884_vm3 = vmmov 0  }
  0x2d   :  { %vm521_vm4 = vcmask 261312   ;;  %vm528_vm5 = vcmask 326912   ;;  %vm535_vm6 = vcmask 392512   ;;  %vm542_vm7 = vcmask 458112  }
  0x2e   :  { %298 = vadd.xlane.f32.xlu1 %v297_v4  ;;  %v366_v4 = vadd.f32 %v197_v61, %v196_v58  ;;  %v214_v58 = vunpack.c.l.bf16 %v99_v48  ;;  %v215_v61 = vunpack.c.h.bf16 %v99_v48  ;;  %v110_v48 = vld [vmem:[%s5742_s0 + $0x1f0] sm:$0xff]  ;;  %vm549_vm8 = vcmask 523712  }
  0x2f   :  { %277 = vadd.xlane.f32.xlu0 %v276_v5  ;;  %v345_v5 = vadd.f32 %v183_v63, %v182_v62  ;;  %v200_v62 = vunpack.c.l.bf16 %v92_v51  ;;  %v201_v63 = vunpack.c.h.bf16 %v92_v51  ;;  %v111_v51 = vld [vmem:[%s5742_s0 + $0x1f8] sm:$0xff]  ;;  %vm824_vm9 = vcmask 1041409  }
  0x30   :  { %vm826_vm10 = vcmask 1042434   ;;  %vm828_vm11 = vcmask 1043459   ;;  %vm830_vm12 = vcmask 1044484   ;;  %vm832_vm13 = vcmask 1045509  }
  0x31   :  { %vm834_vm14 = vcmask 1046534   ;;  %vm836_vm15 = vcmask 1047559  }
  0x32   :  { %337 = vadd.xlane.f32.xlu1 %v336_v9  ;;  %v387_v9 = vadd.f32 %v211_v2, %v210_v1  ;;  %v174_v1 = vunpack.c.l.bf16 %v79_v56  ;;  %v175_v2 = vunpack.c.h.bf16 %v79_v56 }
  0x33   :  { %319 = vadd.xlane.f32.xlu0 %v318_v12  ;;  %v384_v12 = vadd.f32 %v209_v7, %v208_v6  ;;  %v228_v6 = vunpack.c.l.bf16 %v106_v59  ;;  %v229_v7 = vunpack.c.h.bf16 %v106_v59  ;;  %v237_v59 = vunpack.c.h.bf16 %v110_v48 }
  0x36   :  { %256 = vadd.xlane.f32.xlu1 %v255_v20  ;;  %v285_v20 = vadd.f32 %v143_v13, %v142_v10  ;;  %v202_v10 = vunpack.c.l.bf16 %v93_v0  ;;  %v203_v13 = vunpack.c.h.bf16 %v93_v0  ;;  %v496_v0 = vlaneseq }
  0x37   :  { %340 = vadd.xlane.f32.xlu0 %v339_v21  ;;  %v261_v21 = vadd.f32 %v127_v15, %v126_v14  ;;  %v188_v14 = vunpack.c.l.bf16 %v86_v3  ;;  %v189_v15 = vunpack.c.h.bf16 %v86_v3 }
  0x3a   :  { %301 = vadd.xlane.f32.xlu1 %v300_v25  ;;  %v327_v25 = vadd.f32 %v171_v18, %v170_v17  ;;  %v230_v17 = vunpack.c.l.bf16 %v107_v8  ;;  %v231_v18 = vunpack.c.h.bf16 %v107_v8 }
  0x3b   :  { %280 = vadd.xlane.f32.xlu0 %v279_v28  ;;  %v306_v28 = vadd.f32 %v157_v23, %v156_v22  ;;  %v216_v22 = vunpack.c.l.bf16 %v100_v11  ;;  %v217_v23 = vunpack.c.h.bf16 %v100_v11  ;;  %v4355_v11 = vld [vmem:[%s5743_s1 + $0x10] sm:$0xff]  }
  0x3e   :  { %343 = vadd.xlane.f32.xlu1 %v342_v36  ;;  %v369_v36 = vadd.f32 %v199_v29, %v198_v26  ;;  %v204_v26 = vunpack.c.l.bf16 %v94_v16  ;;  %v205_v29 = vunpack.c.h.bf16 %v94_v16 }
  0x3f   :  { %322 = vadd.xlane.f32.xlu0 %v321_v37  ;;  %v348_v37 = vadd.f32 %v185_v31, %v184_v30  ;;  %v190_v30 = vunpack.c.l.bf16 %v87_v19  ;;  %v191_v31 = vunpack.c.h.bf16 %v87_v19 }
  0x42   :  { %364 = vadd.xlane.f32.xlu1 %v363_v41  ;;  %v408_v41 = vadd.f32 %v225_v34, %v224_v33  ;;  %v232_v33 = vunpack.c.l.bf16 %v108_v24  ;;  %v233_v34 = vunpack.c.h.bf16 %v108_v24 }
  0x43   :  { %361 = vadd.xlane.f32.xlu0 %v360_v44  ;;  %v390_v44 = vadd.f32 %v213_v39, %v212_v38  ;;  %v218_v38 = vunpack.c.l.bf16 %v101_v27  ;;  %v219_v39 = vunpack.c.h.bf16 %v101_v27 }
  0x46   :  { %283 = vadd.xlane.f32.xlu1 %v282_v52  ;;  %v309_v52 = vadd.f32 %v159_v45, %v158_v42  ;;  %v220_v42 = vunpack.c.l.bf16 %v102_v32  ;;  %v221_v45 = vunpack.c.h.bf16 %v102_v32 }
  0x47   :  { %259 = vadd.xlane.f32.xlu0 %v258_v53  ;;  %v411_v53 = vadd.f32 %v227_v47, %v226_v46  ;;  %v206_v46 = vunpack.c.l.bf16 %v95_v35  ;;  %v207_v47 = vunpack.c.h.bf16 %v95_v35 }
  0x4a   :  { %325 = vadd.xlane.f32.xlu1 %v324_v57  ;;  %v351_v57 = vadd.f32 %v187_v50, %v186_v49  ;;  %v222_v49 = vunpack.c.l.bf16 %v103_v40  ;;  %v223_v50 = vunpack.c.h.bf16 %v103_v40 }
  0x4b   :  { %304 = vadd.xlane.f32.xlu0 %v303_v60  ;;  %v330_v60 = vadd.f32 %v173_v55, %v172_v54  ;;  %v234_v54 = vunpack.c.l.bf16 %v109_v43  ;;  %v235_v55 = vunpack.c.h.bf16 %v109_v43 }
  0x4c   :  { %v405_v56 = vadd.f32 %v223_v50, %v222_v49  ;;  %v4360_v49 = vld [vmem:[%s5744_s2 + $0x28] sm:$0xff]  }
  0x4e   :  { %367 = vadd.xlane.f32.xlu1 %v366_v4  ;;  %v393_v4 = vadd.f32 %v215_v61, %v214_v58  ;;  %v423_v58 = vadd.f32 %v235_v55, %v234_v54  ;;  %v239_v61 = vunpack.c.h.bf16 %v111_v51 }
  0x4f   :  { %346 = vadd.xlane.f32.xlu0 %v345_v5  ;;  %v372_v5 = vadd.f32 %v201_v63, %v200_v62 }
  0x52   :  { %388 = vadd.xlane.f32.xlu1 %v387_v9  ;;  %v333_v9 = vadd.f32 %v175_v2, %v174_v1  ;;  %v5121_v1 = vand.u32 127, %v496_v0  ;;  %v5123_v2 = vshrl.u32 %v496_v0, 7  ;;  %v4362_v0 = vld [vmem:[%s5744_s2 + $0x18] sm:$0xff]  }
  0x53   :  { %385 = vadd.xlane.f32.xlu0 %v384_v12  ;;  %v414_v12 = vadd.f32 %v229_v7, %v228_v6  ;;  %v4354_v6 = vld [vmem:[%s5743_s1 + $0x18] sm:$0xff]  }
  0x54   :  { %v502_v3 = vadd.s32 4294967288, %v5121_v1  ;;  %v5136_v7 = vsub.s32 %v5121_v1, %v5123_v2  ;;  %v516_v16 = vadd.s32 4294967272, %v5121_v1 }
  0x56   :  { %286 = vadd.xlane.f32.xlu1 %v285_v20  ;;  %v375_v20 = vadd.f32 %v203_v13, %v202_v10  ;;  %v5139_v10 = vsub.s32 %v502_v3, %v5123_v2 }
  0x57   :  { %262 = vadd.xlane.f32.xlu0 %v261_v21  ;;  %v354_v21 = vadd.f32 %v189_v15, %v188_v14 }
  0x5a   :  { %328 = vadd.xlane.f32.xlu1 %v327_v25  ;;  %v417_v25 = vadd.f32 %v231_v18, %v230_v17  ;;  %v4356_v17 = vld [vmem:[%s5743_s1 + $0x8] sm:$0xff]  }
  0x5b   :  { %307 = vadd.xlane.f32.xlu0 %v306_v28  ;;  %v396_v28 = vadd.f32 %v217_v23, %v216_v22  ;;  %v4357_v23 = vld [vmem:[%s5743_s1] sm:$0xff]  }
  0x5e   :  { %370 = vadd.xlane.f32.xlu1 %v369_v36  ;;  %v378_v36 = vadd.f32 %v205_v29, %v204_v26 }
  0x5f   :  { %349 = vadd.xlane.f32.xlu0 %v348_v37  ;;  %v357_v37 = vadd.f32 %v191_v31, %v190_v30 }
  0x62   :  { %409 = vadd.xlane.f32.xlu1 %v408_v41  ;;  %v420_v41 = vadd.f32 %v233_v34, %v232_v33  ;;  %v5172_v34 = vsub.s32 %v516_v16, %v5123_v2 }
  0x63   :  { %391 = vadd.xlane.f32.xlu0 %v390_v44  ;;  %v399_v44 = vadd.f32 %v219_v39, %v218_v38  ;;  %v4358_v38 = vld [vmem:[%s5744_s2 + $0x38] sm:$0xff]  }
  0x66   :  { %310 = vadd.xlane.f32.xlu1 %v309_v52  ;;  %v402_v52 = vadd.f32 %v221_v45, %v220_v42  ;;  %v4359_v42 = vld [vmem:[%s5744_s2 + $0x30] sm:$0xff]  }
  0x67   :  { %412 = vadd.xlane.f32.xlu0 %v411_v53  ;;  %v381_v53 = vadd.f32 %v207_v47, %v206_v46 }
  0x6a   :  { %352 = vadd.xlane.f32.xlu1 %v351_v57  ;;  %v236_v57 = vunpack.c.l.bf16 %v110_v48 }
  0x6b   :  { %331 = vadd.xlane.f32.xlu0 %v330_v60  ;;  %v238_v60 = vunpack.c.l.bf16 %v111_v51 }
  0x6c   :  { %v426_v62 = vadd.f32 %v237_v59, %v236_v57 }
  0x6d   :  { %v429_v63 = vadd.f32 %v239_v61, %v238_v60 }
  0x6e   :  { %394 = vadd.xlane.f32.xlu1 %v393_v4  ;;  %v4883_v4 = vmov 0.0  }
  0x6f   :  { %373 = vadd.xlane.f32.xlu0 %v372_v5  ;;  %46 = vst.msk [vmem:[#allocation2] sm:$0xff] %vm45_vm0, %v4883_v4  ;;  %4316 = vmatprep.subr.bf16.mxu0 %v4883_v4  ;;  %v509_v5 = vadd.s32 4294967280, %v5121_v1 }
  0x70   :  { %4328 = vmatprep.subr.bf16.mxu1 %v4883_v4  ;;  %4317 = vmatpush3.bf16.msra.mxu0 %v4354_v6 }
  0x71   :  { %4318 = vmatprep.subr.bf16.mxu0 %v4883_v4  ;;  %v5147_v15 = vsub.s32 %v509_v5, %v5123_v2  ;;  %4324 = vmatprep.mubr.msk.bf16.mxu0 %vm4884_vm3, %v4883_v4 }
  0x72   :  { %334 = vadd.xlane.f32.xlu1 %v333_v9  ;;  %4344 = vmatprep.mubr.msk.bf16.mxu1 %vm4884_vm3, %v4883_v4 }
  0x73   :  { %415 = vadd.xlane.f32.xlu0 %v414_v12  ;;  %4329 = vmatpush3.bf16.msra.mxu1 %v4358_v38 }
  0x74   :  { %4319 = vmatpush3.bf16.msra.mxu0 %v4355_v11  ;;  %4330 = vmatprep.subr.bf16.mxu1 %v4883_v4 }
  0x75   :  { %4320 = vmatprep.subr.bf16.mxu0 %v4883_v4 }
  0x76   :  { %376 = vadd.xlane.f32.xlu1 %v375_v20 }
  0x77   :  { %355 = vadd.xlane.f32.xlu0 %v354_v21  ;;  %4331 = vmatpush3.bf16.msra.mxu1 %v4359_v42 }
  0x78   :  { %4321 = vmatpush3.bf16.msra.mxu0 %v4356_v17  ;;  %4332 = vmatprep.subr.bf16.mxu1 %v4883_v4 }
  0x79   :  { %4322 = vmatprep.subr.bf16.mxu0 %v4883_v4 }
  0x7a   :  { %418 = vadd.xlane.f32.xlu1 %v417_v25 }
  0x7b   :  { %397 = vadd.xlane.f32.xlu0 %v396_v28  ;;  %4333 = vmatpush3.bf16.msra.mxu1 %v4360_v49 }
  0x7c   :  { %4323 = vmatpush3.bf16.msra.mxu0 %v4357_v23  ;;  %4334 = vmatprep.subr.bf16.mxu1 %v4883_v4 }
  0x7e   :  { %379 = vadd.xlane.f32.xlu1 %v378_v36 }
  0x7f   :  { %358 = vadd.xlane.f32.xlu0 %v357_v37 }
  0x82   :  { %421 = vadd.xlane.f32.xlu1 %v420_v41  ;;  %v523_v41 = vadd.s32 4294967264, %v5121_v1 }
  0x83   :  { %400 = vadd.xlane.f32.xlu0 %v399_v44 }
  0x84   :  { %v5189_v48 = vsub.s32 %v523_v41, %v5123_v2 }
  0x86   :  { %403 = vadd.xlane.f32.xlu1 %v402_v52 }
  0x87   :  { %382 = vadd.xlane.f32.xlu0 %v381_v53 }
  0x8a   :  { %406 = vadd.xlane.f32.xlu1 %v405_v56  ;;  %v4361_v56 = vld [vmem:[%s5744_s2 + $0x20] sm:$0xff]  }
  0x8b   :  { %424 = vadd.xlane.f32.xlu0 %v423_v58  ;;  %4335 = vmatpush3.bf16.msra.mxu1 %v4361_v56 }
  0x8c   :  { %4336 = vmatprep.subr.bf16.mxu1 %v4883_v4 }
  0x8e   :  { %430 = vadd.xlane.f32.xlu1 %v429_v63  ;;  %v530_v63 = vadd.s32 4294967256, %v5121_v1 }
  0x8f   :  { %427 = vadd.xlane.f32.xlu0 %v426_v62  ;;  %4337 = vmatpush3.bf16.msra.mxu1 %v4362_v0 }
  0x90   :  { %v5216_v11 = vsub.s32 %v530_v63, %v5123_v2  ;;  %4338 = vmatprep.subr.bf16.mxu1 %v4883_v4 }
  0x9b   :  { %v266_v8 = vpop.xlane.xlu1 %265 }
  0x9c   :  { %v242_v9 = vpop.xlane.xlu0 %241  ;;  %v554_v12 = vrot.slane %v266_v8, %v5136_v7 }
  0x9d   :  { %v501_v18 = vrot.slane %v242_v9, %v5136_v7 }
  0x9f   :  { %v269_v13 = vpop.xlane.xlu1 %268 }
  0xa0   :  { %v245_v14 = vpop.xlane.xlu0 %244  ;;  %v558_v19 = vrot.slane %v269_v13, %v5139_v10 }
  0xa1   :  { %v506_v20 = vrot.slane %v245_v14, %v5139_v10 }
  0xa2   :  { %v559_v21 = vsel %vm507_vm1, %v558_v19, %v554_v12  ;;  %v4363_v12 = vld [vmem:[%s5744_s2 + $0x10] sm:$0xff]  }
  0xa3   :  { %v508_v22 = vsel %vm507_vm1, %v506_v20, %v501_v18  ;;  %v272_v24 = vpop.xlane.xlu1 %271  ;;  %4339 = vmatpush3.bf16.msra.mxu1 %v4363_v12  ;;  %v4364_v20 = vld [vmem:[%s5744_s2 + $0x8] sm:$0xff]  }
  0xa4   :  { %v248_v25 = vpop.xlane.xlu0 %247  ;;  %v563_v26 = vrot.slane %v272_v24, %v5147_v15  ;;  %4340 = vmatprep.subr.bf16.mxu1 %v4883_v4 }
  0xa5   :  { %v513_v27 = vrot.slane %v248_v25, %v5147_v15 }
  0xa6   :  { %v564_v28 = vsel %vm514_vm2, %v563_v26, %v559_v21 }
  0xa7   :  { %v515_v29 = vsel %vm514_vm2, %v513_v27, %v508_v22  ;;  %v293_v30 = vpop.xlane.xlu1 %292  ;;  %4341 = vmatpush3.bf16.msra.mxu1 %v4364_v20 }
  0xa8   :  { %v290_v31 = vpop.xlane.xlu0 %289  ;;  %v597_v32 = vrot.slane %v293_v30, %v5139_v10  ;;  %4342 = vmatprep.subr.bf16.mxu1 %v4883_v4 }
  0xa9   :  { %v593_v33 = vrot.slane %v290_v31, %v5136_v7 }
  0xab   :  { %v598_v35 = vsel %vm507_vm1, %v597_v32, %v593_v33  ;;  %v275_v36 = vpop.xlane.xlu1 %274  ;;  %v537_v33 = vadd.s32 4294967248, %v5121_v1 }
  0xac   :  { %v251_v37 = vpop.xlane.xlu0 %250  ;;  %v568_v39 = vrot.slane %v275_v36, %v5172_v34 }
  0xad   :  { %v520_v40 = vrot.slane %v251_v37, %v5172_v34  ;;  %v5247_v4 = vsub.s32 %v537_v33, %v5123_v2 }
  0xae   :  { %v569_v43 = vsel %vm521_vm4, %v568_v39, %v564_v28 }
  0xaf   :  { %v522_v44 = vsel %vm521_vm4, %v520_v40, %v515_v29  ;;  %v314_v45 = vpop.xlane.xlu1 %313 }
  0xb0   :  { %v296_v46 = vpop.xlane.xlu0 %295  ;;  %v632_v53 = vrot.slane %v314_v45, %v5136_v7 }
  0xb1   :  { %v602_v47 = vrot.slane %v296_v46, %v5147_v15 }
  0xb3   :  { %v603_v50 = vsel %vm514_vm2, %v602_v47, %v598_v35  ;;  %v254_v51 = vpop.xlane.xlu1 %253 }
  0xb4   :  { %v317_v52 = vpop.xlane.xlu0 %316  ;;  %v527_v54 = vrot.slane %v254_v51, %v5189_v48 }
  0xb5   :  { %v636_v55 = vrot.slane %v317_v52, %v5139_v10 }
  0xb6   :  { %v529_v57 = vsel %vm528_vm5, %v527_v54, %v522_v44 }
  0xb7   :  { %v637_v58 = vsel %vm507_vm1, %v636_v55, %v632_v53  ;;  %v299_v59 = vpop.xlane.xlu1 %298  ;;  %v544_v53 = vadd.s32 4294967240, %v5121_v1 }
  0xb8   :  { %v278_v60 = vpop.xlane.xlu0 %277  ;;  %v607_v61 = vrot.slane %v299_v59, %v5172_v34 }
  0xb9   :  { %v573_v62 = vrot.slane %v278_v60, %v5189_v48  ;;  %v5264_v56 = vsub.s32 %v544_v53, %v5123_v2 }
  0xba   :  { %v608_v3 = vsel %vm521_vm4, %v607_v61, %v603_v50 }
  0xbb   :  { %v574_v5 = vsel %vm528_vm5, %v573_v62, %v569_v43  ;;  %v338_v6 = vpop.xlane.xlu1 %337 }
  0xbc   :  { %v320_v8 = vpop.xlane.xlu0 %319  ;;  %v671_v17 = vrot.slane %v338_v6, %v5136_v7 }
  0xbd   :  { %v641_v9 = vrot.slane %v320_v8, %v5147_v15 }
  0xbf   :  { %v642_v13 = vsel %vm514_vm2, %v641_v9, %v637_v58  ;;  %v257_v14 = vpop.xlane.xlu1 %256 }
  0xc0   :  { %v341_v16 = vpop.xlane.xlu0 %340  ;;  %v534_v18 = vrot.slane %v257_v14, %v5216_v11 }
  0xc1   :  { %v675_v19 = vrot.slane %v341_v16, %v5139_v10 }
  0xc2   :  { %v536_v21 = vsel %vm535_vm6, %v534_v18, %v529_v57 }
  0xc3   :  { %v676_v22 = vsel %vm507_vm1, %v675_v19, %v671_v17  ;;  %v302_v23 = vpop.xlane.xlu1 %301 }
  0xc4   :  { %v281_v24 = vpop.xlane.xlu0 %280  ;;  %v612_v25 = vrot.slane %v302_v23, %v5189_v48 }
  0xc5   :  { %v578_v26 = vrot.slane %v281_v24, %v5216_v11 }
  0xc6   :  { %v613_v27 = vsel %vm528_vm5, %v612_v25, %v608_v3 }
  0xc7   :  { %v579_v28 = vsel %vm535_vm6, %v578_v26, %v574_v5  ;;  %v344_v29 = vpop.xlane.xlu1 %343 }
  0xc8   :  { %v323_v30 = vpop.xlane.xlu0 %322  ;;  %v680_v31 = vrot.slane %v344_v29, %v5147_v15 }
  0xc9   :  { %v646_v32 = vrot.slane %v323_v30, %v5172_v34 }
  0xca   :  { %v5241_v35 = vsel %vm514_vm2, %v680_v31, %v676_v22 }
  0xcb   :  { %v647_v36 = vsel %vm521_vm4, %v646_v32, %v642_v13  ;;  %v365_v37 = vpop.xlane.xlu1 %364 }
  0xcc   :  { %v362_v38 = vpop.xlane.xlu0 %361  ;;  %v714_v39 = vrot.slane %v365_v37, %v5139_v10 }
  0xcd   :  { %v710_v40 = vrot.slane %v362_v38, %v5136_v7 }
  0xcf   :  { %v5250_v41 = vsel %vm507_vm1, %v714_v39, %v710_v40  ;;  %v284_v42 = vpop.xlane.xlu1 %283 }
  0xd0   :  { %v260_v43 = vpop.xlane.xlu0 %259  ;;  %v583_v44 = vrot.slane %v284_v42, %v5247_v4 }
  0xd1   :  { %v541_v45 = vrot.slane %v260_v43, %v5247_v4 }
  0xd2   :  { %v584_v46 = vsel %vm542_vm7, %v583_v44, %v579_v28 }
  0xd3   :  { %v543_v47 = vsel %vm542_vm7, %v541_v45, %v536_v21  ;;  %v326_v49 = vpop.xlane.xlu1 %325 }
  0xd4   :  { %v305_v50 = vpop.xlane.xlu0 %304  ;;  %v651_v23 = vrot.slane %v326_v49, %v5189_v48 }
  0xd5   :  { %v617_v9 = vrot.slane %v305_v50, %v5216_v11 }
  0xd7   :  { %v5256_v51 = vpop.xlane.xlu1 %367  ;;  %v618_v16 = vsel %vm535_vm6, %v617_v9, %v613_v27  ;;  %v652_v27 = vsel %vm528_vm5, %v651_v23, %v647_v36 }
  0xd8   :  { %v347_v52 = vpop.xlane.xlu0 %346 }
  0xd9   :  { %v685_v42 = vrot.slane %v347_v52, %v5172_v34 }
  0xdb   :  { %v5259_v54 = vpop.xlane.xlu1 %388 }
  0xdc   :  { %v5261_v55 = vpop.xlane.xlu0 %385  ;;  %v753_v9 = vrot.slane %v5259_v54, %v5139_v10 }
  0xdf   :  { %v287_v57 = vpop.xlane.xlu1 %286 }
  0xe0   :  { %v263_v58 = vpop.xlane.xlu0 %262  ;;  %v588_v59 = vrot.slane %v287_v57, %v5264_v56 }
  0xe1   :  { %v548_v60 = vrot.slane %v263_v58, %v5264_v56  ;;  %v719_v58 = vrot.slane %v5256_v51, %v5147_v15  ;;  %v749_v51 = vrot.slane %v5261_v55, %v5136_v7 }
  0xe2   :  { %v589_v61 = vsel %vm549_vm8, %v588_v59, %v584_v46 }
  0xe3   :  { %v550_v62 = vsel %vm549_vm8, %v548_v60, %v543_v47  ;;  %v329_v63 = vpop.xlane.xlu1 %328  ;;  %v686_v47 = vsel %vm521_vm4, %v685_v42, %v5241_v35  ;;  %v754_v55 = vsel %vm507_vm1, %v753_v9, %v749_v51  ;;  %v4377_v9 = vld [vmem:[%s5745_s3 + $0xd4] ss:$48 sps:$4 sm:$0xff]   ;;  %v4372_v51 = vld [vmem:[%s5745_s3 + $0xc0] ss:$48 sps:$4 sm:$0xff]  }
  0xe4   :  { %v825_v1 = vsel %vm824_vm9, %v589_v61, %v550_v62  ;;  %v308_v0 = vpop.xlane.xlu0 %307  ;;  %v656_v26 = vrot.slane %v329_v63, %v5216_v11 }
  0xe5   :  { %v622_v12 = vrot.slane %v308_v0, %v5247_v4 }
  0xe6   :  { %v657_v31 = vsel %vm535_vm6, %v656_v26, %v652_v27 }
  0xe7   :  { %v371_v3 = vpop.xlane.xlu1 %370  ;;  %v623_v18 = vsel %vm542_vm7, %v622_v12, %v618_v16 }
  0xe8   :  { %v350_v5 = vpop.xlane.xlu0 %349  ;;  %v724_v60 = vrot.slane %v371_v3, %v5172_v34 }
  0xe9   :  { %v690_v43 = vrot.slane %v350_v5, %v5189_v48  ;;  %v720_v5 = vsel %vm514_vm2, %v719_v58, %v5250_v41 }
  0xea   :  { %v725_v12 = vsel %vm521_vm4, %v724_v60, %v720_v5  ;;  %v4374_v5 = vld [vmem:[%s5745_s3 + $0xc4] ss:$48 sps:$4 sm:$0xff]  }
  0xeb   :  { %v5270_v6 = vpop.xlane.xlu1 %409  ;;  %v691_v49 = vsel %vm528_vm5, %v690_v43, %v686_v47 }
  0xec   :  { %v5272_v8 = vpop.xlane.xlu0 %391 }
  0xef   :  { %v311_v13 = vpop.xlane.xlu1 %310 }
  0xf0   :  { %v5276_v14 = vpop.xlane.xlu0 %412  ;;  %v627_v17 = vrot.slane %v311_v13, %v5264_v56  ;;  %v758_v13 = vrot.slane %v5272_v8, %v5147_v15 }
  0xf2   :  { %v628_v19 = vsel %vm549_vm8, %v627_v17, %v623_v18  ;;  %v759_v26 = vsel %vm514_vm2, %v758_v13, %v754_v55  ;;  %v4383_v13 = vld [vmem:[%s5745_s3 + $0x74] ss:$48 sps:$4 sm:$0xff]   ;;  %v4387_v55 = vld [vmem:[%s5745_s3 + $0x10] ss:$48 sps:$4 sm:$0xff]  }
  0xf3   :  { %v827_v20 = vsel %vm826_vm10, %v628_v19, %v825_v1  ;;  %v353_v21 = vpop.xlane.xlu1 %352 }
  0xf4   :  { %v332_v22 = vpop.xlane.xlu0 %331  ;;  %v695_v45 = vrot.slane %v353_v21, %v5216_v11 }
  0xf5   :  { %v661_v28 = vrot.slane %v332_v22, %v5247_v4  ;;  %v788_v22 = vrot.slane %v5270_v6, %v5136_v7 }
  0xf6   :  { %v696_v57 = vsel %vm535_vm6, %v695_v45, %v691_v49  ;;  %v47_v45 = vld [vmem:[#allocation2] sm:$0xff] }
  0xf7   :  { %v5283_v24 = vpop.xlane.xlu1 %394  ;;  %v662_v33 = vsel %vm542_vm7, %v661_v28, %v657_v31 }
  0xf8   :  { %v374_v25 = vpop.xlane.xlu0 %373  ;;  %v763_v41 = vrot.slane %v5283_v24, %v5172_v34 }
  0xf9   :  { %v729_v35 = vrot.slane %v374_v25, %v5189_v48 }
  0xfa   :  { %v764_v31 = vsel %vm521_vm4, %v763_v41, %v759_v26  ;;  %v4386_v41 = vld [vmem:[%s5745_s3 + $0x4] ss:$48 sps:$4 sm:$0xff]  }
  0xfb   :  { %v335_v29 = vpop.xlane.xlu1 %334  ;;  %v730_v16 = vsel %vm528_vm5, %v729_v35, %v725_v12  ;;  %v4380_v12 = vld [vmem:[%s5745_s3 + $0x64] ss:$48 sps:$4 sm:$0xff]  }
  0xfc   :  { %v5288_v30 = vpop.xlane.xlu0 %415  ;;  %v666_v32 = vrot.slane %v335_v29, %v5264_v56 }
  0xfd   :  { %v797_v23 = vrot.slane %v5288_v30, %v5147_v15 }
  0xfe   :  { %v667_v37 = vsel %vm549_vm8, %v666_v32, %v662_v33 }
  0xff   :  { %v829_v38 = vsel %vm828_vm11, %v667_v37, %v827_v20  ;;  %v377_v39 = vpop.xlane.xlu1 %376  ;;  %v792_v20 = vrot.slane %v5276_v14, %v5139_v10 }
 0x100   :  { %v356_v40 = vpop.xlane.xlu0 %355  ;;  %v734_v0 = vrot.slane %v377_v39, %v5216_v11 }
 0x101   :  { %v700_v46 = vrot.slane %v356_v40, %v5247_v4  ;;  %v793_v15 = vsel %vm507_vm1, %v792_v20, %v788_v22  ;;  %v4392_v20 = vld [vmem:[%s5745_s3 + $0x12c] ss:$48 sps:$4 sm:$0xff]  }
 0x102   :  { %v735_v19 = vsel %vm535_vm6, %v734_v0, %v730_v16  ;;  %v798_v33 = vsel %vm514_vm2, %v797_v23, %v793_v15  ;;  %v4369_v0 = vld [vmem:[%s5745_s3 + $0x130] ss:$48 sps:$4 sm:$0xff]   ;;  %v4885_v16 = vmov 0   ;;  %v4396_v15 = vld [vmem:[%s5745_s3 + $0xc8] ss:$48 sps:$4 sm:$0xff]  }
 0x103   :  { %v419_v36 = vpop.xlane.xlu1 %418  ;;  %v701_v59 = vsel %vm542_vm7, %v700_v46, %v696_v57 }
 0x104   :  { %v398_v44 = vpop.xlane.xlu0 %397  ;;  %v802_v28 = vrot.slane %v419_v36, %v5172_v34 }
 0x105   :  { %v768_v21 = vrot.slane %v398_v44, %v5189_v48 }
 0x106   :  { %v803_v37 = vsel %vm521_vm4, %v802_v28, %v798_v33  ;;  %v4407_v33 = vld [vmem:[%s5745_s3 + $0x84] ss:$48 sps:$4 sm:$0xff]  }
 0x107   :  { %v380_v50 = vpop.xlane.xlu1 %379  ;;  %v769_v30 = vsel %vm528_vm5, %v768_v21, %v764_v31  ;;  %v4395_v21 = vld [vmem:[%s5745_s3 + $0x144] ss:$48 sps:$4 sm:$0xff]  }
 0x108   :  { %v359_v53 = vpop.xlane.xlu0 %358  ;;  %v739_v3 = vrot.slane %v380_v50, %v5247_v4 }
 0x109   :  { %v705_v52 = vrot.slane %v359_v53, %v5264_v56 }
 0x10a   :  { %v740_v8 = vsel %vm542_vm7, %v739_v3, %v735_v19  ;;  %v4375_v3 = vld [vmem:[%s5745_s3 + $0xd0] ss:$48 sps:$4 sm:$0xff]   ;;  %v4389_v19 = vld [vmem:[%s5745_s3 + $0x14] ss:$48 sps:$4 sm:$0xff]  }
 0x10b   :  { %v706_v61 = vsel %vm549_vm8, %v705_v52, %v701_v59  ;;  %v422_v1 = vpop.xlane.xlu1 %421 }
 0x10c   :  { %v831_v62 = vsel %vm830_vm12, %v706_v61, %v829_v38  ;;  %v401_v63 = vpop.xlane.xlu0 %400  ;;  %v807_v7 = vrot.slane %v422_v1, %v5189_v48  ;;  %v4371_v1 = vld [vmem:[%s5745_s3 + $0x134] ss:$48 sps:$4 sm:$0xff]  }
 0x10d   :  { %v773_v24 = vrot.slane %v401_v63, %v5216_v11  ;;  %v4366_v63 = vld [vmem:[%s5745_s3 + $0x120] ss:$48 sps:$4 sm:$0xff]  }
 0x10e   :  { %v808_v48 = vsel %vm528_vm5, %v807_v7, %v803_v37  ;;  %v4398_v7 = vld [vmem:[%s5745_s3 + $0xcc] ss:$48 sps:$4 sm:$0xff]   ;;  %v4405_v37 = vld [vmem:[%s5745_s3 + $0x80] ss:$48 sps:$4 sm:$0xff]  }
 0x10f   :  { %v404_v17 = vpop.xlane.xlu1 %403  ;;  %v774_v34 = vsel %vm535_vm6, %v773_v24, %v769_v30  ;;  %v4399_v30 = vld [vmem:[%s5745_s3 + $0xe0] ss:$48 sps:$4 sm:$0xff]  }
 0x110   :  { %v383_v18 = vpop.xlane.xlu0 %382  ;;  %v778_v10 = vrot.slane %v404_v17, %v5247_v4  ;;  %v4378_v17 = vld [vmem:[%s5745_s3 + $0x60] ss:$48 sps:$4 sm:$0xff]  }
 0x111   :  { %v744_v54 = vrot.slane %v383_v18, %v5264_v56  ;;  %v4381_v18 = vld [vmem:[%s5745_s3 + $0x70] ss:$48 sps:$4 sm:$0xff]  }
 0x112   :  { %v779_v38 = vsel %vm542_vm7, %v778_v10, %v774_v34  ;;  %v4402_v34 = vld [vmem:[%s5745_s3 + $0x68] ss:$48 sps:$4 sm:$0xff]  }
 0x113   :  { %v745_v25 = vsel %vm549_vm8, %v744_v54, %v740_v8  ;;  %v407_v27 = vpop.xlane.xlu1 %406  ;;  %v4384_v54 = vld [vmem:[%s5745_s3] ss:$48 sps:$4 sm:$0xff]  }
 0x114   :  { %v833_v14 = vsel %vm832_vm13, %v745_v25, %v831_v62  ;;  %v425_v29 = vpop.xlane.xlu0 %424  ;;  %v783_v6 = vrot.slane %v407_v27, %v5264_v56  ;;  %v4368_v62 = vld [vmem:[%s5745_s3 + $0x124] ss:$48 sps:$4 sm:$0xff]   ;;  %v4390_v27 = vld [vmem:[%s5745_s3 + $0x128] ss:$48 sps:$4 sm:$0xff]  }
 0x115   :  { %v812_v32 = vrot.slane %v425_v29, %v5216_v11  ;;  %1400 = vmatprep.subr.bf16.mxu0 %v4368_v62  ;;  %v4393_v29 = vld [vmem:[%s5745_s3 + $0x140] ss:$48 sps:$4 sm:$0xff]   ;;  %v4453_v62 = vld [vmem:[#allocation3 + $0x60] ss:$16 sps:$4 sm:$0xff]  }
 0x116   :  { %v784_v42 = vsel %vm549_vm8, %v783_v6, %v779_v38  ;;  %v4401_v6 = vld [vmem:[%s5745_s3 + $0xe4] ss:$48 sps:$4 sm:$0xff]   ;;  %v4410_v38 = vld [vmem:[%s5745_s3 + $0xc] ss:$48 sps:$4 sm:$0xff]  }
 0x117   :  { %v431_v40 = vpop.xlane.xlu1 %430  ;;  %v813_v11 = vsel %vm535_vm6, %v812_v32, %v808_v48  ;;  %v835_v46 = vsel %vm834_vm14, %v784_v42, %v833_v14  ;;  %v4404_v32 = vld [vmem:[%s5745_s3 + $0x6c] ss:$48 sps:$4 sm:$0xff]   ;;  %v4411_v48 = vld [vmem:[%s5745_s3 + $0x20] ss:$48 sps:$4 sm:$0xff]  }
 0x118   :  { %v428_v39 = vpop.xlane.xlu0 %427  ;;  %v822_v36 = vrot.slane %v431_v40, %v5264_v56  ;;  %v4408_v40 = vld [vmem:[%s5745_s3 + $0x8] ss:$48 sps:$4 sm:$0xff]   ;;  %v4416_v42 = vld [vmem:[%s5745_s3 + $0x13c] ss:$48 sps:$4 sm:$0xff]  }
 0x119   :  { %v817_v43 = vrot.slane %v428_v39, %v5247_v4  ;;  %v4365_v4 = vld [vmem:[%s5744_s2] sm:$0xff]  }
 0x11a   :  { %4343 = vmatpush3.bf16.msra.mxu1 %v4365_v4  ;;  %v4413_v39 = vld [vmem:[%s5745_s3 + $0x24] ss:$48 sps:$4 sm:$0xff]   ;;  %v4449_v4 = vld [vmem:[#allocation3 + $0x84] ss:$16 sps:$4 sm:$0xff]  }
 0x11b   :  { %v818_v44 = vsel %vm542_vm7, %v817_v43, %v813_v11  ;;  %1482 = vmatprep.subr.bf16.mxu1 %v4371_v1  ;;  %v4440_v43 = vld [vmem:[#allocation3 + $0xe4] ss:$16 sps:$4 sm:$0xff]  }
 0x11c   :  { %v823_v47 = vsel %vm549_vm8, %v822_v36, %v818_v44  ;;  %v4414_v36 = vld [vmem:[%s5745_s3 + $0x138] ss:$48 sps:$4 sm:$0xff]   ;;  %v4419_v11 = vld [vmem:[%s5745_s3 + $0xdc] ss:$48 sps:$4 sm:$0xff]  }
 0x11d   :  { %v837_v49 = vsel %vm836_vm15, %v823_v47, %v835_v46  ;;  %v4438_v44 = vld [vmem:[#allocation3 + $0xe0] ss:$16 sps:$4 sm:$0xff]   ;;  %v4422_v47 = vld [vmem:[%s5745_s3 + $0x7c] ss:$48 sps:$4 sm:$0xff]  }
 0x11e   :  { %v839_v50 = vadd.f32 %v837_v49, %v47_v45  ;;  %v4443_v45 = vld [vmem:[#allocation3 + $0xc4] ss:$16 sps:$4 sm:$0xff]   ;;  %v4417_v46 = vld [vmem:[%s5745_s3 + $0xd8] ss:$48 sps:$4 sm:$0xff]  }
 0x11f   :  { %v4441_v49 = vld [vmem:[#allocation3 + $0xc0] ss:$16 sps:$4 sm:$0xff]   ;;  %v4461_v1 = vld [vmem:[#allocation3 + $0x44] ss:$16 sps:$4 sm:$0xff]  }
 0x120   :  { %841 = vst.msk [vmem:[#allocation2] sm:$0xff] %vm45_vm0, %v839_v50  ;;  %v4446_v50 = vld [vmem:[#allocation3 + $0xa4] ss:$16 sps:$4 sm:$0xff]  }
 0x127   :  { %v845_v53 = vld [vmem:[#allocation2] sm:$0xff] }
 0x128   :  { %v846_v57 = vmul.f32 0.00390625, %v845_v53  ;;  %v4420_v53 = vld [vmem:[%s5745_s3 + $0x78] ss:$48 sps:$4 sm:$0xff]  }
 0x12a   :  { %v847_v52 = vpack.c.bf16 %v846_v57, %v846_v57 }
 0x12c   :  { %4325 = vmatmul.mubr.msk.bf16.vlgmr.msra.gmra.mxu0 %vm45_vm0, %v847_v52  ;;  %v4444_v52 = vld [vmem:[#allocation3 + $0xa0] ss:$16 sps:$4 sm:$0xff]  }
 0x12d   :  { %1401 = vmatpush1.bf16.msra.mxu0 %v4366_v63  ;;  %1424 = vmatprep.mubr.bf16.mxu0 %v4885_v16  ;;  %v4429_v63 = vld [vmem:[%s5745_s3 + $0xe8] ss:$48 sps:$4 sm:$0xff]  }
 0x12e   :  { %1402 = vmatprep.subr.bf16.mxu0 %v4374_v5  ;;  %v4459_v5 = vld [vmem:[#allocation3 + $0x40] ss:$16 sps:$4 sm:$0xff]  }
 0x131   :  { %1403 = vmatpush1.bf16.msra.mxu0 %v4372_v51  ;;  %v4432_v51 = vld [vmem:[%s5745_s3 + $0x88] ss:$48 sps:$4 sm:$0xff]  }
 0x132   :  { %1404 = vmatprep.subr.bf16.mxu0 %v4380_v12  ;;  %v4465_v12 = vld [vmem:[#allocation3 + $0x20] ss:$16 sps:$4 sm:$0xff]  }
 0x135   :  { %1405 = vmatpush1.bf16.msra.mxu0 %v4378_v17  ;;  %v4452_v17 = vld [vmem:[#allocation3 + $0x2e4] ss:$16 sps:$4 sm:$0xff]  }
 0x136   :  { %1406 = vmatprep.subr.bf16.mxu0 %v4386_v41  ;;  %v4479_v41 = vld [vmem:[#allocation3 + $0x1e4] ss:$16 sps:$4 sm:$0xff]  }
 0x139   :  { %1407 = vmatpush1.bf16.msra.mxu0 %v4384_v54  ;;  %v4458_v54 = vld [vmem:[#allocation3 + $0x2c4] ss:$16 sps:$4 sm:$0xff]  }
 0x13a   :  { %1441 = vmatprep.subr.bf16.mxu0 %v4392_v20  ;;  %v4485_v20 = vld [vmem:[#allocation3 + $0x1c4] ss:$16 sps:$4 sm:$0xff]  }
 0x1ec   :  { %v917_v56 = vpop.f32.mrf.mxu0 }
 0x1ed   :  { %v923_v58 = vmax.f32 %v917_v56, 0.0  ;;  %v4423_v56 = vld [vmem:[%s5745_s3 + $0x18] ss:$48 sps:$4 sm:$0xff]  }
 0x1ee   :  { %v4326_v59 = vpop.f32.mrf.mxu0 }
 0x1ef   :  { %v924_v60 = vpack.c.bf16 %v923_v58, %v923_v58  ;;  %v4428_v58 = vld [vmem:[%s5745_s3 + $0x14c] ss:$48 sps:$4 sm:$0xff]   ;;  %v4447_v59 = vld [vmem:[#allocation3 + $0x80] ss:$16 sps:$4 sm:$0xff]  }
 0x1f0   :  { %v920_v61 = vpop.f32.mrf.mxu0 }
 0x1f1   :  { %4345 = vmatmul.mubr.bf16.vlgmr.msra.gmra.mxu1 %v924_v60  ;;  %v4455_v60 = vld [vmem:[#allocation3 + $0x64] ss:$16 sps:$4 sm:$0xff]   ;;  %v4426_v61 = vld [vmem:[%s5745_s3 + $0x148] ss:$48 sps:$4 sm:$0xff]  }
 0x1f2   :  { %v4327_v35 = vpop.f32.mrf.mxu0  ;;  %1483 = vmatpush1.bf16.msra.mxu1 %v4369_v0  ;;  %1506 = vmatprep.mubr.bf16.mxu1 %v4885_v16  ;;  %v4434_v0 = vld [vmem:[%s5745_s3 + $0x8c] ss:$48 sps:$4 sm:$0xff]  }
 0x1f3   :  { %1484 = vmatprep.subr.bf16.mxu1 %v4377_v9  ;;  %v4431_v35 = vld [vmem:[%s5745_s3 + $0xec] ss:$48 sps:$4 sm:$0xff]  }
 0x1f4   :  { %v4467_v9 = vld [vmem:[#allocation3 + $0x24] ss:$16 sps:$4 sm:$0xff]  }
 0x1f6   :  { %1485 = vmatpush1.bf16.msra.mxu1 %v4375_v3  ;;  %v4437_v3 = vld [vmem:[%s5745_s3 + $0x2c] ss:$48 sps:$4 sm:$0xff]  }
 0x1f7   :  { %1486 = vmatprep.subr.bf16.mxu1 %v4383_v13  ;;  %v4473_v13 = vld [vmem:[#allocation3 + $0x4] ss:$16 sps:$4 sm:$0xff]  }
 0x1fa   :  { %1487 = vmatpush1.bf16.msra.mxu1 %v4381_v18  ;;  %v4471_v18 = vld [vmem:[#allocation3] ss:$16 sps:$4 sm:$0xff]  }
 0x1fb   :  { %1488 = vmatprep.subr.bf16.mxu1 %v4389_v19  ;;  %v4450_v19 = vld [vmem:[#allocation3 + $0x2e0] ss:$16 sps:$4 sm:$0xff]  }
 0x1fe   :  { %1489 = vmatpush1.bf16.msra.mxu1 %v4387_v55  ;;  %v4477_v55 = vld [vmem:[#allocation3 + $0x1e0] ss:$16 sps:$4 sm:$0xff]  }
 0x1ff   :  { %1564 = vmatprep.subr.bf16.mxu1 %v4395_v21  ;;  %v4456_v21 = vld [vmem:[#allocation3 + $0x2c0] ss:$16 sps:$4 sm:$0xff]  }
 0x2b1   :  { %v1023_v8 = vpop.f32.mrf.mxu1 }
 0x2b2   :  { %v3914_v22 = vmul.f32 -1.442695, %v1023_v8  ;;  %v4464_v8 = vld [vmem:[#allocation3 + $0x2a4] ss:$16 sps:$4 sm:$0xff]  }
 0x2b3   :  { %v4346_v23 = vpop.f32.mrf.mxu1 }
 0x2b4   :  { %4854 = vpow2.f32 %v3914_v22  ;;  %v4483_v22 = vld [vmem:[#allocation3 + $0x1c0] ss:$16 sps:$4 sm:$0xff]   ;;  %v4491_v23 = vld [vmem:[#allocation3 + $0x1a4] ss:$16 sps:$4 sm:$0xff]  }
 0x2b5   :  { %v1026_v24 = vpop.f32.mrf.mxu1 }
 0x2b6   :  { %v4462_v24 = vld [vmem:[#allocation3 + $0x2a0] ss:$16 sps:$4 sm:$0xff]  }
 0x2b7   :  { %v4347_v25 = vpop.f32.mrf.mxu1 }
 0x2b8   :  { %v4470_v25 = vld [vmem:[#allocation3 + $0x284] ss:$16 sps:$4 sm:$0xff]  }
 0x2c1   :  { %v4855_v26 = vpop.eup %4854 }
 0x2c2   :  { %v1032_v28 = vadd.f32 1.0, %v4855_v26  ;;  %v4489_v26 = vld [vmem:[#allocation3 + $0x1a0] ss:$16 sps:$4 sm:$0xff]  }
 0x2c4   :  { %4856 = vrcp.f32 %v1032_v28  ;;  %v4497_v28 = vld [vmem:[#allocation3 + $0x184] ss:$16 sps:$4 sm:$0xff]  }
 0x2d1   :  { %v4857_v10 = vpop.eup %4856 }
 0x2d2   :  { %v1035_v14 = vmul.f32 %v4857_v10, %v846_v57  ;;  %v4425_v57 = vld [vmem:[%s5745_s3 + $0x1c] ss:$48 sps:$4 sm:$0xff]   ;;  %v4468_v10 = vld [vmem:[#allocation3 + $0x280] ss:$16 sps:$4 sm:$0xff]  }
 0x2d4   :  { %v5423_v31 = vpack.c.bf16 %v1035_v14, %v1035_v14  ;;  %v4476_v14 = vld [vmem:[#allocation3 + $0x264] ss:$16 sps:$4 sm:$0xff]  }
 0x2d6   :  { %3963 = vmatmul.mubr.msk.bf16.vlgmr.msra.gmra.mxu0 %vm45_vm0, %v5423_v31  ;;  %3965 = vmatmul.mubr.msk.bf16.vlgmr.msra.gmra.mxu1 %vm45_vm0, %v5423_v31 }
 0x2d7   :  { %1442 = vmatpush1.bf16.msra.mxu0 %v4390_v27  ;;  %1565 = vmatpush1.bf16.msra.mxu1 %v4393_v29  ;;  %v4495_v27 = vld [vmem:[#allocation3 + $0x180] ss:$16 sps:$4 sm:$0xff]   ;;  %v4503_v29 = vld [vmem:[#allocation3 + $0x164] ss:$16 sps:$4 sm:$0xff]  }
 0x2d8   :  { %1443 = vmatprep.subr.bf16.mxu0 %v4398_v7  ;;  %1566 = vmatprep.subr.bf16.mxu1 %v4401_v6  ;;  %v4482_v7 = vld [vmem:[#allocation3 + $0x244] ss:$16 sps:$4 sm:$0xff]   ;;  %v4501_v6 = vld [vmem:[#allocation3 + $0x160] ss:$16 sps:$4 sm:$0xff]  }
 0x2d9   :  { %1465 = vmatprep.mubr.bf16.mxu0 %v4885_v16  ;;  %1588 = vmatprep.mubr.bf16.mxu1 %v4885_v16 }
 0x2db   :  { %1444 = vmatpush1.bf16.msra.mxu0 %v4396_v15  ;;  %1567 = vmatpush1.bf16.msra.mxu1 %v4399_v30  ;;  %v4509_v15 = vld [vmem:[#allocation3 + $0x144] ss:$16 sps:$4 sm:$0xff]   ;;  %v4480_v30 = vld [vmem:[#allocation3 + $0x240] ss:$16 sps:$4 sm:$0xff]  }
 0x2dc   :  { %1445 = vmatprep.subr.bf16.mxu0 %v4404_v32  ;;  %1568 = vmatprep.subr.bf16.mxu1 %v4407_v33  ;;  %v4488_v32 = vld [vmem:[#allocation3 + $0x224] ss:$16 sps:$4 sm:$0xff]   ;;  %v4507_v33 = vld [vmem:[#allocation3 + $0x140] ss:$16 sps:$4 sm:$0xff]  }
 0x2df   :  { %1446 = vmatpush1.bf16.msra.mxu0 %v4402_v34  ;;  %1569 = vmatpush1.bf16.msra.mxu1 %v4405_v37  ;;  %v4515_v34 = vld [vmem:[#allocation3 + $0x124] ss:$16 sps:$4 sm:$0xff]   ;;  %v4486_v37 = vld [vmem:[#allocation3 + $0x220] ss:$16 sps:$4 sm:$0xff]  }
 0x2e0   :  { %1447 = vmatprep.subr.bf16.mxu0 %v4410_v38  ;;  %1570 = vmatprep.subr.bf16.mxu1 %v4413_v39  ;;  %v4494_v38 = vld [vmem:[#allocation3 + $0x204] ss:$16 sps:$4 sm:$0xff]   ;;  %v4513_v39 = vld [vmem:[#allocation3 + $0x120] ss:$16 sps:$4 sm:$0xff]  }
 0x2e3   :  { %1448 = vmatpush1.bf16.msra.mxu0 %v4408_v40  ;;  %1571 = vmatpush1.bf16.msra.mxu1 %v4411_v48  ;;  %v4521_v40 = vld [vmem:[#allocation3 + $0x104] ss:$16 sps:$4 sm:$0xff]   ;;  %v4492_v48 = vld [vmem:[#allocation3 + $0x200] ss:$16 sps:$4 sm:$0xff]  }
 0x2e4   :  { %1523 = vmatprep.subr.bf16.mxu0 %v4416_v42  ;;  %3212 = vmatprep.subr.bf16.mxu1 %v4440_v43  ;;  %v4500_v42 = vld [vmem:[#allocation3 + $0x3e4] ss:$16 sps:$4 sm:$0xff]   ;;  %v4519_v43 = vld [vmem:[#allocation3 + $0x100] ss:$16 sps:$4 sm:$0xff]  }
 0x2e6   :  { %3964 = vmatmul.mubr.msk.bf16.vlgmr.msra.gmra.mxu0 %vm45_vm0, %v5423_v31  ;;  %3967 = vmatmul.mubr.msk.bf16.vlgmr.msra.gmra.mxu1 %vm45_vm0, %v5423_v31 }
 0x2e7   :  { %1524 = vmatpush1.bf16.msra.mxu0 %v4414_v36  ;;  %1547 = vmatprep.mubr.bf16.mxu0 %v4885_v16  ;;  %v4527_v36 = vld [vmem:[#allocation3 + $0x4e4] ss:$16 sps:$4 sm:$0xff]  }
 0x2e8   :  { %1525 = vmatprep.subr.bf16.mxu0 %v4419_v11  ;;  %3213 = vmatpush1.bf16.msra.mxu1 %v4438_v44  ;;  %v4498_v11 = vld [vmem:[#allocation3 + $0x3e0] ss:$16 sps:$4 sm:$0xff]   ;;  %v4506_v44 = vld [vmem:[#allocation3 + $0x3c4] ss:$16 sps:$4 sm:$0xff]  }
 0x2e9   :  { %3214 = vmatprep.subr.bf16.mxu1 %v4443_v45  ;;  %v4504_v45 = vld [vmem:[#allocation3 + $0x3c0] ss:$16 sps:$4 sm:$0xff]  }
 0x2eb   :  { %1526 = vmatpush1.bf16.msra.mxu0 %v4417_v46  ;;  %v4512_v46 = vld [vmem:[#allocation3 + $0x3a4] ss:$16 sps:$4 sm:$0xff]  }
 0x2ec   :  { %1527 = vmatprep.subr.bf16.mxu0 %v4422_v47  ;;  %3215 = vmatpush1.bf16.msra.mxu1 %v4441_v49  ;;  %v4510_v47 = vld [vmem:[#allocation3 + $0x3a0] ss:$16 sps:$4 sm:$0xff]   ;;  %v4518_v49 = vld [vmem:[#allocation3 + $0x384] ss:$16 sps:$4 sm:$0xff]  }
 0x2ed   :  { %3216 = vmatprep.subr.bf16.mxu1 %v4446_v50  ;;  %v4516_v50 = vld [vmem:[#allocation3 + $0x380] ss:$16 sps:$4 sm:$0xff]  }
 0x2ef   :  { %1528 = vmatpush1.bf16.msra.mxu0 %v4420_v53  ;;  %v4524_v53 = vld [vmem:[#allocation3 + $0x364] ss:$16 sps:$4 sm:$0xff]  }
 0x2f0   :  { %1529 = vmatprep.subr.bf16.mxu0 %v4425_v57  ;;  %3217 = vmatpush1.bf16.msra.mxu1 %v4444_v52  ;;  %v4522_v57 = vld [vmem:[#allocation3 + $0x360] ss:$16 sps:$4 sm:$0xff]   ;;  %v4530_v52 = vld [vmem:[#allocation3 + $0x344] ss:$16 sps:$4 sm:$0xff]  }
 0x2f1   :  { %3218 = vmatprep.subr.bf16.mxu1 %v4449_v4  ;;  %v4528_v4 = vld [vmem:[#allocation3 + $0x340] ss:$16 sps:$4 sm:$0xff]  }
 0x2f3   :  { %1530 = vmatpush1.bf16.msra.mxu0 %v4423_v56  ;;  %v4536_v56 = vld [vmem:[#allocation3 + $0x324] ss:$16 sps:$4 sm:$0xff]  }
 0x2f4   :  { %1605 = vmatprep.subr.bf16.mxu0 %v4428_v58  ;;  %3219 = vmatpush1.bf16.msra.mxu1 %v4447_v59  ;;  %v4534_v58 = vld [vmem:[#allocation3 + $0x320] ss:$16 sps:$4 sm:$0xff]   ;;  %v4542_v59 = vld [vmem:[#allocation3 + $0x304] ss:$16 sps:$4 sm:$0xff]  }
 0x2f5   :  { %3220 = vmatprep.subr.bf16.mxu1 %v4455_v60  ;;  %v4540_v60 = vld [vmem:[#allocation3 + $0x300] ss:$16 sps:$4 sm:$0xff]  }
 0x2f6   :  { %3966 = vmatmul.mubr.msk.bf16.vlgmr.msra.gmra.mxu0 %vm45_vm0, %v5423_v31 }
 0x2f7   :  { %1606 = vmatpush1.bf16.msra.mxu0 %v4426_v61  ;;  %1629 = vmatprep.mubr.bf16.mxu0 %v4885_v16  ;;  %v4435_v16 = vld [vmem:[%s5745_s3 + $0x28] ss:$48 sps:$4 sm:$0xff]   ;;  %v4548_v61 = vld [vmem:[#allocation3 + $0x6e4] ss:$16 sps:$4 sm:$0xff]  }
 0x2f8   :  { %1607 = vmatprep.subr.bf16.mxu0 %v4431_v35  ;;  %3221 = vmatpush1.bf16.msra.mxu1 %v4453_v62  ;;  %v5526_v35 = vsub.s32 0, %v5123_v2  ;;  %v5531_v62 = vld [vmem:[%s5748_s6] sm:$0xff] }
 0x2f9   :  { %3222 = vmatprep.subr.bf16.mxu1 %v4461_v1  ;;  %v5534_v1 = vsub.s32 1, %v5123_v2 }
 0x2fb   :  { %1608 = vmatpush1.bf16.msra.mxu0 %v4429_v63  ;;  %v1111_v63 = vsub.s32 5, %v5123_v2 }
 0x2fc   :  { %1609 = vmatprep.subr.bf16.mxu0 %v4434_v0  ;;  %3223 = vmatpush1.bf16.msra.mxu1 %v4459_v5  ;;  %v1092_v0 = vrot.slane %v5531_v62, %v5526_v35  ;;  %v1096_v5 = vrot.slane %v5531_v62, %v5534_v1 }
 0x2fd   :  { %3224 = vmatprep.subr.bf16.mxu1 %v4467_v9  ;;  %v1112_v9 = vrot.slane %v5531_v62, %v1111_v63  ;;  %v4566_v63 = vld [vmem:[#allocation3 + $0x684] ss:$16 sps:$4 sm:$0xff]  }
 0x2ff   :  { %1610 = vmatpush1.bf16.msra.mxu0 %v4432_v51 }
 0x300   :  { %1611 = vmatprep.subr.bf16.mxu0 %v4437_v3  ;;  %3225 = vmatpush1.bf16.msra.mxu1 %v4465_v12 }
 0x301   :  { %3226 = vmatprep.subr.bf16.mxu1 %v4473_v13 }
 0x303   :  { %1612 = vmatpush1.bf16.msra.mxu0 %v4435_v16 }
 0x304   :  { %3253 = vmatprep.subr.bf16.mxu0 %v4452_v17  ;;  %3227 = vmatpush1.bf16.msra.mxu1 %v4471_v18 }
 0x305   :  { %3228 = vmatprep.subr.bf16.mxu1 %v4479_v41 }
 0x306   :  { %3968 = vmatmul.mubr.msk.bf16.vlgmr.msra.gmra.mxu0 %vm45_vm0, %v5423_v31  ;;  %v4474_v31 = vld [vmem:[#allocation3 + $0x260] ss:$16 sps:$4 sm:$0xff]  }
 0x307   :  { %3254 = vmatpush1.bf16.msra.mxu0 %v4450_v19 }
 0x308   :  { %3255 = vmatprep.subr.bf16.mxu0 %v4458_v54  ;;  %3229 = vmatpush2.bf16.msra.mxu1 %v4477_v55 }
 0x309   :  { %3230 = vmatprep.subr.bf16.mxu1 %v4485_v20 }
 0x30b   :  { %3256 = vmatpush1.bf16.msra.mxu0 %v4456_v21 }
 0x30c   :  { %3257 = vmatprep.subr.bf16.mxu0 %v4464_v8  ;;  %3231 = vmatpush2.bf16.msra.mxu1 %v4483_v22 }
 0x30d   :  { %3232 = vmatprep.subr.bf16.mxu1 %v4491_v23  ;;  %v4525_v23 = vld [vmem:[#allocation3 + $0x4e0] ss:$16 sps:$4 sm:$0xff]  }
 0x30f   :  { %3258 = vmatpush1.bf16.msra.mxu0 %v4462_v24 }
 0x310   :  { %3259 = vmatprep.subr.bf16.mxu0 %v4470_v25  ;;  %3233 = vmatpush2.bf16.msra.mxu1 %v4489_v26  ;;  %v4533_v25 = vld [vmem:[#allocation3 + $0x4c4] ss:$16 sps:$4 sm:$0xff]  }
 0x311   :  { %3234 = vmatprep.subr.bf16.mxu1 %v4497_v28  ;;  %v5552_v28 = vsub.s32 2, %v5123_v2 }
 0x313   :  { %3260 = vmatpush1.bf16.msra.mxu0 %v4468_v10  ;;  %v4531_v10 = vld [vmem:[#allocation3 + $0x4c0] ss:$16 sps:$4 sm:$0xff]  }
 0x314   :  { %3261 = vmatprep.subr.bf16.mxu0 %v4476_v14  ;;  %3235 = vmatpush2.bf16.msra.mxu1 %v4495_v27  ;;  %v5557_v14 = vsub.s32 3, %v5123_v2  ;;  %v4539_v27 = vld [vmem:[#allocation3 + $0x4a4] ss:$16 sps:$4 sm:$0xff]  }
 0x315   :  { %3236 = vmatprep.subr.bf16.mxu1 %v4503_v29  ;;  %v1100_v29 = vrot.slane %v5531_v62, %v5552_v28 }
 0x317   :  { %3262 = vmatpush1.bf16.msra.mxu0 %v4474_v31  ;;  %v1104_v31 = vrot.slane %v5531_v62, %v5557_v14 }
 0x318   :  { %3263 = vmatprep.subr.bf16.mxu0 %v4482_v7  ;;  %3237 = vmatpush2.bf16.msra.mxu1 %v4501_v6  ;;  %v4537_v7 = vld [vmem:[#allocation3 + $0x4a0] ss:$16 sps:$4 sm:$0xff]  }
 0x319   :  { %3238 = vmatprep.subr.bf16.mxu1 %v4509_v15 }
 0x31b   :  { %3264 = vmatpush1.bf16.msra.mxu0 %v4480_v30  ;;  %v4545_v30 = vld [vmem:[#allocation3 + $0x484] ss:$16 sps:$4 sm:$0xff]  }
 0x31c   :  { %3265 = vmatprep.subr.bf16.mxu0 %v4488_v32  ;;  %3239 = vmatpush2.bf16.msra.mxu1 %v4507_v33 }
 0x31d   :  { %3240 = vmatprep.subr.bf16.mxu1 %v4515_v34 }
 0x31f   :  { %3266 = vmatpush1.bf16.msra.mxu0 %v4486_v37 }
 0x320   :  { %3267 = vmatprep.subr.bf16.mxu0 %v4494_v38  ;;  %3241 = vmatpush2.bf16.msra.mxu1 %v4513_v39  ;;  %v4543_v38 = vld [vmem:[#allocation3 + $0x480] ss:$16 sps:$4 sm:$0xff]  }
 0x321   :  { %3242 = vmatprep.subr.bf16.mxu1 %v4521_v40 }
 0x323   :  { %3268 = vmatpush1.bf16.msra.mxu0 %v4492_v48 }
 0x324   :  { %3269 = vmatprep.subr.bf16.mxu0 %v4500_v42  ;;  %3243 = vmatpush2.bf16.msra.mxu1 %v4519_v43  ;;  %v4551_v42 = vld [vmem:[#allocation3 + $0x464] ss:$16 sps:$4 sm:$0xff]  }
 0x325   :  { %3294 = vmatprep.subr.bf16.mxu1 %v4527_v36 }
 0x327   :  { %3270 = vmatpush2.bf16.msra.mxu0 %v4498_v11 }
 0x328   :  { %3271 = vmatprep.subr.bf16.mxu0 %v4506_v44 }
 0x32b   :  { %3272 = vmatpush2.bf16.msra.mxu0 %v4504_v45  ;;  %v4546_v45 = vld [vmem:[#allocation3 + $0x6e0] ss:$16 sps:$4 sm:$0xff]  }
 0x32c   :  { %3273 = vmatprep.subr.bf16.mxu0 %v4512_v46  ;;  %v4549_v46 = vld [vmem:[#allocation3 + $0x460] ss:$16 sps:$4 sm:$0xff]  }
 0x32f   :  { %3274 = vmatpush2.bf16.msra.mxu0 %v4510_v47 }
 0x330   :  { %3275 = vmatprep.subr.bf16.mxu0 %v4518_v49  ;;  %v4554_v49 = vld [vmem:[#allocation3 + $0x6c4] ss:$16 sps:$4 sm:$0xff]  }
 0x333   :  { %3276 = vmatpush2.bf16.msra.mxu0 %v4516_v50  ;;  %v4557_v50 = vld [vmem:[#allocation3 + $0x444] ss:$16 sps:$4 sm:$0xff]  }
 0x334   :  { %3277 = vmatprep.subr.bf16.mxu0 %v4524_v53  ;;  %v4552_v53 = vld [vmem:[#allocation3 + $0x6c0] ss:$16 sps:$4 sm:$0xff]  }
 0x337   :  { %3278 = vmatpush2.bf16.msra.mxu0 %v4522_v57  ;;  %v4555_v57 = vld [vmem:[#allocation3 + $0x440] ss:$16 sps:$4 sm:$0xff]  }
 0x338   :  { %3279 = vmatprep.subr.bf16.mxu0 %v4530_v52  ;;  %v1119_v52 = vsub.s32 7, %v5123_v2 }
 0x33b   :  { %3280 = vmatpush2.bf16.msra.mxu0 %v4528_v4  ;;  %v4560_v4 = vld [vmem:[#allocation3 + $0x6a4] ss:$16 sps:$4 sm:$0xff]  }
 0x33c   :  { %3281 = vmatprep.subr.bf16.mxu0 %v4536_v56  ;;  %v4563_v56 = vld [vmem:[#allocation3 + $0x424] ss:$16 sps:$4 sm:$0xff]  }
 0x33f   :  { %3282 = vmatpush2.bf16.msra.mxu0 %v4534_v58  ;;  %v4558_v58 = vld [vmem:[#allocation3 + $0x6a0] ss:$16 sps:$4 sm:$0xff]  }
 0x340   :  { %3283 = vmatprep.subr.bf16.mxu0 %v4542_v59  ;;  %v1120_v59 = vrot.slane %v5531_v62, %v1119_v52  ;;  %v4603_v52 = vld [vmem:[#allocation3 + $0x540] ss:$16 sps:$4 sm:$0xff]  }
 0x343   :  { %3284 = vmatpush2.bf16.msra.mxu0 %v4540_v60  ;;  %v4561_v60 = vld [vmem:[#allocation3 + $0x420] ss:$16 sps:$4 sm:$0xff]  }
 0x344   :  { %3335 = vmatprep.subr.bf16.mxu0 %v4548_v61 }
 0x396   :  { %v1426_v51 = vpop.f32.mrf.mxu0  ;;  %v5542_v3 = vpop.f32.mrf.mxu1 }
 0x397   :  { %v1427_v12 = vadd.f32 %v1426_v51, %v1092_v0  ;;  %v4569_v0 = vld [vmem:[#allocation3 + $0x404] ss:$16 sps:$4 sm:$0xff]   ;;  %v4564_v51 = vld [vmem:[#allocation3 + $0x680] ss:$16 sps:$4 sm:$0xff]  }
 0x398   :  { %v1428_v13 = vpop.f32.mrf.mxu0  ;;  %v1510_v16 = vpop.f32.mrf.mxu1 }
 0x399   :  { %v1429_v17 = vadd.f32 %v1428_v13, %v1096_v5  ;;  %v1511_v18 = vadd.f32 %v1510_v16, %v1112_v9  ;;  %v1638_v41 = vmax.f32 %v1427_v12, 0.0  ;;  %v4567_v12 = vld [vmem:[#allocation3 + $0x400] ss:$16 sps:$4 sm:$0xff]   ;;  %v4572_v16 = vld [vmem:[#allocation3 + $0x664] ss:$16 sps:$4 sm:$0xff]  }
 0x39a   :  { %v1430_v19 = vpop.f32.mrf.mxu0  ;;  %v1512_v54 = vpop.f32.mrf.mxu1 }
 0x39b   :  { %v1639_v55 = vmax.f32 %v1429_v17, 0.0  ;;  %v1643_v20 = vmax.f32 %v1511_v18, 0.0  ;;  %v5546_v24 = vpack.c.bf16 %v1638_v41, %v1638_v41  ;;  %v4575_v17 = vld [vmem:[#allocation3 + $0x5e4] ss:$16 sps:$4 sm:$0xff]   ;;  %v4570_v54 = vld [vmem:[#allocation3 + $0x660] ss:$16 sps:$4 sm:$0xff]  }
 0x39c   :  { %v1431_v21 = vpop.f32.mrf.mxu0  ;;  %v1513_v8 = vpop.f32.mrf.mxu1 }
 0x39d   :  { %v5544_v22 = vpack.c.bf16 %v1639_v55, %v1639_v55  ;;  %v5548_v26 = vpack.c.bf16 %v1643_v20, %v1643_v20  ;;  %v4573_v55 = vld [vmem:[#allocation3 + $0x5e0] ss:$16 sps:$4 sm:$0xff]   ;;  %v4578_v20 = vld [vmem:[#allocation3 + $0x644] ss:$16 sps:$4 sm:$0xff]  }
 0x39e   :  { %v4581_v21 = vld [vmem:[#allocation3 + $0x5c4] ss:$16 sps:$4 sm:$0xff]   ;;  %v4576_v8 = vld [vmem:[#allocation3 + $0x640] ss:$16 sps:$4 sm:$0xff]  }
 0x39f   :  { %3244 = vmatprep.mubr.bf16.mxu1 %v5544_v22 }
 0x3a0   :  { %3245 = vmatmul.mubr.bf16.vlgmr.msra.gmra.mxu1 %v5546_v24 }
 0x3a1   :  { %3295 = vmatpush1.bf16.msra.mxu1 %v4525_v23  ;;  %3326 = vmatprep.mubr.bf16.mxu1 %v5548_v26  ;;  %v4579_v23 = vld [vmem:[#allocation3 + $0x5c0] ss:$16 sps:$4 sm:$0xff]  }
 0x3a2   :  { %3296 = vmatprep.subr.bf16.mxu1 %v4533_v25  ;;  %v5583_v25 = vld [vmem:[%s5748_s6 + $0x8] sm:$0xf] }
 0x3a5   :  { %3297 = vmatpush1.bf16.msra.mxu1 %v4531_v10  ;;  %v4584_v10 = vld [vmem:[#allocation3 + $0x624] ss:$16 sps:$4 sm:$0xff]  }
 0x3a6   :  { %v1467_v6 = vpop.f32.mrf.mxu0  ;;  %v5563_v15 = vpop.f32.mrf.mxu1  ;;  %3298 = vmatprep.subr.bf16.mxu1 %v4539_v27  ;;  %v4587_v27 = vld [vmem:[#allocation3 + $0x5a4] ss:$16 sps:$4 sm:$0xff]  }
 0x3a7   :  { %v1468_v32 = vadd.f32 %v1467_v6, %v1100_v29  ;;  %v1132_v29 = vrot.slane %v5583_v25, %v5552_v28  ;;  %v4585_v6 = vld [vmem:[#allocation3 + $0x5a0] ss:$16 sps:$4 sm:$0xff]  }
 0x3a8   :  { %v1469_v33 = vpop.f32.mrf.mxu0  ;;  %v5565_v34 = vpop.f32.mrf.mxu1 }
 0x3a9   :  { %v1470_v37 = vadd.f32 %v1469_v33, %v1104_v31  ;;  %3299 = vmatpush1.bf16.msra.mxu1 %v4537_v7  ;;  %v1640_v39 = vmax.f32 %v1468_v32, 0.0  ;;  %v4582_v31 = vld [vmem:[#allocation3 + $0x620] ss:$16 sps:$4 sm:$0xff]   ;;  %v1136_v7 = vrot.slane %v5583_v25, %v5557_v14  ;;  %v4590_v32 = vld [vmem:[#allocation3 + $0x604] ss:$16 sps:$4 sm:$0xff]  }
 0x3aa   :  { %v1471_v40 = vpop.f32.mrf.mxu0  ;;  %v1594_v48 = vpop.f32.mrf.mxu1  ;;  %3300 = vmatprep.subr.bf16.mxu1 %v4545_v30  ;;  %v4593_v33 = vld [vmem:[#allocation3 + $0x584] ss:$16 sps:$4 sm:$0xff]  }
 0x3ab   :  { %v1641_v43 = vmax.f32 %v1470_v37, 0.0  ;;  %v5569_v47 = vpack.c.bf16 %v1640_v39, %v1640_v39  ;;  %v4588_v40 = vld [vmem:[#allocation3 + $0x600] ss:$16 sps:$4 sm:$0xff]  }
 0x3ac   :  { %v1472_v36 = vpop.f32.mrf.mxu0  ;;  %v1595_v11 = vpop.f32.mrf.mxu1  ;;  %v4591_v48 = vld [vmem:[#allocation3 + $0x580] ss:$16 sps:$4 sm:$0xff]  }
 0x3ad   :  { %v5567_v44 = vpack.c.bf16 %v1641_v43, %v1641_v43  ;;  %3301 = vmatpush1.bf16.msra.mxu1 %v4543_v38  ;;  %v4596_v43 = vld [vmem:[#allocation3 + $0x7e4] ss:$16 sps:$4 sm:$0xff]  }
 0x3ae   :  { %3302 = vmatprep.subr.bf16.mxu1 %v4551_v42  ;;  %v4599_v36 = vld [vmem:[#allocation3 + $0x564] ss:$16 sps:$4 sm:$0xff]  }
 0x3af   :  { %3285 = vmatprep.mubr.bf16.mxu0 %v5567_v44 }
 0x3b0   :  { %3286 = vmatmul.mubr.bf16.vlgmr.msra.gmra.mxu0 %v5569_v47 }
 0x3b1   :  { %3336 = vmatpush1.bf16.msra.mxu0 %v4546_v45  ;;  %3303 = vmatpush1.bf16.msra.mxu1 %v4549_v46  ;;  %v4594_v45 = vld [vmem:[#allocation3 + $0x7e0] ss:$16 sps:$4 sm:$0xff]  }
 0x3b2   :  { %3337 = vmatprep.subr.bf16.mxu0 %v4554_v49  ;;  %3304 = vmatprep.subr.bf16.mxu1 %v4557_v50  ;;  %v4597_v46 = vld [vmem:[#allocation3 + $0x560] ss:$16 sps:$4 sm:$0xff]   ;;  %v1107_v49 = vsub.s32 4, %v5123_v2  ;;  %v4602_v50 = vld [vmem:[#allocation3 + $0x7c4] ss:$16 sps:$4 sm:$0xff]  }
 0x3b5   :  { %3338 = vmatpush1.bf16.msra.mxu0 %v4552_v53  ;;  %3305 = vmatpush1.bf16.msra.mxu1 %v4555_v57  ;;  %v4605_v53 = vld [vmem:[#allocation3 + $0x544] ss:$16 sps:$4 sm:$0xff]   ;;  %v4600_v57 = vld [vmem:[#allocation3 + $0x7c0] ss:$16 sps:$4 sm:$0xff]  }
 0x3b6   :  { %v5575_v61 = vpop.f32.mrf.mxu0  ;;  %3339 = vmatprep.subr.bf16.mxu0 %v4560_v4  ;;  %3306 = vmatprep.subr.bf16.mxu1 %v4563_v56  ;;  %v1108_v4 = vrot.slane %v5531_v62, %v1107_v49  ;;  %v4608_v56 = vld [vmem:[#allocation3 + $0x7a4] ss:$16 sps:$4 sm:$0xff]   ;;  %v4662_v49 = vld [vmem:[#allocation3 + $0x28c] ss:$16 sps:$4 sm:$0xff]  }
 0x3b8   :  { %v1551_v5 = vpop.f32.mrf.mxu0 }
 0x3b9   :  { %v1552_v9 = vadd.f32 %v1551_v5, %v1120_v59  ;;  %3340 = vmatpush1.bf16.msra.mxu0 %v4558_v58  ;;  %3307 = vmatpush1.bf16.msra.mxu1 %v4561_v60  ;;  %v4611_v58 = vld [vmem:[#allocation3 + $0x524] ss:$16 sps:$4 sm:$0xff]   ;;  %v4606_v59 = vld [vmem:[#allocation3 + $0x7a0] ss:$16 sps:$4 sm:$0xff]  }
 0x3ba   :  { %v1553_v13 = vpop.f32.mrf.mxu0  ;;  %3341 = vmatprep.subr.bf16.mxu0 %v4566_v63  ;;  %3308 = vmatprep.subr.bf16.mxu1 %v4569_v0  ;;  %v4609_v60 = vld [vmem:[#allocation3 + $0x520] ss:$16 sps:$4 sm:$0xff]   ;;  %v1509_v63 = vadd.f32 %v5542_v3, %v1108_v4  ;;  %v4614_v0 = vld [vmem:[#allocation3 + $0x784] ss:$16 sps:$4 sm:$0xff]   ;;  %v1115_v3 = vsub.s32 6, %v5123_v2 }
 0x3bb   :  { %v1645_v18 = vmax.f32 %v1552_v9, 0.0  ;;  %v4617_v5 = vld [vmem:[#allocation3 + $0x504] ss:$16 sps:$4 sm:$0xff]   ;;  %v4612_v9 = vld [vmem:[#allocation3 + $0x780] ss:$16 sps:$4 sm:$0xff]  }
 0x3bc   :  { %v1554_v41 = vpop.f32.mrf.mxu0  ;;  %v4620_v13 = vld [vmem:[#allocation3 + $0x764] ss:$16 sps:$4 sm:$0xff]   ;;  %v4630_v2 = vld [vmem:[#allocation3 + $0x720] ss:$16 sps:$4 sm:$0xff]   ;;  %v4666_v4 = vld [vmem:[#allocation3 + $0x268] ss:$16 sps:$4 sm:$0xff]  }
 0x3bd   :  { %v5577_v19 = vpack.c.bf16 %v1645_v18, %v1645_v18  ;;  %3342 = vmatpush1.bf16.msra.mxu0 %v4564_v51  ;;  %3309 = vmatpush1.bf16.msra.mxu1 %v4567_v12  ;;  %v4615_v51 = vld [vmem:[#allocation3 + $0x500] ss:$16 sps:$4 sm:$0xff]   ;;  %v1642_v12 = vmax.f32 %v1509_v63, 0.0  ;;  %v4621_v18 = vld [vmem:[#allocation3 + $0xe8] ss:$16 sps:$4 sm:$0xff]  }
 0x3be   :  { %3343 = vmatprep.subr.bf16.mxu0 %v4572_v16  ;;  %3310 = vmatprep.subr.bf16.mxu1 %v4575_v17  ;;  %v4623_v16 = vld [vmem:[#allocation3 + $0xec] ss:$16 sps:$4 sm:$0xff]   ;;  %v4618_v17 = vld [vmem:[#allocation3 + $0x760] ss:$16 sps:$4 sm:$0xff]   ;;  %v4675_v63 = vld [vmem:[#allocation3 + $0x1c8] ss:$16 sps:$4 sm:$0xff]  }
 0x3bf   :  { %3367 = vmatprep.mubr.bf16.mxu0 %v5577_v19  ;;  %v5596_v41 = vpack.c.bf16 %v1642_v12, %v1642_v12  ;;  %v4686_v12 = vld [vmem:[#allocation3 + $0x20c] ss:$16 sps:$4 sm:$0xff]  }
 0x3c1   :  { %3344 = vmatpush1.bf16.msra.mxu0 %v4570_v54  ;;  %3311 = vmatpush2.bf16.msra.mxu1 %v4573_v55  ;;  %v4626_v54 = vld [vmem:[#allocation3 + $0x744] ss:$16 sps:$4 sm:$0xff]   ;;  %v4629_v55 = vld [vmem:[#allocation3 + $0xcc] ss:$16 sps:$4 sm:$0xff]  }
 0x3c2   :  { %3345 = vmatprep.subr.bf16.mxu0 %v4578_v20  ;;  %3312 = vmatprep.subr.bf16.mxu1 %v4581_v21  ;;  %v4624_v20 = vld [vmem:[#allocation3 + $0x740] ss:$16 sps:$4 sm:$0xff]   ;;  %v4627_v21 = vld [vmem:[#allocation3 + $0xc8] ss:$16 sps:$4 sm:$0xff]  }
 0x3c5   :  { %3346 = vmatpush1.bf16.msra.mxu0 %v4576_v8  ;;  %3313 = vmatpush2.bf16.msra.mxu1 %v4579_v23  ;;  %v1116_v8 = vrot.slane %v5531_v62, %v1115_v3  ;;  %v4632_v23 = vld [vmem:[#allocation3 + $0x724] ss:$16 sps:$4 sm:$0xff]   ;;  %v4639_v62 = vld [vmem:[#allocation3 + $0x88] ss:$16 sps:$4 sm:$0xff]   ;;  %v4695_v3 = vld [vmem:[#allocation3 + $0x16c] ss:$16 sps:$4 sm:$0xff]  }
 0x3c6   :  { %v1631_v30 = vpop.f32.mrf.mxu0  ;;  %3347 = vmatprep.subr.bf16.mxu0 %v4584_v10  ;;  %3314 = vmatprep.subr.bf16.mxu1 %v4587_v27  ;;  %v4635_v10 = vld [vmem:[#allocation3 + $0xac] ss:$16 sps:$4 sm:$0xff]   ;;  %v4633_v27 = vld [vmem:[#allocation3 + $0xa8] ss:$16 sps:$4 sm:$0xff]  }
 0x3c7   :  { %v5589_v37 = vadd.f32 %v1631_v30, %v1132_v29  ;;  %v1550_v29 = vadd.f32 %v5575_v61, %v1116_v8  ;;  %v4645_v61 = vld [vmem:[#allocation3 + $0x68] ss:$16 sps:$4 sm:$0xff]  }
 0x3c8   :  { %v1633_v38 = vpop.f32.mrf.mxu0  ;;  %v4696_v8 = vld [vmem:[#allocation3 + $0x3c8] ss:$16 sps:$4 sm:$0xff]  }
 0x3c9   :  { %v5591_v39 = vadd.f32 %v1633_v38, %v1136_v7  ;;  %3348 = vmatpush1.bf16.msra.mxu0 %v4582_v31  ;;  %3315 = vmatpush2.bf16.msra.mxu1 %v4585_v6  ;;  %v4638_v31 = vld [vmem:[#allocation3 + $0x704] ss:$16 sps:$4 sm:$0xff]   ;;  %v4641_v7 = vld [vmem:[#allocation3 + $0x8c] ss:$16 sps:$4 sm:$0xff]   ;;  %v4636_v6 = vld [vmem:[#allocation3 + $0x700] ss:$16 sps:$4 sm:$0xff]  }
 0x3ca   :  { %v1635_v42 = vpop.f32.mrf.mxu0  ;;  %3349 = vmatprep.subr.bf16.mxu0 %v4590_v32  ;;  %3316 = vmatprep.subr.bf16.mxu1 %v4593_v33  ;;  %v1644_v30 = vmax.f32 %v1550_v29, 0.0  ;;  %v4647_v32 = vld [vmem:[#allocation3 + $0x6c] ss:$16 sps:$4 sm:$0xff]   ;;  %v4642_v33 = vld [vmem:[#allocation3 + $0x2e8] ss:$16 sps:$4 sm:$0xff]  }
 0x3cb   :  { %v4648_v42 = vld [vmem:[#allocation3 + $0x2c8] ss:$16 sps:$4 sm:$0xff]  }
 0x3cc   :  { %v1636_v11 = vpop.f32.mrf.mxu0  ;;  %v5603_v38 = vpack.c.bf16 %v1644_v30, %v1644_v30  ;;  %v4705_v29 = vld [vmem:[#allocation3 + $0x128] ss:$16 sps:$4 sm:$0xff]   ;;  %v4716_v30 = vld [vmem:[#allocation3 + $0x36c] ss:$16 sps:$4 sm:$0xff]  }
 0x3cd   :  { %3350 = vmatpush1.bf16.msra.mxu0 %v4588_v40  ;;  %3317 = vmatpush2.bf16.msra.mxu1 %v4591_v48  ;;  %v4650_v40 = vld [vmem:[#allocation3 + $0x2cc] ss:$16 sps:$4 sm:$0xff]  }
 0x3ce   :  { %3351 = vmatprep.subr.bf16.mxu0 %v4596_v43  ;;  %3318 = vmatprep.subr.bf16.mxu1 %v4599_v36  ;;  %v4653_v48 = vld [vmem:[#allocation3 + $0x4c] ss:$16 sps:$4 sm:$0xff]   ;;  %v4651_v43 = vld [vmem:[#allocation3 + $0x48] ss:$16 sps:$4 sm:$0xff]  }
 0x3cf   :  { %v4656_v36 = vld [vmem:[#allocation3 + $0x2ac] ss:$16 sps:$4 sm:$0xff]  }
 0x3d0   :  { %v4659_v11 = vld [vmem:[#allocation3 + $0x2c] ss:$16 sps:$4 sm:$0xff]  }
 0x3d1   :  { %3352 = vmatpush2.bf16.msra.mxu0 %v4594_v45  ;;  %3319 = vmatpush2.bf16.msra.mxu1 %v4597_v46  ;;  %v4654_v45 = vld [vmem:[#allocation3 + $0x2a8] ss:$16 sps:$4 sm:$0xff]  }
 0x3d2   :  { %3353 = vmatprep.subr.bf16.mxu0 %v4602_v50  ;;  %3320 = vmatprep.subr.bf16.mxu1 %v4605_v53  ;;  %v4657_v46 = vld [vmem:[#allocation3 + $0x28] ss:$16 sps:$4 sm:$0xff]   ;;  %v4665_v50 = vld [vmem:[#allocation3 + $0xc] ss:$16 sps:$4 sm:$0xff]  }
 0x3d3   :  { %v4660_v53 = vld [vmem:[#allocation3 + $0x288] ss:$16 sps:$4 sm:$0xff]  }
 0x3d5   :  { %3354 = vmatpush2.bf16.msra.mxu0 %v4600_v57  ;;  %3321 = vmatpush2.bf16.msra.mxu1 %v4603_v52  ;;  %v4668_v57 = vld [vmem:[#allocation3 + $0x26c] ss:$16 sps:$4 sm:$0xff]  }
 0x3d6   :  { %3355 = vmatprep.subr.bf16.mxu0 %v4608_v56  ;;  %3322 = vmatprep.subr.bf16.mxu1 %v4611_v58  ;;  %v4671_v52 = vld [vmem:[#allocation3 + $0x1ec] ss:$16 sps:$4 sm:$0xff]   ;;  %v4669_v56 = vld [vmem:[#allocation3 + $0x1e8] ss:$16 sps:$4 sm:$0xff]  }
 0x3d7   :  { %v4674_v58 = vld [vmem:[#allocation3 + $0x24c] ss:$16 sps:$4 sm:$0xff]  }
 0x3d9   :  { %3356 = vmatpush2.bf16.msra.mxu0 %v4606_v59  ;;  %3323 = vmatpush2.bf16.msra.mxu1 %v4609_v60  ;;  %v4677_v59 = vld [vmem:[#allocation3 + $0x1cc] ss:$16 sps:$4 sm:$0xff]   ;;  %v4672_v60 = vld [vmem:[#allocation3 + $0x248] ss:$16 sps:$4 sm:$0xff]  }
 0x3da   :  { %3357 = vmatprep.subr.bf16.mxu0 %v4614_v0  ;;  %3324 = vmatprep.subr.bf16.mxu1 %v4617_v5  ;;  %v4680_v0 = vld [vmem:[#allocation3 + $0x22c] ss:$16 sps:$4 sm:$0xff]  }
 0x3db   :  { %v4683_v5 = vld [vmem:[#allocation3 + $0x1ac] ss:$16 sps:$4 sm:$0xff]  }
 0x3dd   :  { %3358 = vmatpush2.bf16.msra.mxu0 %v4612_v9  ;;  %3325 = vmatpush2.bf16.msra.mxu1 %v4615_v51  ;;  %v4678_v9 = vld [vmem:[#allocation3 + $0x228] ss:$16 sps:$4 sm:$0xff]  }
 0x3de   :  { %3359 = vmatprep.subr.bf16.mxu0 %v4620_v13  ;;  %3376 = vmatprep.subr.bf16.mxu1 %v4623_v16  ;;  %v4681_v51 = vld [vmem:[#allocation3 + $0x1a8] ss:$16 sps:$4 sm:$0xff]   ;;  %v4689_v13 = vld [vmem:[#allocation3 + $0x18c] ss:$16 sps:$4 sm:$0xff]  }
 0x3df   :  { %v4684_v16 = vld [vmem:[#allocation3 + $0x208] ss:$16 sps:$4 sm:$0xff]  }
 0x3e0   :  { %3327 = vmatmul.mubr.bf16.vlgmr.msra.gmra.mxu1 %v5596_v41 }
 0x3e1   :  { %3360 = vmatpush2.bf16.msra.mxu0 %v4618_v17  ;;  %3377 = vmatpush1.bf16.msra.mxu1 %v4621_v18  ;;  %v4687_v17 = vld [vmem:[#allocation3 + $0x188] ss:$16 sps:$4 sm:$0xff]   ;;  %v4692_v18 = vld [vmem:[#allocation3 + $0x3ec] ss:$16 sps:$4 sm:$0xff]  }
 0x3e2   :  { %3408 = vmatprep.mubr.bf16.mxu1 %v5544_v22  ;;  %3361 = vmatprep.subr.bf16.mxu0 %v4626_v54  ;;  %v4644_v22 = vld [vmem:[#allocation3 + $0x2ec] ss:$16 sps:$4 sm:$0xff]   ;;  %v4690_v54 = vld [vmem:[#allocation3 + $0x3e8] ss:$16 sps:$4 sm:$0xff]  }
 0x3e3   :  { %3378 = vmatprep.subr.bf16.mxu1 %v4629_v55  ;;  %v4693_v55 = vld [vmem:[#allocation3 + $0x168] ss:$16 sps:$4 sm:$0xff]  }
 0x3e5   :  { %3362 = vmatpush2.bf16.msra.mxu0 %v4624_v20  ;;  %3379 = vmatpush1.bf16.msra.mxu1 %v4627_v21  ;;  %v4698_v20 = vld [vmem:[#allocation3 + $0x3cc] ss:$16 sps:$4 sm:$0xff]  }
 0x3e6   :  { %3363 = vmatprep.subr.bf16.mxu0 %v4632_v23  ;;  %3380 = vmatprep.subr.bf16.mxu1 %v4635_v10  ;;  %v4701_v21 = vld [vmem:[#allocation3 + $0x14c] ss:$16 sps:$4 sm:$0xff]   ;;  %v4699_v23 = vld [vmem:[#allocation3 + $0x148] ss:$16 sps:$4 sm:$0xff]  }
 0x3e7   :  { %v4704_v10 = vld [vmem:[#allocation3 + $0x3ac] ss:$16 sps:$4 sm:$0xff]  }
 0x3e9   :  { %3364 = vmatpush2.bf16.msra.mxu0 %v4630_v2  ;;  %3381 = vmatpush1.bf16.msra.mxu1 %v4633_v27  ;;  %v4707_v2 = vld [vmem:[#allocation3 + $0x12c] ss:$16 sps:$4 sm:$0xff]   ;;  %v4702_v27 = vld [vmem:[#allocation3 + $0x3a8] ss:$16 sps:$4 sm:$0xff]  }
 0x3ea   :  { %3365 = vmatprep.subr.bf16.mxu0 %v4638_v31  ;;  %3382 = vmatprep.subr.bf16.mxu1 %v4641_v7  ;;  %v4710_v31 = vld [vmem:[#allocation3 + $0x38c] ss:$16 sps:$4 sm:$0xff]  }
 0x3eb   :  { %v4713_v7 = vld [vmem:[#allocation3 + $0x10c] ss:$16 sps:$4 sm:$0xff]  }
 0x3ed   :  { %3366 = vmatpush2.bf16.msra.mxu0 %v4636_v6  ;;  %3383 = vmatpush1.bf16.msra.mxu1 %v4639_v62  ;;  %v4708_v6 = vld [vmem:[#allocation3 + $0x388] ss:$16 sps:$4 sm:$0xff]  }
 0x3ee   :  { %3417 = vmatprep.subr.bf16.mxu0 %v4644_v22  ;;  %3384 = vmatprep.subr.bf16.mxu1 %v4647_v32  ;;  %v4711_v62 = vld [vmem:[#allocation3 + $0x108] ss:$16 sps:$4 sm:$0xff]   ;;  %v4719_v22 = vld [vmem:[#allocation3 + $0x4ec] ss:$16 sps:$4 sm:$0xff]  }
 0x3ef   :  { %v4714_v32 = vld [vmem:[#allocation3 + $0x368] ss:$16 sps:$4 sm:$0xff]  }
 0x3f0   :  { %3368 = vmatmul.mubr.bf16.vlgmr.msra.gmra.mxu0 %v5603_v38 }
 0x3f1   :  { %3418 = vmatpush1.bf16.msra.mxu0 %v4642_v33  ;;  %3449 = vmatprep.mubr.bf16.mxu0 %v5567_v44  ;;  %v4663_v44 = vld [vmem:[#allocation3 + $0x8] ss:$16 sps:$4 sm:$0xff]  }
 0x3f2   :  { %3385 = vmatpush1.bf16.msra.mxu1 %v4645_v61  ;;  %3419 = vmatprep.subr.bf16.mxu0 %v4650_v40  ;;  %v4717_v33 = vld [vmem:[#allocation3 + $0x4e8] ss:$16 sps:$4 sm:$0xff]   ;;  %v4722_v61 = vld [vmem:[#allocation3 + $0x34c] ss:$16 sps:$4 sm:$0xff]  }
 0x3f3   :  { %3386 = vmatprep.subr.bf16.mxu1 %v4653_v48  ;;  %v4725_v40 = vld [vmem:[#allocation3 + $0x4cc] ss:$16 sps:$4 sm:$0xff]   ;;  %v4720_v48 = vld [vmem:[#allocation3 + $0x348] ss:$16 sps:$4 sm:$0xff]  }
 0x3f5   :  { %3420 = vmatpush1.bf16.msra.mxu0 %v4648_v42  ;;  %v4723_v42 = vld [vmem:[#allocation3 + $0x4c8] ss:$16 sps:$4 sm:$0xff]  }
 0x3f6   :  { %3387 = vmatpush1.bf16.msra.mxu1 %v4651_v43  ;;  %3421 = vmatprep.subr.bf16.mxu0 %v4656_v36  ;;  %v4728_v43 = vld [vmem:[#allocation3 + $0x32c] ss:$16 sps:$4 sm:$0xff]  }
 0x3f7   :  { %3388 = vmatprep.subr.bf16.mxu1 %v4659_v11  ;;  %v4731_v36 = vld [vmem:[#allocation3 + $0x4ac] ss:$16 sps:$4 sm:$0xff]   ;;  %v4726_v11 = vld [vmem:[#allocation3 + $0x328] ss:$16 sps:$4 sm:$0xff]  }
 0x3f9   :  { %3422 = vmatpush1.bf16.msra.mxu0 %v4654_v45  ;;  %v4729_v45 = vld [vmem:[#allocation3 + $0x4a8] ss:$16 sps:$4 sm:$0xff]  }
 0x3fa   :  { %3389 = vmatpush1.bf16.msra.mxu1 %v4657_v46  ;;  %3423 = vmatprep.subr.bf16.mxu0 %v4662_v49  ;;  %v4734_v46 = vld [vmem:[#allocation3 + $0x30c] ss:$16 sps:$4 sm:$0xff]  }
 0x3fb   :  { %3390 = vmatprep.subr.bf16.mxu1 %v4665_v50  ;;  %v4737_v49 = vld [vmem:[#allocation3 + $0x48c] ss:$16 sps:$4 sm:$0xff]   ;;  %v4735_v50 = vld [vmem:[#allocation3 + $0x488] ss:$16 sps:$4 sm:$0xff]  }
 0x3fd   :  { %3424 = vmatpush1.bf16.msra.mxu0 %v4660_v53  ;;  %v4740_v53 = vld [vmem:[#allocation3 + $0x6ec] ss:$16 sps:$4 sm:$0xff]  }
 0x3fe   :  { %3391 = vmatpush1.bf16.msra.mxu1 %v4663_v44  ;;  %3425 = vmatprep.subr.bf16.mxu0 %v4668_v57  ;;  %v4738_v44 = vld [vmem:[#allocation3 + $0x6e8] ss:$16 sps:$4 sm:$0xff]  }
 0x3ff   :  { %3392 = vmatprep.subr.bf16.mxu1 %v4671_v52  ;;  %v4741_v57 = vld [vmem:[#allocation3 + $0x468] ss:$16 sps:$4 sm:$0xff]   ;;  %v4746_v52 = vld [vmem:[#allocation3 + $0x6cc] ss:$16 sps:$4 sm:$0xff]  }
 0x401   :  { %3426 = vmatpush1.bf16.msra.mxu0 %v4666_v4  ;;  %v4749_v4 = vld [vmem:[#allocation3 + $0x44c] ss:$16 sps:$4 sm:$0xff]  }
 0x402   :  { %3393 = vmatpush2.bf16.msra.mxu1 %v4669_v56  ;;  %3427 = vmatprep.subr.bf16.mxu0 %v4674_v58  ;;  %v4744_v56 = vld [vmem:[#allocation3 + $0x6c8] ss:$16 sps:$4 sm:$0xff]  }
 0x403   :  { %3394 = vmatprep.subr.bf16.mxu1 %v4677_v59  ;;  %v4747_v58 = vld [vmem:[#allocation3 + $0x448] ss:$16 sps:$4 sm:$0xff]   ;;  %v4752_v59 = vld [vmem:[#allocation3 + $0x6ac] ss:$16 sps:$4 sm:$0xff]  }
 0x405   :  { %3428 = vmatpush1.bf16.msra.mxu0 %v4672_v60  ;;  %v4755_v60 = vld [vmem:[#allocation3 + $0x42c] ss:$16 sps:$4 sm:$0xff]  }
 0x406   :  { %3395 = vmatpush2.bf16.msra.mxu1 %v4675_v63  ;;  %3429 = vmatprep.subr.bf16.mxu0 %v4680_v0  ;;  %v4750_v63 = vld [vmem:[#allocation3 + $0x6a8] ss:$16 sps:$4 sm:$0xff]  }
 0x407   :  { %3396 = vmatprep.subr.bf16.mxu1 %v4683_v5  ;;  %v4753_v0 = vld [vmem:[#allocation3 + $0x428] ss:$16 sps:$4 sm:$0xff]   ;;  %v4758_v5 = vld [vmem:[#allocation3 + $0x68c] ss:$16 sps:$4 sm:$0xff]  }
 0x409   :  { %3430 = vmatpush1.bf16.msra.mxu0 %v4678_v9  ;;  %v4761_v9 = vld [vmem:[#allocation3 + $0x40c] ss:$16 sps:$4 sm:$0xff]  }
 0x40a   :  { %3397 = vmatpush2.bf16.msra.mxu1 %v4681_v51  ;;  %3431 = vmatprep.subr.bf16.mxu0 %v4686_v12  ;;  %v4764_v51 = vld [vmem:[#allocation3 + $0x66c] ss:$16 sps:$4 sm:$0xff]  }
 0x40b   :  { %3398 = vmatprep.subr.bf16.mxu1 %v4689_v13  ;;  %v4767_v12 = vld [vmem:[#allocation3 + $0x5ec] ss:$16 sps:$4 sm:$0xff]   ;;  %v4762_v13 = vld [vmem:[#allocation3 + $0x668] ss:$16 sps:$4 sm:$0xff]  }
 0x40d   :  { %3432 = vmatpush1.bf16.msra.mxu0 %v4684_v16  ;;  %v4765_v16 = vld [vmem:[#allocation3 + $0x5e8] ss:$16 sps:$4 sm:$0xff]  }
 0x40e   :  { %3399 = vmatpush2.bf16.msra.mxu1 %v4687_v17  ;;  %3433 = vmatprep.subr.bf16.mxu0 %v4692_v18  ;;  %v4770_v17 = vld [vmem:[#allocation3 + $0x64c] ss:$16 sps:$4 sm:$0xff]  }
 0x40f   :  { %3400 = vmatprep.subr.bf16.mxu1 %v4695_v3  ;;  %v4773_v18 = vld [vmem:[#allocation3 + $0x5cc] ss:$16 sps:$4 sm:$0xff]   ;;  %v4768_v3 = vld [vmem:[#allocation3 + $0x648] ss:$16 sps:$4 sm:$0xff]  }
 0x411   :  { %3434 = vmatpush2.bf16.msra.mxu0 %v4690_v54  ;;  %v4771_v54 = vld [vmem:[#allocation3 + $0x5c8] ss:$16 sps:$4 sm:$0xff]  }
 0x412   :  { %3401 = vmatpush2.bf16.msra.mxu1 %v4693_v55  ;;  %3435 = vmatprep.subr.bf16.mxu0 %v4698_v20  ;;  %v4776_v55 = vld [vmem:[#allocation3 + $0x62c] ss:$16 sps:$4 sm:$0xff]  }
 0x413   :  { %3402 = vmatprep.subr.bf16.mxu1 %v4701_v21  ;;  %v4779_v20 = vld [vmem:[#allocation3 + $0x5ac] ss:$16 sps:$4 sm:$0xff]   ;;  %v4774_v21 = vld [vmem:[#allocation3 + $0x628] ss:$16 sps:$4 sm:$0xff]  }
 0x415   :  { %3436 = vmatpush2.bf16.msra.mxu0 %v4696_v8  ;;  %v4777_v8 = vld [vmem:[#allocation3 + $0x5a8] ss:$16 sps:$4 sm:$0xff]  }
 0x416   :  { %3403 = vmatpush2.bf16.msra.mxu1 %v4699_v23  ;;  %3437 = vmatprep.subr.bf16.mxu0 %v4704_v10  ;;  %v4782_v23 = vld [vmem:[#allocation3 + $0x60c] ss:$16 sps:$4 sm:$0xff]  }
 0x417   :  { %3404 = vmatprep.subr.bf16.mxu1 %v4707_v2  ;;  %v4785_v10 = vld [vmem:[#allocation3 + $0x58c] ss:$16 sps:$4 sm:$0xff]   ;;  %v4780_v2 = vld [vmem:[#allocation3 + $0x608] ss:$16 sps:$4 sm:$0xff]  }
 0x419   :  { %3438 = vmatpush2.bf16.msra.mxu0 %v4702_v27  ;;  %v4783_v27 = vld [vmem:[#allocation3 + $0x588] ss:$16 sps:$4 sm:$0xff]  }
 0x41a   :  { %3405 = vmatpush2.bf16.msra.mxu1 %v4705_v29  ;;  %3439 = vmatprep.subr.bf16.mxu0 %v4710_v31  ;;  %v4788_v29 = vld [vmem:[#allocation3 + $0x7ec] ss:$16 sps:$4 sm:$0xff]  }
 0x41b   :  { %3406 = vmatprep.subr.bf16.mxu1 %v4713_v7  ;;  %v4791_v31 = vld [vmem:[#allocation3 + $0x56c] ss:$16 sps:$4 sm:$0xff]   ;;  %v4786_v7 = vld [vmem:[#allocation3 + $0x7e8] ss:$16 sps:$4 sm:$0xff]  }
 0x41d   :  { %3440 = vmatpush2.bf16.msra.mxu0 %v4708_v6  ;;  %v4789_v6 = vld [vmem:[#allocation3 + $0x568] ss:$16 sps:$4 sm:$0xff]  }
 0x41e   :  { %3407 = vmatpush2.bf16.msra.mxu1 %v4711_v62  ;;  %3441 = vmatprep.subr.bf16.mxu0 %v4716_v30  ;;  %v4794_v62 = vld [vmem:[#allocation3 + $0x7cc] ss:$16 sps:$4 sm:$0xff]  }
 0x41f   :  { %3458 = vmatprep.subr.bf16.mxu1 %v4719_v22  ;;  %v4797_v30 = vld [vmem:[#allocation3 + $0x54c] ss:$16 sps:$4 sm:$0xff]   ;;  %v4792_v22 = vld [vmem:[#allocation3 + $0x7c8] ss:$16 sps:$4 sm:$0xff]  }
 0x421   :  { %3409 = vmatmul.mubr.bf16.vlgmr.msra.gmra.mxu1 %v5546_v24  ;;  %3442 = vmatpush2.bf16.msra.mxu0 %v4714_v32  ;;  %v4732_v24 = vld [vmem:[#allocation3 + $0x308] ss:$16 sps:$4 sm:$0xff]  }
 0x422   :  { %3459 = vmatpush1.bf16.msra.mxu1 %v4717_v33  ;;  %3490 = vmatprep.mubr.bf16.mxu1 %v5548_v26  ;;  %v4743_v26 = vld [vmem:[#allocation3 + $0x46c] ss:$16 sps:$4 sm:$0xff]   ;;  %v4795_v32 = vld [vmem:[#allocation3 + $0x548] ss:$16 sps:$4 sm:$0xff]  }
 0x423   :  { %3443 = vmatprep.subr.bf16.mxu0 %v4722_v61  ;;  %3460 = vmatprep.subr.bf16.mxu1 %v4725_v40  ;;  %v4800_v33 = vld [vmem:[#allocation3 + $0x7ac] ss:$16 sps:$4 sm:$0xff]   ;;  %v4798_v40 = vld [vmem:[#allocation3 + $0x7a8] ss:$16 sps:$4 sm:$0xff]  }
 0x424   :  { %v4803_v61 = vld [vmem:[#allocation3 + $0x52c] ss:$16 sps:$4 sm:$0xff]  }
 0x425   :  { %3444 = vmatpush2.bf16.msra.mxu0 %v4720_v48  ;;  %v4801_v48 = vld [vmem:[#allocation3 + $0x528] ss:$16 sps:$4 sm:$0xff]  }
 0x426   :  { %3461 = vmatpush1.bf16.msra.mxu1 %v4723_v42  ;;  %3445 = vmatprep.subr.bf16.mxu0 %v4728_v43  ;;  %v4806_v42 = vld [vmem:[#allocation3 + $0x78c] ss:$16 sps:$4 sm:$0xff]  }
 0x427   :  { %3462 = vmatprep.subr.bf16.mxu1 %v4731_v36  ;;  %v4809_v43 = vld [vmem:[#allocation3 + $0x50c] ss:$16 sps:$4 sm:$0xff]   ;;  %v4804_v36 = vld [vmem:[#allocation3 + $0x788] ss:$16 sps:$4 sm:$0xff]  }
 0x429   :  { %3446 = vmatpush2.bf16.msra.mxu0 %v4726_v11  ;;  %v4807_v11 = vld [vmem:[#allocation3 + $0x508] ss:$16 sps:$4 sm:$0xff]  }
 0x42a   :  { %3463 = vmatpush1.bf16.msra.mxu1 %v4729_v45  ;;  %3447 = vmatprep.subr.bf16.mxu0 %v4734_v46  ;;  %v4812_v45 = vld [vmem:[#allocation3 + $0x76c] ss:$16 sps:$4 sm:$0xff]   ;;  %v4822_v46 = vld [vmem:[%s5747_s5 + $0x78] sm:$0xff]  }
 0x42b   :  { %3464 = vmatprep.subr.bf16.mxu1 %v4737_v49  ;;  %v4810_v49 = vld [vmem:[#allocation3 + $0x768] ss:$16 sps:$4 sm:$0xff]  }
 0x42d   :  { %3448 = vmatpush2.bf16.msra.mxu0 %v4732_v24  ;;  %v4815_v24 = vld [vmem:[#allocation3 + $0x74c] ss:$16 sps:$4 sm:$0xff]  }
 0x42e   :  { %3465 = vmatpush1.bf16.msra.mxu1 %v4735_v50  ;;  %3499 = vmatprep.subr.bf16.mxu0 %v4740_v53  ;;  %v4823_v50 = vld [vmem:[%s5747_s5 + $0x38] sm:$0xff]   ;;  %v4824_v53 = vld [vmem:[%s5747_s5 + $0x70] sm:$0xff]  }
 0x42f   :  { %3466 = vmatprep.subr.bf16.mxu1 %v4743_v26 }
 0x430   :  { %3450 = vmatmul.mubr.bf16.vlgmr.msra.gmra.mxu0 %v5569_v47  ;;  %v4756_v47 = vld [vmem:[#allocation3 + $0x688] ss:$16 sps:$4 sm:$0xff]  }
 0x431   :  { %3500 = vmatpush1.bf16.msra.mxu0 %v4738_v44  ;;  %3531 = vmatprep.mubr.bf16.mxu0 %v5577_v19  ;;  %v4759_v19 = vld [vmem:[#allocation3 + $0x408] ss:$16 sps:$4 sm:$0xff]  }
 0x432   :  { %3467 = vmatpush1.bf16.msra.mxu1 %v4741_v57  ;;  %3501 = vmatprep.subr.bf16.mxu0 %v4746_v52  ;;  %v4813_v44 = vld [vmem:[#allocation3 + $0x748] ss:$16 sps:$4 sm:$0xff]   ;;  %v4818_v52 = vld [vmem:[#allocation3 + $0x72c] ss:$16 sps:$4 sm:$0xff]  }
 0x433   :  { %3468 = vmatprep.subr.bf16.mxu1 %v4749_v4  ;;  %v4825_v4 = vld [vmem:[%s5747_s5 + $0x30] sm:$0xff]  }
 0x435   :  { %3502 = vmatpush1.bf16.msra.mxu0 %v4744_v56  ;;  %v4826_v56 = vld [vmem:[%s5747_s5 + $0x68] sm:$0xff]  }
 0x436   :  { %3469 = vmatpush1.bf16.msra.mxu1 %v4747_v58  ;;  %3503 = vmatprep.subr.bf16.mxu0 %v4752_v59  ;;  %v4816_v59 = vld [vmem:[#allocation3 + $0x728] ss:$16 sps:$4 sm:$0xff]  }
 0x437   :  { %3470 = vmatprep.subr.bf16.mxu1 %v4755_v60  ;;  %v4821_v60 = vld [vmem:[#allocation3 + $0x70c] ss:$16 sps:$4 sm:$0xff]  }
 0x439   :  { %3504 = vmatpush1.bf16.msra.mxu0 %v4750_v63  ;;  %v4827_v63 = vld [vmem:[%s5747_s5 + $0x28] sm:$0xff]  }
 0x43a   :  { %3471 = vmatpush1.bf16.msra.mxu1 %v4753_v0  ;;  %3505 = vmatprep.subr.bf16.mxu0 %v4758_v5  ;;  %v4828_v0 = vld [vmem:[%s5747_s5 + $0x60] sm:$0xff]  }
 0x43b   :  { %3472 = vmatprep.subr.bf16.mxu1 %v4761_v9  ;;  %v4819_v5 = vld [vmem:[#allocation3 + $0x708] ss:$16 sps:$4 sm:$0xff]  }
 0x43c   :  { %v4829_v9 = vld [vmem:[%s5747_s5 + $0x20] sm:$0xff]  }
 0x43d   :  { %3506 = vmatpush1.bf16.msra.mxu0 %v4756_v47  ;;  %v4830_v47 = vld [vmem:[%s5747_s5 + $0x58] sm:$0xff]  }
 0x43e   :  { %3473 = vmatpush1.bf16.msra.mxu1 %v4759_v19  ;;  %3507 = vmatprep.subr.bf16.mxu0 %v4764_v51  ;;  %v4831_v19 = vld [vmem:[%s5747_s5 + $0x18] sm:$0xff]   ;;  %v4832_v51 = vld [vmem:[%s5747_s5 + $0x50] sm:$0xff]  }
 0x43f   :  { %3474 = vmatprep.subr.bf16.mxu1 %v4767_v12 }
 0x441   :  { %3508 = vmatpush1.bf16.msra.mxu0 %v4762_v13 }
 0x442   :  { %3475 = vmatpush2.bf16.msra.mxu1 %v4765_v16  ;;  %3509 = vmatprep.subr.bf16.mxu0 %v4770_v17  ;;  %v4833_v16 = vld [vmem:[%s5747_s5 + $0x10] sm:$0xff]   ;;  %v4834_v17 = vld [vmem:[%s5747_s5 + $0x48] sm:$0xff]  }
 0x443   :  { %3476 = vmatprep.subr.bf16.mxu1 %v4773_v18 }
 0x445   :  { %3510 = vmatpush1.bf16.msra.mxu0 %v4768_v3  ;;  %v4835_v3 = vld [vmem:[%s5747_s5 + $0x8] sm:$0xff]  }
 0x446   :  { %3477 = vmatpush2.bf16.msra.mxu1 %v4771_v54  ;;  %3511 = vmatprep.subr.bf16.mxu0 %v4776_v55  ;;  %v4839_v55 = vld [vmem:[%s5747_s5 + $0xb8] sm:$0xff]  }
 0x447   :  { %3478 = vmatprep.subr.bf16.mxu1 %v4779_v20  ;;  %v4840_v20 = vld [vmem:[%s5747_s5 + $0xf0] sm:$0xff]  }
 0x449   :  { %3512 = vmatpush1.bf16.msra.mxu0 %v4774_v21  ;;  %v4836_v21 = vld [vmem:[%s5747_s5 + $0x40] sm:$0xff]  }
 0x44a   :  { %3479 = vmatpush2.bf16.msra.mxu1 %v4777_v8  ;;  %3513 = vmatprep.subr.bf16.mxu0 %v4782_v23  ;;  %v4837_v8 = vld [vmem:[%s5747_s5] sm:$0xff]   ;;  %v4841_v23 = vld [vmem:[%s5747_s5 + $0xb0] sm:$0xff]  }
 0x44b   :  { %3480 = vmatprep.subr.bf16.mxu1 %v4785_v10 }
 0x44d   :  { %3514 = vmatpush1.bf16.msra.mxu0 %v4780_v2 }
 0x44e   :  { %3481 = vmatpush2.bf16.msra.mxu1 %v4783_v27  ;;  %3515 = vmatprep.subr.bf16.mxu0 %v4788_v29  ;;  %v4842_v27 = vld [vmem:[%s5747_s5 + $0xe8] sm:$0xff]  }
 0x44f   :  { %3482 = vmatprep.subr.bf16.mxu1 %v4791_v31  ;;  %v4843_v29 = vld [vmem:[%s5747_s5 + $0xa8] sm:$0xff]  }
 0x450   :  { %v5686_v31 = vld [vmem:[%s5748_s6 + $0xc] sm:$0xf] }
 0x451   :  { %3516 = vmatpush2.bf16.msra.mxu0 %v4786_v7 }
 0x452   :  { %3483 = vmatpush2.bf16.msra.mxu1 %v4789_v6  ;;  %3517 = vmatprep.subr.bf16.mxu0 %v4794_v62  ;;  %v4844_v62 = vld [vmem:[%s5747_s5 + $0xe0] sm:$0xff]  }
 0x453   :  { %3484 = vmatprep.subr.bf16.mxu1 %v4797_v30  ;;  %v1915_v30 = vrot.slane %v5686_v31, %v5526_v35 }
 0x455   :  { %3518 = vmatpush2.bf16.msra.mxu0 %v4792_v22  ;;  %v4845_v22 = vld [vmem:[%s5747_s5 + $0xa0] sm:$0xff]  }
 0x456   :  { %3485 = vmatpush2.bf16.msra.mxu1 %v4795_v32  ;;  %3519 = vmatprep.subr.bf16.mxu0 %v4800_v33  ;;  %v4846_v32 = vld [vmem:[%s5747_s5 + $0xd8] sm:$0xff]   ;;  %v1919_v33 = vrot.slane %v5686_v31, %v5534_v1 }
 0x457   :  { %3486 = vmatprep.subr.bf16.mxu1 %v4803_v61  ;;  %v4847_v61 = vld [vmem:[%s5747_s5 + $0x98] sm:$0xff]  }
 0x459   :  { %3520 = vmatpush2.bf16.msra.mxu0 %v4798_v40 }
 0x45a   :  { %3487 = vmatpush2.bf16.msra.mxu1 %v4801_v48  ;;  %3521 = vmatprep.subr.bf16.mxu0 %v4806_v42  ;;  %v1124_v48 = vrot.slane %v5583_v25, %v5526_v35 }
 0x45b   :  { %3488 = vmatprep.subr.bf16.mxu1 %v4809_v43 }
 0x45c   :  { %v1591_v35 = vadd.f32 %v5563_v15, %v1124_v48 }
 0x45d   :  { %3522 = vmatpush2.bf16.msra.mxu0 %v4804_v36  ;;  %v4848_v36 = vld [vmem:[%s5747_s5 + $0xd0] sm:$0xff]  }
 0x45e   :  { %3489 = vmatpush2.bf16.msra.mxu1 %v4807_v11  ;;  %3523 = vmatprep.subr.bf16.mxu0 %v4812_v45  ;;  %v1128_v11 = vrot.slane %v5583_v25, %v5534_v1 }
 0x45f   :  { %4272 = vmatprep.subr.bf16.mxu1 %v4822_v46 }
 0x460   :  { %v5620_v26 = vpop.f32.mrf.mxu1  ;;  %v1593_v1 = vadd.f32 %v5565_v34, %v1128_v11  ;;  %v4853_v34 = vld [vmem:[%s5747_s5 + $0x80] sm:$0xff]  }
 0x461   :  { %3491 = vmatmul.mubr.bf16.vlgmr.msra.gmra.mxu1 %v5596_v41  ;;  %3524 = vmatpush2.bf16.msra.mxu0 %v4810_v49  ;;  %v3247_v40 = vadd.f32 %v5620_v26, %v1915_v30  ;;  %v4849_v49 = vld [vmem:[%s5747_s5 + $0x90] sm:$0xff]  }
 0x462   :  { %v5623_v57 = vpop.f32.mrf.mxu1  ;;  %3525 = vmatprep.subr.bf16.mxu0 %v4815_v24  ;;  %4273 = vmatpush3.bf16.msra.mxu1 %v4823_v50 }
 0x463   :  { %4274 = vmatprep.subr.bf16.mxu1 %v4824_v53  ;;  %v3249_v42 = vadd.f32 %v5623_v57, %v1919_v33 }
 0x464   :  { %v3250_v58 = vpop.f32.mrf.mxu1 }
 0x465   :  { %3526 = vmatpush2.bf16.msra.mxu0 %v4813_v44  ;;  %v4850_v44 = vld [vmem:[%s5747_s5 + $0xc8] sm:$0xff]  }
 0x466   :  { %v3251_v41 = vpop.f32.mrf.mxu1  ;;  %3527 = vmatprep.subr.bf16.mxu0 %v4818_v52  ;;  %4275 = vmatpush3.bf16.msra.mxu1 %v4825_v4  ;;  %v4851_v52 = vld [vmem:[%s5747_s5 + $0x88] sm:$0xff]  }
 0x467   :  { %4276 = vmatprep.subr.bf16.mxu1 %v4826_v56 }
 0x469   :  { %3528 = vmatpush2.bf16.msra.mxu0 %v4816_v59  ;;  %v4852_v59 = vld [vmem:[%s5747_s5 + $0xc0] sm:$0xff]  }
 0x46a   :  { %3529 = vmatprep.subr.bf16.mxu0 %v4821_v60  ;;  %4277 = vmatpush3.bf16.msra.mxu1 %v4827_v63 }
 0x46b   :  { %4278 = vmatprep.subr.bf16.mxu1 %v4828_v0 }
 0x46d   :  { %3530 = vmatpush2.bf16.msra.mxu0 %v4819_v5 }
 0x46e   :  { %4279 = vmatpush3.bf16.msra.mxu1 %v4829_v9 }
 0x46f   :  { %4280 = vmatprep.subr.bf16.mxu1 %v4830_v47 }
 0x470   :  { %3532 = vmatmul.mubr.bf16.vlgmr.msra.gmra.mxu0 %v5603_v38  ;;  %v3287_v12 = vpop.f32.mrf.mxu0  ;;  %v4838_v38 = vld [vmem:[%s5747_s5 + $0xf8] sm:$0xff]  }
 0x471   :  { %4294 = vmatprep.subr.bf16.mxu0 %v4838_v38  ;;  %v3288_v43 = vadd.f32 %v3287_v12, %v3247_v40  ;;  %v1927_v38 = vrot.slane %v5686_v31, %v5557_v14 }
 0x472   :  { %v3289_v13 = vpop.f32.mrf.mxu0  ;;  %4281 = vmatpush3.bf16.msra.mxu1 %v4831_v19  ;;  %4295 = vmatpush3.bf16.msra.mxu0 %v4839_v55 }
 0x473   :  { %4282 = vmatprep.subr.bf16.mxu1 %v4832_v51  ;;  %4296 = vmatprep.subr.bf16.mxu0 %v4840_v20  ;;  %v3290_v45 = vadd.f32 %v3289_v13, %v3249_v42 }
 0x474   :  { %v3291_v18 = vpop.f32.mrf.mxu0 }
 0x476   :  { %v3292_v54 = vpop.f32.mrf.mxu0  ;;  %4283 = vmatpush3.bf16.msra.mxu1 %v4833_v16  ;;  %4297 = vmatpush3.bf16.msra.mxu0 %v4841_v23 }
 0x477   :  { %4284 = vmatprep.subr.bf16.mxu1 %v4834_v17  ;;  %4298 = vmatprep.subr.bf16.mxu0 %v4842_v27 }
 0x47a   :  { %4285 = vmatpush3.bf16.msra.mxu1 %v4835_v3  ;;  %4299 = vmatpush3.bf16.msra.mxu0 %v4843_v29  ;;  %v1923_v3 = vrot.slane %v5686_v31, %v5552_v28 }
 0x47b   :  { %4286 = vmatprep.subr.bf16.mxu1 %v4836_v21  ;;  %4300 = vmatprep.subr.bf16.mxu0 %v4844_v62 }
 0x47e   :  { %4287 = vmatpush3.bf16.msra.mxu1 %v4837_v8  ;;  %4301 = vmatpush3.bf16.msra.mxu0 %v4845_v22 }
 0x47f   :  { %4302 = vmatprep.subr.bf16.mxu0 %v4846_v32 }
 0x482   :  { %4303 = vmatpush3.bf16.msra.mxu0 %v4847_v61 }
 0x483   :  { %4304 = vmatprep.subr.bf16.mxu0 %v4848_v36 }
 0x486   :  { %4305 = vmatpush3.bf16.msra.mxu0 %v4849_v49 }
 0x487   :  { %4306 = vmatprep.subr.bf16.mxu0 %v4850_v44 }
 0x48a   :  { %4307 = vmatpush3.bf16.msra.mxu0 %v4851_v52 }
 0x48b   :  { %4308 = vmatprep.subr.bf16.mxu0 %v4852_v59 }
 0x48e   :  { %4309 = vmatpush3.bf16.msra.mxu0 %v4853_v34 }
 0x4a0   :  { %v3328_v10 = vpop.f32.mrf.mxu1 }
 0x4a1   :  { %v3329_v46 = vadd.f32 %v3328_v10, %v3288_v43 }
 0x4a2   :  { %v3330_v2 = vpop.f32.mrf.mxu1 }
 0x4a3   :  { %v3331_v50 = vadd.f32 %v3330_v2, %v3290_v45 }
 0x4a4   :  { %v3332_v7 = vpop.f32.mrf.mxu1 }
 0x4a6   :  { %v3333_v6 = vpop.f32.mrf.mxu1 }
 0x4b0   :  { %v3369_v24 = vpop.f32.mrf.mxu0 }
 0x4b1   :  { %v3370_v53 = vadd.f32 %v3369_v24, %v3329_v46 }
 0x4b2   :  { %v3371_v26 = vpop.f32.mrf.mxu0 }
 0x4b3   :  { %v3540_v25 = vadd.f32 %v3370_v53, %v1591_v35  ;;  %v3372_v57 = vadd.f32 %v3371_v26, %v3331_v50 }
 0x4b4   :  { %v3373_v4 = vpop.f32.mrf.mxu0 }
 0x4b5   :  { %v3541_v56 = vadd.f32 %v3372_v57, %v1593_v1  ;;  %v3544_v15 = vmax.f32 %v3540_v25, 0.0 }
 0x4b6   :  { %v3374_v58 = vpop.f32.mrf.mxu0 }
 0x4b7   :  { %v3545_v41 = vmax.f32 %v3541_v56, 0.0  ;;  %v3548_v63 = vpack.c.bf16 %v3544_v15, %v3544_v15 }
 0x4b9   :  { %v3549_v60 = vpack.c.bf16 %v3545_v41, %v3545_v41 }
 0x4bb   :  { %3847 = vmatprep.mubr.bf16.mxu1 %v3549_v60 }
 0x4bc   :  { %3848 = vmatmul.mubr.bf16.vlgmr.msra.gmra.mxu1 %v3548_v63 }
 0x4e1   :  { %v3410_v0 = vpop.f32.mrf.mxu1 }
 0x4e2   :  { %v3411_v55 = vadd.f32 %v3410_v0, %v1923_v3 }
 0x4e3   :  { %v3412_v5 = vpop.f32.mrf.mxu1 }
 0x4e4   :  { %v3413_v20 = vadd.f32 %v3412_v5, %v1927_v38 }
 0x4e5   :  { %v3414_v9 = vpop.f32.mrf.mxu1 }
 0x4e7   :  { %v3415_v47 = vpop.f32.mrf.mxu1 }
 0x4f0   :  { %v3451_v19 = vpop.f32.mrf.mxu0 }
 0x4f1   :  { %v3452_v21 = vadd.f32 %v3451_v19, %v3411_v55 }
 0x4f2   :  { %v3453_v51 = vpop.f32.mrf.mxu0 }
 0x4f3   :  { %v3454_v8 = vadd.f32 %v3453_v51, %v3413_v20 }
 0x4f4   :  { %v3455_v12 = vpop.f32.mrf.mxu0 }
 0x4f6   :  { %v3456_v13 = vpop.f32.mrf.mxu0 }
 0x521   :  { %v3492_v16 = vpop.f32.mrf.mxu1 }
 0x522   :  { %v3493_v23 = vadd.f32 %v3492_v16, %v3452_v21 }
 0x523   :  { %v3494_v17 = vpop.f32.mrf.mxu1 }
 0x524   :  { %v3495_v2 = vadd.f32 %v3494_v17, %v3454_v8 }
 0x525   :  { %v3496_v18 = vpop.f32.mrf.mxu1 }
 0x527   :  { %v3497_v54 = vpop.f32.mrf.mxu1 }
 0x530   :  { %v3533_v10 = vpop.f32.mrf.mxu0 }
 0x531   :  { %v3534_v27 = vadd.f32 %v3533_v10, %v3493_v23 }
 0x532   :  { %v3535_v29 = vpop.f32.mrf.mxu0 }
 0x533   :  { %v3542_v7 = vadd.f32 %v3534_v27, %v5589_v37  ;;  %v3536_v6 = vadd.f32 %v3535_v29, %v3495_v2  ;;  %v4225_v37 = vld [vmem:[%s5748_s6 + $0x10] ss:$0 sm:$0xff] }
 0x534   :  { %v3537_v62 = vpop.f32.mrf.mxu0 }
 0x535   :  { %v3543_v30 = vadd.f32 %v3536_v6, %v5591_v39  ;;  %v3546_v28 = vmax.f32 %v3542_v7, 0.0 }
 0x536   :  { %v3538_v22 = vpop.f32.mrf.mxu0 }
 0x537   :  { %v3547_v32 = vmax.f32 %v3543_v30, 0.0  ;;  %v3550_v14 = vpack.c.bf16 %v3546_v28, %v3546_v28 }
 0x539   :  { %v3551_v33 = vpack.c.bf16 %v3547_v32, %v3547_v32 }
 0x53b   :  { %3887 = vmatprep.mubr.bf16.mxu0 %v3551_v33 }
 0x53c   :  { %3888 = vmatmul.mubr.bf16.vlgmr.msra.gmra.mxu0 %v3550_v14 }
 0x57c   :  { %v4288_v31 = vpop.f32.mrf.mxu1 }
 0x57e   :  { %v4289_v61 = vpop.f32.mrf.mxu1 }
 0x57f   :  { %v4290_v40 = vadd.f32 %v4289_v61, %v4288_v31 }
 0x580   :  { %v4291_v48 = vpop.f32.mrf.mxu1 }
 0x581   :  { %v3850_v11 = vadd.f32 %v4290_v40, %v4225_v37 }
 0x582   :  { %v4292_v42 = vpop.f32.mrf.mxu1 }
 0x5fc   :  { %v4310_v43 = vpop.f32.mrf.mxu0 }
 0x5fe   :  { %v4311_v36 = vpop.f32.mrf.mxu0 }
 0x5ff   :  { %v4312_v39 = vadd.f32 %v4311_v36, %v4310_v43 }
 0x600   :  { %v4313_v45 = vpop.f32.mrf.mxu0 }
 0x601   :  { %v3890_v46 = vadd.f32 %v4312_v39, %v3850_v11 }
 0x602   :  { %v4314_v49 = vpop.f32.mrf.mxu0 }
 0x603   :  { %3895 = vst [vmem:[%s5749_s7] sm:$0xff] %v3890_v46 }
 0x604   :  { %3900 = vsyncpa [#allocation4], 1 }

</bundles_post_ra>
